<compile_context>
chip_gen: v6e
topology: v6e:2x2x1
jax: 0.10.0
libtpu: 0.0.40
codegen_flags: <defaults>
</compile_context>

<pallas_src>
import jax
import jax.numpy as jnp
from jax import lax
from jax.experimental import pallas as pl
from jax.experimental.pallas import tpu as pltpu


# ----------------------------------------------------------------------------
# Kernels
# ----------------------------------------------------------------------------
def proj_kernel(x_ref, w_ref, b_ref, o_ref):
    # x_ref: (TM, E), w_ref: (E, 6H), b_ref: (1, 6H), o_ref: (TM, 6H)
    o_ref[...] = (
        jnp.dot(x_ref[...], w_ref[...], preferred_element_type=jnp.float32)
        + b_ref[...]
    ).astype(o_ref.dtype)


def make_gru_kernel(T, H):
    """Recurrent kernel processing T timesteps of one direction per grid step."""

    def gru_kernel(gi_ref, whh_ref, bhh_ref, out_ref, hn_ref, h_scratch):
        # gi_ref : (T, B, 3H)  precomputed x @ w_ih.T + b_ih for this
        #                      (direction, time-chunk)
        # whh_ref: (H, 3H)     w_hh.T for this direction
        # bhh_ref: (1, 3H)
        # out_ref: (T, B, H)   slice of the (S, B, 2H) output (lane block = dir)
        # hn_ref : (B, H)      final hidden for this direction
        # h_scratch: (B, H)    recurrent state (VMEM, persists across chunks)
        d = pl.program_id(0)   # direction
        c = pl.program_id(1)   # time-chunk index (processing order)

        @pl.when(c == 0)
        def _():
            h_scratch[...] = jnp.zeros_like(h_scratch)

        whh = whh_ref[...]
        bhh = bhh_ref[...]

        def step(i, h):
            # local index inside the chunk: i for fwd, T-1-i for bwd
            lt = i + d * (T - 1 - 2 * i)
            gi_t = gi_ref[lt]                                   # (B, 3H)
            gh = jnp.dot(h, whh, preferred_element_type=jnp.float32) + bhh
            r = jax.nn.sigmoid(gi_t[:, 0:H] + gh[:, 0:H])
            z = jax.nn.sigmoid(gi_t[:, H:2 * H] + gh[:, H:2 * H])
            n = jnp.tanh(gi_t[:, 2 * H:3 * H] + r * gh[:, 2 * H:3 * H])
            hy = n + z * (h - n)
            out_ref[lt] = hy.astype(out_ref.dtype)
            return hy

        h = lax.fori_loop(0, T, step, h_scratch[...], unroll=True)
        h_scratch[...] = h
        hn_ref[...] = h.astype(hn_ref.dtype)   # last writeback = final hidden

    return gru_kernel


# ----------------------------------------------------------------------------
# Wrapper
# ----------------------------------------------------------------------------
def bi_gru_forward(x, w_ih, w_hh, b_ih, b_hh, *, time_chunk=16, proj_rows=512):
    """Bidirectional single-layer GRU with zero initial hidden state.

    x    : (S, B, E) float32
    w_ih : (2, 3H, E)
    w_hh : (2, 3H, H)
    b_ih : (2, 3H)
    b_hh : (2, 3H)
    returns (output (S, B, 2H), hidden (2, B, H))
    """
    S, B, E = x.shape
    H = w_hh.shape[-1]
    # TODO(synk): pad H (and each gate) up to a multiple of 128 to support
    # arbitrary d_rnn; for now require lane-aligned gates.
    assert H % 128 == 0, "d_rnn must be a multiple of 128 (TPU lane width)"

    # Pick a time-chunk size T that divides S.
    T = 1
    for cand in (time_chunk, 16, 8, 4, 2, 1):
        if cand <= S and S % cand == 0:
            T = cand
            break
    NC = S // T

    # ---- fused input projection for both directions ------------------------
    # W: (E, 6H) = [w_ih_fwd.T | w_ih_bwd.T], bias: (1, 6H)
    w_all = jnp.concatenate(
        [jnp.transpose(w_ih[0]), jnp.transpose(w_ih[1])], axis=1)
    b_all = jnp.concatenate([b_ih[0], b_ih[1]]).reshape(1, 6 * H)

    SB = S * B
    TM = min(proj_rows, SB)
    x_flat = x.reshape(SB, E)

    gi_flat = pl.pallas_call(
        proj_kernel,
        out_shape=jax.ShapeDtypeStruct((SB, 6 * H), jnp.float32),
        grid_spec=pltpu.PrefetchScalarGridSpec(
            num_scalar_prefetch=0,
            grid=(pl.cdiv(SB, TM),),
            in_specs=[
                pl.BlockSpec((TM, E), lambda m: (m, 0)),
                pl.BlockSpec((E, 6 * H), lambda m: (0, 0)),
                pl.BlockSpec((1, 6 * H), lambda m: (0, 0)),
            ],
            out_specs=pl.BlockSpec((TM, 6 * H), lambda m: (m, 0)),
        ),
        compiler_params=pltpu.CompilerParams(
            dimension_semantics=("parallel",)),
    )(x_flat, w_all, b_all)
    gi = gi_flat.reshape(S, B, 6 * H)    # lanes [0:3H] fwd, [3H:6H] bwd

    # ---- recurrent sweep ----------------------------------------------------
    w_hh_t = jnp.transpose(w_hh, (0, 2, 1))          # (2, H, 3H)
    b_hh_r = b_hh.reshape(2, 1, 3 * H)

    def tc_idx(d, c):
        # time-chunk index in the array: c for fwd (d=0), NC-1-c for bwd (d=1)
        return c + d * (NC - 1 - 2 * c)

    output, h_n = pl.pallas_call(
        make_gru_kernel(T, H),
        out_shape=(
            jax.ShapeDtypeStruct((S, B, 2 * H), jnp.float32),
            jax.ShapeDtypeStruct((2, B, H), jnp.float32),
        ),
        grid_spec=pltpu.PrefetchScalarGridSpec(
            num_scalar_prefetch=0,
            grid=(2, NC),
            in_specs=[
                pl.BlockSpec((T, B, 3 * H),
                             lambda d, c: (tc_idx(d, c), 0, d)),
                pl.BlockSpec((None, H, 3 * H), lambda d, c: (d, 0, 0)),
                pl.BlockSpec((None, 1, 3 * H), lambda d, c: (d, 0, 0)),
            ],
            out_specs=[
                pl.BlockSpec((T, B, H),
                             lambda d, c: (tc_idx(d, c), 0, d)),
                pl.BlockSpec((None, B, H), lambda d, c: (d, 0, 0)),
            ],
            scratch_shapes=[pltpu.VMEM((B, H), jnp.float32)],
        ),
        compiler_params=pltpu.CompilerParams(
            dimension_semantics=("parallel", "arbitrary")),
    )(gi, w_hh_t, b_hh_r)

    return output, h_n


# ----------------------------------------------------------------------------
# Pure-JAX reference (mirrors the PyTorch `gru` / `gru_cell` exactly)
# ----------------------------------------------------------------------------
def bi_gru_reference(x, w_ih, w_hh, b_ih, b_hh):
    S, B, E = x.shape
    H = w_hh.shape[-1]

    def run_dir(d, reverse):
        gi = x.reshape(-1, E) @ w_ih[d].T + b_ih[d]
        gi = gi.reshape(S, B, 3 * H)
        if reverse:
            gi = gi[::-1]

        def step(h, gi_t):
            gh = h @ w_hh[d].T + b_hh[d]
            i_r, i_i, i_n = jnp.split(gi_t, 3, axis=1)
            h_r, h_i, h_n = jnp.split(gh, 3, axis=1)
            r = jax.nn.sigmoid(i_r + h_r)
            z = jax.nn.sigmoid(i_i + h_i)
            n = jnp.tanh(i_n + r * h_n)
            hy = n + z * (h - n)
            return hy, hy

        h0 = jnp.zeros((B, H), jnp.float32)
        h_last, outs = jax.lax.scan(step, h0, gi)
        if reverse:
            outs = outs[::-1]
        return outs, h_last

    o0, h0 = run_dir(0, False)
    o1, h1 = run_dir(1, True)
    return jnp.concatenate([o0, o1], axis=-1), jnp.stack([h0, h1], axis=0)


# ----------------------------------------------------------------------------
if __name__ == "__main__":
    S, B, E, H = 32, 8, 64, 128   # seq_len, batch, d_emb, d_rnn

    key = jax.random.PRNGKey(0)
    k_x, k_wih, k_whh, k_bih, k_bhh = jax.random.split(key, 5)

    # nn.GRU default init: U(-1/sqrt(H), 1/sqrt(H)), deterministic here.
    bound = 1.0 / (H ** 0.5)
    x = jax.random.normal(k_x, (S, B, E), dtype=jnp.float32)
    w_ih = jax.random.uniform(k_wih, (2, 3 * H, E), jnp.float32, -bound, bound)
    w_hh = jax.random.uniform(k_whh, (2, 3 * H, H), jnp.float32, -bound, bound)
    b_ih = jax.random.uniform(k_bih, (2, 3 * H), jnp.float32, -bound, bound)
    b_hh = jax.random.uniform(k_bhh, (2, 3 * H), jnp.float32, -bound, bound)

    output, hidden = jax.jit(bi_gru_forward)(x, w_ih, w_hh, b_ih, b_hh)
    jax.block_until_ready((output, hidden))

    # correctness check against a pure-JAX reference of the PyTorch code
    ref_out, ref_hid = bi_gru_reference(x, w_ih, w_hh, b_ih, b_hh)
    assert output.shape == (S, B, 2 * H) and hidden.shape == (2, B, H)
    assert jnp.allclose(output, ref_out, rtol=1e-3, atol=1e-3), \
        float(jnp.max(jnp.abs(output - ref_out)))
    assert jnp.allclose(hidden, ref_hid, rtol=1e-3, atol=1e-3), \
        float(jnp.max(jnp.abs(hidden - ref_hid)))

    print("KERNEL_OK")
</pallas_src>

<mosaic_0001>
module attributes {stable_mosaic.version = 11 : i64} {
  func.func @proj_kernel(%arg0: i32, %arg1: memref<256x64xf32, #tpu.memory_space<vmem>>, %arg2: memref<64x768xf32, #tpu.memory_space<vmem>>, %arg3: memref<1x768xf32, #tpu.memory_space<vmem>>, %arg4: memref<256x768xf32, #tpu.memory_space<vmem>>) attributes {dimension_semantics = [#tpu.dimension_semantics<parallel>], iteration_bounds = array<i64: 1>, scalar_prefetch = 0 : i64, scratch_operands = 0 : i64, tpu.core_type = #tpu.core_type<tc>, window_params = [{transform_indices = @transform_0, window_bounds = array<i64: 256, 64>}, {pipeline_mode = #tpu.pipeline_mode<synchronous>, transform_indices = @transform_1, window_bounds = array<i64: 64, 768>}, {pipeline_mode = #tpu.pipeline_mode<synchronous>, transform_indices = @transform_2, window_bounds = array<i64: 1, 768>}, {transform_indices = @transform_3, window_bounds = array<i64: 256, 768>}]} {
    %c0 = arith.constant 0 : index
    %c0_0 = arith.constant 0 : index
    %0 = vector.load %arg1[%c0, %c0_0] : memref<256x64xf32, #tpu.memory_space<vmem>>, vector<256x64xf32>
    %c0_1 = arith.constant 0 : index
    %c0_2 = arith.constant 0 : index
    %1 = vector.load %arg2[%c0_1, %c0_2] : memref<64x768xf32, #tpu.memory_space<vmem>>, vector<64x768xf32>
    %cst = arith.constant dense<0.000000e+00> : vector<256x768xf32>
    %2 = tpu.matmul %0, %1, %cst {dimension_numbers = #tpu.dot_dimension_numbers<[1], [0], [0], [1], [0, 0, 1, 1], [], []>} : vector<256x64xf32>, vector<64x768xf32>, vector<256x768xf32> -> vector<256x768xf32>
    %c0_3 = arith.constant 0 : index
    %c0_4 = arith.constant 0 : index
    %3 = vector.load %arg3[%c0_3, %c0_4] : memref<1x768xf32, #tpu.memory_space<vmem>>, vector<1x768xf32>
    %4 = vector.broadcast %3 : vector<1x768xf32> to vector<256x768xf32>
    %5 = arith.addf %2, %4 : vector<256x768xf32>
    %c0_5 = arith.constant 0 : index
    %c0_6 = arith.constant 0 : index
    %6 = vector.load %arg4[%c0_5, %c0_6] : memref<256x768xf32, #tpu.memory_space<vmem>>, vector<256x768xf32>
    tpu.vector_store %arg4[%c0_5, %c0_6], %5 {strides = array<i32>} : memref<256x768xf32, #tpu.memory_space<vmem>>, vector<256x768xf32>,
    return
  }
  func.func @transform_0(%arg0: i32) -> (i32, i32) {
    %c0_i32 = arith.constant 0 : i32
    %c0_i32_0 = arith.constant 0 : i32
    return %arg0, %c0_i32 : i32, i32
  }
  func.func @transform_1(%arg0: i32) -> (i32, i32) {
    %c0_i32 = arith.constant 0 : i32
    %c0_i32_0 = arith.constant 0 : i32
    %c0_i32_1 = arith.constant 0 : i32
    return %c0_i32, %c0_i32_0 : i32, i32
  }
  func.func @transform_2(%arg0: i32) -> (i32, i32) {
    %c0_i32 = arith.constant 0 : i32
    %c0_i32_0 = arith.constant 0 : i32
    %c0_i32_1 = arith.constant 0 : i32
    return %c0_i32, %c0_i32_0 : i32, i32
  }
  func.func @transform_3(%arg0: i32) -> (i32, i32) {
    %c0_i32 = arith.constant 0 : i32
    %c0_i32_0 = arith.constant 0 : i32
    return %arg0, %c0_i32 : i32, i32
  }
}

module attributes {stable_mosaic.version = 11 : i64} {
  func.func @gru_kernel(%arg0: i32, %arg1: i32, %arg2: memref<16x8x384xf32, #tpu.memory_space<vmem>>, %arg3: memref<1x128x384xf32, #tpu.memory_space<vmem>>, %arg4: memref<1x1x384xf32, #tpu.memory_space<vmem>>, %arg5: memref<16x8x128xf32, #tpu.memory_space<vmem>>, %arg6: memref<1x8x128xf32, #tpu.memory_space<vmem>>, %arg7: memref<8x128xf32, #tpu.memory_space<vmem>>) attributes {dimension_semantics = [#tpu.dimension_semantics<parallel>, #tpu.dimension_semantics<arbitrary>], iteration_bounds = array<i64: 2, 2>, scalar_prefetch = 0 : i64, scratch_operands = 1 : i64, tpu.core_type = #tpu.core_type<tc>, window_params = [{transform_indices = @transform_0, window_bounds = array<i64: 16, 8, 384>}, {transform_indices = @transform_1, window_bounds = array<i64: 1, 128, 384>}, {transform_indices = @transform_2, window_bounds = array<i64: 1, 1, 384>}, {transform_indices = @transform_3, window_bounds = array<i64: 16, 8, 128>}, {transform_indices = @transform_4, window_bounds = array<i64: 1, 8, 128>}]} {
    %c0_i32 = arith.constant 0 : i32
    %0 = arith.cmpi eq, %arg1, %c0_i32 : i32
    %1 = arith.extui %0 : i1 to i32
    %c0_i32_0 = arith.constant 0 : i32
    %2 = arith.cmpi ne, %1, %c0_i32_0 : i32
    scf.if %2 {
      %cst_157 = arith.constant 0.000000e+00 : f32
      %620 = vector.broadcast %cst_157 : f32 to vector<8x128xf32>
      %c0_158 = arith.constant 0 : index
      %c0_159 = arith.constant 0 : index
      %621 = vector.load %arg7[%c0_158, %c0_159] : memref<8x128xf32, #tpu.memory_space<vmem>>, vector<8x128xf32>
      tpu.vector_store %arg7[%c0_158, %c0_159], %620 {strides = array<i32>} : memref<8x128xf32, #tpu.memory_space<vmem>>, vector<8x128xf32>,
    } else {
    }
    %c0 = arith.constant 0 : index
    %c0_1 = arith.constant 0 : index
    %c0_2 = arith.constant 0 : index
    %3 = vector.load %arg3[%c0, %c0_1, %c0_2] : memref<1x128x384xf32, #tpu.memory_space<vmem>>, vector<1x128x384xf32>
    %4 = vector.shape_cast %3 : vector<1x128x384xf32> to vector<128x384xf32>
    %c0_3 = arith.constant 0 : index
    %c0_4 = arith.constant 0 : index
    %c0_5 = arith.constant 0 : index
    %5 = vector.load %arg4[%c0_3, %c0_4, %c0_5] : memref<1x1x384xf32, #tpu.memory_space<vmem>>, vector<1x1x384xf32>
    %6 = vector.shape_cast %5 : vector<1x1x384xf32> to vector<1x384xf32>
    %c0_6 = arith.constant 0 : index
    %c0_7 = arith.constant 0 : index
    %7 = vector.load %arg7[%c0_6, %c0_7] : memref<8x128xf32, #tpu.memory_space<vmem>>, vector<8x128xf32>
    %c0_i32_8 = arith.constant 0 : i32
    %c2_i32 = arith.constant 2 : i32
    %8 = arith.muli %c2_i32, %c0_i32_8 : i32
    %c15_i32 = arith.constant 15 : i32
    %9 = arith.subi %c15_i32, %8 : i32
    %10 = arith.muli %arg0, %9 : i32
    %11 = arith.addi %c0_i32_8, %10 : i32
    %12 = arith.index_cast %11 : i32 to index
    %c0_9 = arith.constant 0 : index
    %c0_10 = arith.constant 0 : index
    %13 = vector.load %arg2[%12, %c0_9, %c0_10] : memref<16x8x384xf32, #tpu.memory_space<vmem>>, vector<1x8x384xf32>
    %14 = vector.shape_cast %13 : vector<1x8x384xf32> to vector<8x384xf32>
    %cst = arith.constant dense<0.000000e+00> : vector<8x384xf32>
    %15 = tpu.matmul %7, %4, %cst {dimension_numbers = #tpu.dot_dimension_numbers<[1], [0], [0], [1], [0, 0, 1, 1], [], []>} : vector<8x128xf32>, vector<128x384xf32>, vector<8x384xf32> -> vector<8x384xf32>
    %16 = vector.broadcast %6 : vector<1x384xf32> to vector<8x384xf32>
    %17 = arith.addf %15, %16 : vector<8x384xf32>
    %18 = vector.extract_strided_slice %14 {offsets = [0, 0], sizes = [8, 128], strides = [1, 1]} : vector<8x384xf32> to vector<8x128xf32>
    %19 = vector.extract_strided_slice %17 {offsets = [0, 0], sizes = [8, 128], strides = [1, 1]} : vector<8x384xf32> to vector<8x128xf32>
    %20 = arith.addf %18, %19 : vector<8x128xf32>
    %21 = arith.negf %20 : vector<8x128xf32>
    %22 = math.exp %21 : vector<8x128xf32>
    %cst_11 = arith.constant 1.000000e+00 : f32
    %23 = vector.broadcast %cst_11 : f32 to vector<8x128xf32>
    %24 = arith.addf %23, %22 : vector<8x128xf32>
    %25 = arith.divf %23, %24 : vector<8x128xf32>
    %26 = vector.extract_strided_slice %14 {offsets = [0, 128], sizes = [8, 128], strides = [1, 1]} : vector<8x384xf32> to vector<8x128xf32>
    %27 = vector.extract_strided_slice %17 {offsets = [0, 128], sizes = [8, 128], strides = [1, 1]} : vector<8x384xf32> to vector<8x128xf32>
    %28 = arith.addf %26, %27 : vector<8x128xf32>
    %29 = arith.negf %28 : vector<8x128xf32>
    %30 = math.exp %29 : vector<8x128xf32>
    %cst_12 = arith.constant 1.000000e+00 : f32
    %31 = vector.broadcast %cst_12 : f32 to vector<8x128xf32>
    %32 = arith.addf %31, %30 : vector<8x128xf32>
    %33 = arith.divf %31, %32 : vector<8x128xf32>
    %34 = vector.extract_strided_slice %14 {offsets = [0, 256], sizes = [8, 128], strides = [1, 1]} : vector<8x384xf32> to vector<8x128xf32>
    %35 = vector.extract_strided_slice %17 {offsets = [0, 256], sizes = [8, 128], strides = [1, 1]} : vector<8x384xf32> to vector<8x128xf32>
    %36 = arith.mulf %25, %35 : vector<8x128xf32>
    %37 = arith.addf %34, %36 : vector<8x128xf32>
    %38 = math.tanh %37 : vector<8x128xf32>
    %39 = arith.subf %7, %38 : vector<8x128xf32>
    %40 = arith.mulf %33, %39 : vector<8x128xf32>
    %41 = arith.addf %38, %40 : vector<8x128xf32>
    %42 = arith.index_cast %11 : i32 to index
    %c0_13 = arith.constant 0 : index
    %c0_14 = arith.constant 0 : index
    %43 = vector.load %arg5[%42, %c0_13, %c0_14] : memref<16x8x128xf32, #tpu.memory_space<vmem>>, vector<1x8x128xf32>
    %44 = vector.shape_cast %43 : vector<1x8x128xf32> to vector<8x128xf32>
    %45 = vector.shape_cast %41 : vector<8x128xf32> to vector<1x8x128xf32>
    tpu.vector_store %arg5[%42, %c0_13, %c0_14], %45 {strides = array<i32>} : memref<16x8x128xf32, #tpu.memory_space<vmem>>, vector<1x8x128xf32>,
    %c1_i32 = arith.constant 1 : i32
    %c2_i32_15 = arith.constant 2 : i32
    %46 = arith.muli %c2_i32_15, %c1_i32 : i32
    %c15_i32_16 = arith.constant 15 : i32
    %47 = arith.subi %c15_i32_16, %46 : i32
    %48 = arith.muli %arg0, %47 : i32
    %49 = arith.addi %c1_i32, %48 : i32
    %50 = arith.index_cast %49 : i32 to index
    %c0_17 = arith.constant 0 : index
    %c0_18 = arith.constant 0 : index
    %51 = vector.load %arg2[%50, %c0_17, %c0_18] : memref<16x8x384xf32, #tpu.memory_space<vmem>>, vector<1x8x384xf32>
    %52 = vector.shape_cast %51 : vector<1x8x384xf32> to vector<8x384xf32>
    %cst_19 = arith.constant dense<0.000000e+00> : vector<8x384xf32>
    %53 = tpu.matmul %41, %4, %cst_19 {dimension_numbers = #tpu.dot_dimension_numbers<[1], [0], [0], [1], [0, 0, 1, 1], [], []>} : vector<8x128xf32>, vector<128x384xf32>, vector<8x384xf32> -> vector<8x384xf32>
    %54 = vector.broadcast %6 : vector<1x384xf32> to vector<8x384xf32>
    %55 = arith.addf %53, %54 : vector<8x384xf32>
    %56 = vector.extract_strided_slice %52 {offsets = [0, 0], sizes = [8, 128], strides = [1, 1]} : vector<8x384xf32> to vector<8x128xf32>
    %57 = vector.extract_strided_slice %55 {offsets = [0, 0], sizes = [8, 128], strides = [1, 1]} : vector<8x384xf32> to vector<8x128xf32>
    %58 = arith.addf %56, %57 : vector<8x128xf32>
    %59 = arith.negf %58 : vector<8x128xf32>
    %60 = math.exp %59 : vector<8x128xf32>
    %cst_20 = arith.constant 1.000000e+00 : f32
    %61 = vector.broadcast %cst_20 : f32 to vector<8x128xf32>
    %62 = arith.addf %61, %60 : vector<8x128xf32>
    %63 = arith.divf %61, %62 : vector<8x128xf32>
    %64 = vector.extract_strided_slice %52 {offsets = [0, 128], sizes = [8, 128], strides = [1, 1]} : vector<8x384xf32> to vector<8x128xf32>
    %65 = vector.extract_strided_slice %55 {offsets = [0, 128], sizes = [8, 128], strides = [1, 1]} : vector<8x384xf32> to vector<8x128xf32>
    %66 = arith.addf %64, %65 : vector<8x128xf32>
    %67 = arith.negf %66 : vector<8x128xf32>
    %68 = math.exp %67 : vector<8x128xf32>
    %cst_21 = arith.constant 1.000000e+00 : f32
    %69 = vector.broadcast %cst_21 : f32 to vector<8x128xf32>
    %70 = arith.addf %69, %68 : vector<8x128xf32>
    %71 = arith.divf %69, %70 : vector<8x128xf32>
    %72 = vector.extract_strided_slice %52 {offsets = [0, 256], sizes = [8, 128], strides = [1, 1]} : vector<8x384xf32> to vector<8x128xf32>
    %73 = vector.extract_strided_slice %55 {offsets = [0, 256], sizes = [8, 128], strides = [1, 1]} : vector<8x384xf32> to vector<8x128xf32>
    %74 = arith.mulf %63, %73 : vector<8x128xf32>
    %75 = arith.addf %72, %74 : vector<8x128xf32>
    %76 = math.tanh %75 : vector<8x128xf32>
    %77 = arith.subf %41, %76 : vector<8x128xf32>
    %78 = arith.mulf %71, %77 : vector<8x128xf32>
    %79 = arith.addf %76, %78 : vector<8x128xf32>
    %80 = arith.index_cast %49 : i32 to index
    %c0_22 = arith.constant 0 : index
    %c0_23 = arith.constant 0 : index
    %81 = vector.load %arg5[%80, %c0_22, %c0_23] : memref<16x8x128xf32, #tpu.memory_space<vmem>>, vector<1x8x128xf32>
    %82 = vector.shape_cast %81 : vector<1x8x128xf32> to vector<8x128xf32>
    %83 = vector.shape_cast %79 : vector<8x128xf32> to vector<1x8x128xf32>
    tpu.vector_store %arg5[%80, %c0_22, %c0_23], %83 {strides = array<i32>} : memref<16x8x128xf32, #tpu.memory_space<vmem>>, vector<1x8x128xf32>,
    %c2_i32_24 = arith.constant 2 : i32
    %c2_i32_25 = arith.constant 2 : i32
    %84 = arith.muli %c2_i32_25, %c2_i32_24 : i32
    %c15_i32_26 = arith.constant 15 : i32
    %85 = arith.subi %c15_i32_26, %84 : i32
    %86 = arith.muli %arg0, %85 : i32
    %87 = arith.addi %c2_i32_24, %86 : i32
    %88 = arith.index_cast %87 : i32 to index
    %c0_27 = arith.constant 0 : index
    %c0_28 = arith.constant 0 : index
    %89 = vector.load %arg2[%88, %c0_27, %c0_28] : memref<16x8x384xf32, #tpu.memory_space<vmem>>, vector<1x8x384xf32>
    %90 = vector.shape_cast %89 : vector<1x8x384xf32> to vector<8x384xf32>
    %cst_29 = arith.constant dense<0.000000e+00> : vector<8x384xf32>
    %91 = tpu.matmul %79, %4, %cst_29 {dimension_numbers = #tpu.dot_dimension_numbers<[1], [0], [0], [1], [0, 0, 1, 1], [], []>} : vector<8x128xf32>, vector<128x384xf32>, vector<8x384xf32> -> vector<8x384xf32>
    %92 = vector.broadcast %6 : vector<1x384xf32> to vector<8x384xf32>
    %93 = arith.addf %91, %92 : vector<8x384xf32>
    %94 = vector.extract_strided_slice %90 {offsets = [0, 0], sizes = [8, 128], strides = [1, 1]} : vector<8x384xf32> to vector<8x128xf32>
    %95 = vector.extract_strided_slice %93 {offsets = [0, 0], sizes = [8, 128], strides = [1, 1]} : vector<8x384xf32> to vector<8x128xf32>
    %96 = arith.addf %94, %95 : vector<8x128xf32>
    %97 = arith.negf %96 : vector<8x128xf32>
    %98 = math.exp %97 : vector<8x128xf32>
    %cst_30 = arith.constant 1.000000e+00 : f32
    %99 = vector.broadcast %cst_30 : f32 to vector<8x128xf32>
    %100 = arith.addf %99, %98 : vector<8x128xf32>
    %101 = arith.divf %99, %100 : vector<8x128xf32>
    %102 = vector.extract_strided_slice %90 {offsets = [0, 128], sizes = [8, 128], strides = [1, 1]} : vector<8x384xf32> to vector<8x128xf32>
    %103 = vector.extract_strided_slice %93 {offsets = [0, 128], sizes = [8, 128], strides = [1, 1]} : vector<8x384xf32> to vector<8x128xf32>
    %104 = arith.addf %102, %103 : vector<8x128xf32>
    %105 = arith.negf %104 : vector<8x128xf32>
    %106 = math.exp %105 : vector<8x128xf32>
    %cst_31 = arith.constant 1.000000e+00 : f32
    %107 = vector.broadcast %cst_31 : f32 to vector<8x128xf32>
    %108 = arith.addf %107, %106 : vector<8x128xf32>
    %109 = arith.divf %107, %108 : vector<8x128xf32>
    %110 = vector.extract_strided_slice %90 {offsets = [0, 256], sizes = [8, 128], strides = [1, 1]} : vector<8x384xf32> to vector<8x128xf32>
    %111 = vector.extract_strided_slice %93 {offsets = [0, 256], sizes = [8, 128], strides = [1, 1]} : vector<8x384xf32> to vector<8x128xf32>
    %112 = arith.mulf %101, %111 : vector<8x128xf32>
    %113 = arith.addf %110, %112 : vector<8x128xf32>
    %114 = math.tanh %113 : vector<8x128xf32>
    %115 = arith.subf %79, %114 : vector<8x128xf32>
    %116 = arith.mulf %109, %115 : vector<8x128xf32>
    %117 = arith.addf %114, %116 : vector<8x128xf32>
    %118 = arith.index_cast %87 : i32 to index
    %c0_32 = arith.constant 0 : index
    %c0_33 = arith.constant 0 : index
    %119 = vector.load %arg5[%118, %c0_32, %c0_33] : memref<16x8x128xf32, #tpu.memory_space<vmem>>, vector<1x8x128xf32>
    %120 = vector.shape_cast %119 : vector<1x8x128xf32> to vector<8x128xf32>
    %121 = vector.shape_cast %117 : vector<8x128xf32> to vector<1x8x128xf32>
    tpu.vector_store %arg5[%118, %c0_32, %c0_33], %121 {strides = array<i32>} : memref<16x8x128xf32, #tpu.memory_space<vmem>>, vector<1x8x128xf32>,
    %c3_i32 = arith.constant 3 : i32
    %c2_i32_34 = arith.constant 2 : i32
    %122 = arith.muli %c2_i32_34, %c3_i32 : i32
    %c15_i32_35 = arith.constant 15 : i32
    %123 = arith.subi %c15_i32_35, %122 : i32
    %124 = arith.muli %arg0, %123 : i32
    %125 = arith.addi %c3_i32, %124 : i32
    %126 = arith.index_cast %125 : i32 to index
    %c0_36 = arith.constant 0 : index
    %c0_37 = arith.constant 0 : index
    %127 = vector.load %arg2[%126, %c0_36, %c0_37] : memref<16x8x384xf32, #tpu.memory_space<vmem>>, vector<1x8x384xf32>
    %128 = vector.shape_cast %127 : vector<1x8x384xf32> to vector<8x384xf32>
    %cst_38 = arith.constant dense<0.000000e+00> : vector<8x384xf32>
    %129 = tpu.matmul %117, %4, %cst_38 {dimension_numbers = #tpu.dot_dimension_numbers<[1], [0], [0], [1], [0, 0, 1, 1], [], []>} : vector<8x128xf32>, vector<128x384xf32>, vector<8x384xf32> -> vector<8x384xf32>
    %130 = vector.broadcast %6 : vector<1x384xf32> to vector<8x384xf32>
    %131 = arith.addf %129, %130 : vector<8x384xf32>
    %132 = vector.extract_strided_slice %128 {offsets = [0, 0], sizes = [8, 128], strides = [1, 1]} : vector<8x384xf32> to vector<8x128xf32>
    %133 = vector.extract_strided_slice %131 {offsets = [0, 0], sizes = [8, 128], strides = [1, 1]} : vector<8x384xf32> to vector<8x128xf32>
    %134 = arith.addf %132, %133 : vector<8x128xf32>
    %135 = arith.negf %134 : vector<8x128xf32>
    %136 = math.exp %135 : vector<8x128xf32>
    %cst_39 = arith.constant 1.000000e+00 : f32
    %137 = vector.broadcast %cst_39 : f32 to vector<8x128xf32>
    %138 = arith.addf %137, %136 : vector<8x128xf32>
    %139 = arith.divf %137, %138 : vector<8x128xf32>
    %140 = vector.extract_strided_slice %128 {offsets = [0, 128], sizes = [8, 128], strides = [1, 1]} : vector<8x384xf32> to vector<8x128xf32>
    %141 = vector.extract_strided_slice %131 {offsets = [0, 128], sizes = [8, 128], strides = [1, 1]} : vector<8x384xf32> to vector<8x128xf32>
    %142 = arith.addf %140, %141 : vector<8x128xf32>
    %143 = arith.negf %142 : vector<8x128xf32>
    %144 = math.exp %143 : vector<8x128xf32>
    %cst_40 = arith.constant 1.000000e+00 : f32
    %145 = vector.broadcast %cst_40 : f32 to vector<8x128xf32>
    %146 = arith.addf %145, %144 : vector<8x128xf32>
    %147 = arith.divf %145, %146 : vector<8x128xf32>
    %148 = vector.extract_strided_slice %128 {offsets = [0, 256], sizes = [8, 128], strides = [1, 1]} : vector<8x384xf32> to vector<8x128xf32>
    %149 = vector.extract_strided_slice %131 {offsets = [0, 256], sizes = [8, 128], strides = [1, 1]} : vector<8x384xf32> to vector<8x128xf32>
    %150 = arith.mulf %139, %149 : vector<8x128xf32>
    %151 = arith.addf %148, %150 : vector<8x128xf32>
    %152 = math.tanh %151 : vector<8x128xf32>
    %153 = arith.subf %117, %152 : vector<8x128xf32>
    %154 = arith.mulf %147, %153 : vector<8x128xf32>
    %155 = arith.addf %152, %154 : vector<8x128xf32>
    %156 = arith.index_cast %125 : i32 to index
    %c0_41 = arith.constant 0 : index
    %c0_42 = arith.constant 0 : index
    %157 = vector.load %arg5[%156, %c0_41, %c0_42] : memref<16x8x128xf32, #tpu.memory_space<vmem>>, vector<1x8x128xf32>
    %158 = vector.shape_cast %157 : vector<1x8x128xf32> to vector<8x128xf32>
    %159 = vector.shape_cast %155 : vector<8x128xf32> to vector<1x8x128xf32>
    tpu.vector_store %arg5[%156, %c0_41, %c0_42], %159 {strides = array<i32>} : memref<16x8x128xf32, #tpu.memory_space<vmem>>, vector<1x8x128xf32>,
    %c4_i32 = arith.constant 4 : i32
    %c2_i32_43 = arith.constant 2 : i32
    %160 = arith.muli %c2_i32_43, %c4_i32 : i32
    %c15_i32_44 = arith.constant 15 : i32
    %161 = arith.subi %c15_i32_44, %160 : i32
    %162 = arith.muli %arg0, %161 : i32
    %163 = arith.addi %c4_i32, %162 : i32
    %164 = arith.index_cast %163 : i32 to index
    %c0_45 = arith.constant 0 : index
    %c0_46 = arith.constant 0 : index
    %165 = vector.load %arg2[%164, %c0_45, %c0_46] : memref<16x8x384xf32, #tpu.memory_space<vmem>>, vector<1x8x384xf32>
    %166 = vector.shape_cast %165 : vector<1x8x384xf32> to vector<8x384xf32>
    %cst_47 = arith.constant dense<0.000000e+00> : vector<8x384xf32>
    %167 = tpu.matmul %155, %4, %cst_47 {dimension_numbers = #tpu.dot_dimension_numbers<[1], [0], [0], [1], [0, 0, 1, 1], [], []>} : vector<8x128xf32>, vector<128x384xf32>, vector<8x384xf32> -> vector<8x384xf32>
    %168 = vector.broadcast %6 : vector<1x384xf32> to vector<8x384xf32>
    %169 = arith.addf %167, %168 : vector<8x384xf32>
    %170 = vector.extract_strided_slice %166 {offsets = [0, 0], sizes = [8, 128], strides = [1, 1]} : vector<8x384xf32> to vector<8x128xf32>
    %171 = vector.extract_strided_slice %169 {offsets = [0, 0], sizes = [8, 128], strides = [1, 1]} : vector<8x384xf32> to vector<8x128xf32>
    %172 = arith.addf %170, %171 : vector<8x128xf32>
    %173 = arith.negf %172 : vector<8x128xf32>
    %174 = math.exp %173 : vector<8x128xf32>
    %cst_48 = arith.constant 1.000000e+00 : f32
    %175 = vector.broadcast %cst_48 : f32 to vector<8x128xf32>
    %176 = arith.addf %175, %174 : vector<8x128xf32>
    %177 = arith.divf %175, %176 : vector<8x128xf32>
    %178 = vector.extract_strided_slice %166 {offsets = [0, 128], sizes = [8, 128], strides = [1, 1]} : vector<8x384xf32> to vector<8x128xf32>
    %179 = vector.extract_strided_slice %169 {offsets = [0, 128], sizes = [8, 128], strides = [1, 1]} : vector<8x384xf32> to vector<8x128xf32>
    %180 = arith.addf %178, %179 : vector<8x128xf32>
    %181 = arith.negf %180 : vector<8x128xf32>
    %182 = math.exp %181 : vector<8x128xf32>
    %cst_49 = arith.constant 1.000000e+00 : f32
    %183 = vector.broadcast %cst_49 : f32 to vector<8x128xf32>
    %184 = arith.addf %183, %182 : vector<8x128xf32>
    %185 = arith.divf %183, %184 : vector<8x128xf32>
    %186 = vector.extract_strided_slice %166 {offsets = [0, 256], sizes = [8, 128], strides = [1, 1]} : vector<8x384xf32> to vector<8x128xf32>
    %187 = vector.extract_strided_slice %169 {offsets = [0, 256], sizes = [8, 128], strides = [1, 1]} : vector<8x384xf32> to vector<8x128xf32>
    %188 = arith.mulf %177, %187 : vector<8x128xf32>
    %189 = arith.addf %186, %188 : vector<8x128xf32>
    %190 = math.tanh %189 : vector<8x128xf32>
    %191 = arith.subf %155, %190 : vector<8x128xf32>
    %192 = arith.mulf %185, %191 : vector<8x128xf32>
    %193 = arith.addf %190, %192 : vector<8x128xf32>
    %194 = arith.index_cast %163 : i32 to index
    %c0_50 = arith.constant 0 : index
    %c0_51 = arith.constant 0 : index
    %195 = vector.load %arg5[%194, %c0_50, %c0_51] : memref<16x8x128xf32, #tpu.memory_space<vmem>>, vector<1x8x128xf32>
    %196 = vector.shape_cast %195 : vector<1x8x128xf32> to vector<8x128xf32>
    %197 = vector.shape_cast %193 : vector<8x128xf32> to vector<1x8x128xf32>
    tpu.vector_store %arg5[%194, %c0_50, %c0_51], %197 {strides = array<i32>} : memref<16x8x128xf32, #tpu.memory_space<vmem>>, vector<1x8x128xf32>,
    %c5_i32 = arith.constant 5 : i32
    %c2_i32_52 = arith.constant 2 : i32
    %198 = arith.muli %c2_i32_52, %c5_i32 : i32
    %c15_i32_53 = arith.constant 15 : i32
    %199 = arith.subi %c15_i32_53, %198 : i32
    %200 = arith.muli %arg0, %199 : i32
    %201 = arith.addi %c5_i32, %200 : i32
    %202 = arith.index_cast %201 : i32 to index
    %c0_54 = arith.constant 0 : index
    %c0_55 = arith.constant 0 : index
    %203 = vector.load %arg2[%202, %c0_54, %c0_55] : memref<16x8x384xf32, #tpu.memory_space<vmem>>, vector<1x8x384xf32>
    %204 = vector.shape_cast %203 : vector<1x8x384xf32> to vector<8x384xf32>
    %cst_56 = arith.constant dense<0.000000e+00> : vector<8x384xf32>
    %205 = tpu.matmul %193, %4, %cst_56 {dimension_numbers = #tpu.dot_dimension_numbers<[1], [0], [0], [1], [0, 0, 1, 1], [], []>} : vector<8x128xf32>, vector<128x384xf32>, vector<8x384xf32> -> vector<8x384xf32>
    %206 = vector.broadcast %6 : vector<1x384xf32> to vector<8x384xf32>
    %207 = arith.addf %205, %206 : vector<8x384xf32>
    %208 = vector.extract_strided_slice %204 {offsets = [0, 0], sizes = [8, 128], strides = [1, 1]} : vector<8x384xf32> to vector<8x128xf32>
    %209 = vector.extract_strided_slice %207 {offsets = [0, 0], sizes = [8, 128], strides = [1, 1]} : vector<8x384xf32> to vector<8x128xf32>
    %210 = arith.addf %208, %209 : vector<8x128xf32>
    %211 = arith.negf %210 : vector<8x128xf32>
    %212 = math.exp %211 : vector<8x128xf32>
    %cst_57 = arith.constant 1.000000e+00 : f32
    %213 = vector.broadcast %cst_57 : f32 to vector<8x128xf32>
    %214 = arith.addf %213, %212 : vector<8x128xf32>
    %215 = arith.divf %213, %214 : vector<8x128xf32>
    %216 = vector.extract_strided_slice %204 {offsets = [0, 128], sizes = [8, 128], strides = [1, 1]} : vector<8x384xf32> to vector<8x128xf32>
    %217 = vector.extract_strided_slice %207 {offsets = [0, 128], sizes = [8, 128], strides = [1, 1]} : vector<8x384xf32> to vector<8x128xf32>
    %218 = arith.addf %216, %217 : vector<8x128xf32>
    %219 = arith.negf %218 : vector<8x128xf32>
    %220 = math.exp %219 : vector<8x128xf32>
    %cst_58 = arith.constant 1.000000e+00 : f32
    %221 = vector.broadcast %cst_58 : f32 to vector<8x128xf32>
    %222 = arith.addf %221, %220 : vector<8x128xf32>
    %223 = arith.divf %221, %222 : vector<8x128xf32>
    %224 = vector.extract_strided_slice %204 {offsets = [0, 256], sizes = [8, 128], strides = [1, 1]} : vector<8x384xf32> to vector<8x128xf32>
    %225 = vector.extract_strided_slice %207 {offsets = [0, 256], sizes = [8, 128], strides = [1, 1]} : vector<8x384xf32> to vector<8x128xf32>
    %226 = arith.mulf %215, %225 : vector<8x128xf32>
    %227 = arith.addf %224, %226 : vector<8x128xf32>
    %228 = math.tanh %227 : vector<8x128xf32>
    %229 = arith.subf %193, %228 : vector<8x128xf32>
    %230 = arith.mulf %223, %229 : vector<8x128xf32>
    %231 = arith.addf %228, %230 : vector<8x128xf32>
    %232 = arith.index_cast %201 : i32 to index
    %c0_59 = arith.constant 0 : index
    %c0_60 = arith.constant 0 : index
    %233 = vector.load %arg5[%232, %c0_59, %c0_60] : memref<16x8x128xf32, #tpu.memory_space<vmem>>, vector<1x8x128xf32>
    %234 = vector.shape_cast %233 : vector<1x8x128xf32> to vector<8x128xf32>
    %235 = vector.shape_cast %231 : vector<8x128xf32> to vector<1x8x128xf32>
    tpu.vector_store %arg5[%232, %c0_59, %c0_60], %235 {strides = array<i32>} : memref<16x8x128xf32, #tpu.memory_space<vmem>>, vector<1x8x128xf32>,
    %c6_i32 = arith.constant 6 : i32
    %c2_i32_61 = arith.constant 2 : i32
    %236 = arith.muli %c2_i32_61, %c6_i32 : i32
    %c15_i32_62 = arith.constant 15 : i32
    %237 = arith.subi %c15_i32_62, %236 : i32
    %238 = arith.muli %arg0, %237 : i32
    %239 = arith.addi %c6_i32, %238 : i32
    %240 = arith.index_cast %239 : i32 to index
    %c0_63 = arith.constant 0 : index
    %c0_64 = arith.constant 0 : index
    %241 = vector.load %arg2[%240, %c0_63, %c0_64] : memref<16x8x384xf32, #tpu.memory_space<vmem>>, vector<1x8x384xf32>
    %242 = vector.shape_cast %241 : vector<1x8x384xf32> to vector<8x384xf32>
    %cst_65 = arith.constant dense<0.000000e+00> : vector<8x384xf32>
    %243 = tpu.matmul %231, %4, %cst_65 {dimension_numbers = #tpu.dot_dimension_numbers<[1], [0], [0], [1], [0, 0, 1, 1], [], []>} : vector<8x128xf32>, vector<128x384xf32>, vector<8x384xf32> -> vector<8x384xf32>
    %244 = vector.broadcast %6 : vector<1x384xf32> to vector<8x384xf32>
    %245 = arith.addf %243, %244 : vector<8x384xf32>
    %246 = vector.extract_strided_slice %242 {offsets = [0, 0], sizes = [8, 128], strides = [1, 1]} : vector<8x384xf32> to vector<8x128xf32>
    %247 = vector.extract_strided_slice %245 {offsets = [0, 0], sizes = [8, 128], strides = [1, 1]} : vector<8x384xf32> to vector<8x128xf32>
    %248 = arith.addf %246, %247 : vector<8x128xf32>
    %249 = arith.negf %248 : vector<8x128xf32>
    %250 = math.exp %249 : vector<8x128xf32>
    %cst_66 = arith.constant 1.000000e+00 : f32
    %251 = vector.broadcast %cst_66 : f32 to vector<8x128xf32>
    %252 = arith.addf %251, %250 : vector<8x128xf32>
    %253 = arith.divf %251, %252 : vector<8x128xf32>
    %254 = vector.extract_strided_slice %242 {offsets = [0, 128], sizes = [8, 128], strides = [1, 1]} : vector<8x384xf32> to vector<8x128xf32>
    %255 = vector.extract_strided_slice %245 {offsets = [0, 128], sizes = [8, 128], strides = [1, 1]} : vector<8x384xf32> to vector<8x128xf32>
    %256 = arith.addf %254, %255 : vector<8x128xf32>
    %257 = arith.negf %256 : vector<8x128xf32>
    %258 = math.exp %257 : vector<8x128xf32>
    %cst_67 = arith.constant 1.000000e+00 : f32
    %259 = vector.broadcast %cst_67 : f32 to vector<8x128xf32>
    %260 = arith.addf %259, %258 : vector<8x128xf32>
    %261 = arith.divf %259, %260 : vector<8x128xf32>
    %262 = vector.extract_strided_slice %242 {offsets = [0, 256], sizes = [8, 128], strides = [1, 1]} : vector<8x384xf32> to vector<8x128xf32>
    %263 = vector.extract_strided_slice %245 {offsets = [0, 256], sizes = [8, 128], strides = [1, 1]} : vector<8x384xf32> to vector<8x128xf32>
    %264 = arith.mulf %253, %263 : vector<8x128xf32>
    %265 = arith.addf %262, %264 : vector<8x128xf32>
    %266 = math.tanh %265 : vector<8x128xf32>
    %267 = arith.subf %231, %266 : vector<8x128xf32>
    %268 = arith.mulf %261, %267 : vector<8x128xf32>
    %269 = arith.addf %266, %268 : vector<8x128xf32>
    %270 = arith.index_cast %239 : i32 to index
    %c0_68 = arith.constant 0 : index
    %c0_69 = arith.constant 0 : index
    %271 = vector.load %arg5[%270, %c0_68, %c0_69] : memref<16x8x128xf32, #tpu.memory_space<vmem>>, vector<1x8x128xf32>
    %272 = vector.shape_cast %271 : vector<1x8x128xf32> to vector<8x128xf32>
    %273 = vector.shape_cast %269 : vector<8x128xf32> to vector<1x8x128xf32>
    tpu.vector_store %arg5[%270, %c0_68, %c0_69], %273 {strides = array<i32>} : memref<16x8x128xf32, #tpu.memory_space<vmem>>, vector<1x8x128xf32>,
    %c7_i32 = arith.constant 7 : i32
    %c2_i32_70 = arith.constant 2 : i32
    %274 = arith.muli %c2_i32_70, %c7_i32 : i32
    %c15_i32_71 = arith.constant 15 : i32
    %275 = arith.subi %c15_i32_71, %274 : i32
    %276 = arith.muli %arg0, %275 : i32
    %277 = arith.addi %c7_i32, %276 : i32
    %278 = arith.index_cast %277 : i32 to index
    %c0_72 = arith.constant 0 : index
    %c0_73 = arith.constant 0 : index
    %279 = vector.load %arg2[%278, %c0_72, %c0_73] : memref<16x8x384xf32, #tpu.memory_space<vmem>>, vector<1x8x384xf32>
    %280 = vector.shape_cast %279 : vector<1x8x384xf32> to vector<8x384xf32>
    %cst_74 = arith.constant dense<0.000000e+00> : vector<8x384xf32>
    %281 = tpu.matmul %269, %4, %cst_74 {dimension_numbers = #tpu.dot_dimension_numbers<[1], [0], [0], [1], [0, 0, 1, 1], [], []>} : vector<8x128xf32>, vector<128x384xf32>, vector<8x384xf32> -> vector<8x384xf32>
    %282 = vector.broadcast %6 : vector<1x384xf32> to vector<8x384xf32>
    %283 = arith.addf %281, %282 : vector<8x384xf32>
    %284 = vector.extract_strided_slice %280 {offsets = [0, 0], sizes = [8, 128], strides = [1, 1]} : vector<8x384xf32> to vector<8x128xf32>
    %285 = vector.extract_strided_slice %283 {offsets = [0, 0], sizes = [8, 128], strides = [1, 1]} : vector<8x384xf32> to vector<8x128xf32>
    %286 = arith.addf %284, %285 : vector<8x128xf32>
    %287 = arith.negf %286 : vector<8x128xf32>
    %288 = math.exp %287 : vector<8x128xf32>
    %cst_75 = arith.constant 1.000000e+00 : f32
    %289 = vector.broadcast %cst_75 : f32 to vector<8x128xf32>
    %290 = arith.addf %289, %288 : vector<8x128xf32>
    %291 = arith.divf %289, %290 : vector<8x128xf32>
    %292 = vector.extract_strided_slice %280 {offsets = [0, 128], sizes = [8, 128], strides = [1, 1]} : vector<8x384xf32> to vector<8x128xf32>
    %293 = vector.extract_strided_slice %283 {offsets = [0, 128], sizes = [8, 128], strides = [1, 1]} : vector<8x384xf32> to vector<8x128xf32>
    %294 = arith.addf %292, %293 : vector<8x128xf32>
    %295 = arith.negf %294 : vector<8x128xf32>
    %296 = math.exp %295 : vector<8x128xf32>
    %cst_76 = arith.constant 1.000000e+00 : f32
    %297 = vector.broadcast %cst_76 : f32 to vector<8x128xf32>
    %298 = arith.addf %297, %296 : vector<8x128xf32>
    %299 = arith.divf %297, %298 : vector<8x128xf32>
    %300 = vector.extract_strided_slice %280 {offsets = [0, 256], sizes = [8, 128], strides = [1, 1]} : vector<8x384xf32> to vector<8x128xf32>
    %301 = vector.extract_strided_slice %283 {offsets = [0, 256], sizes = [8, 128], strides = [1, 1]} : vector<8x384xf32> to vector<8x128xf32>
    %302 = arith.mulf %291, %301 : vector<8x128xf32>
    %303 = arith.addf %300, %302 : vector<8x128xf32>
    %304 = math.tanh %303 : vector<8x128xf32>
    %305 = arith.subf %269, %304 : vector<8x128xf32>
    %306 = arith.mulf %299, %305 : vector<8x128xf32>
    %307 = arith.addf %304, %306 : vector<8x128xf32>
    %308 = arith.index_cast %277 : i32 to index
    %c0_77 = arith.constant 0 : index
    %c0_78 = arith.constant 0 : index
    %309 = vector.load %arg5[%308, %c0_77, %c0_78] : memref<16x8x128xf32, #tpu.memory_space<vmem>>, vector<1x8x128xf32>
    %310 = vector.shape_cast %309 : vector<1x8x128xf32> to vector<8x128xf32>
    %311 = vector.shape_cast %307 : vector<8x128xf32> to vector<1x8x128xf32>
    tpu.vector_store %arg5[%308, %c0_77, %c0_78], %311 {strides = array<i32>} : memref<16x8x128xf32, #tpu.memory_space<vmem>>, vector<1x8x128xf32>,
    %c8_i32 = arith.constant 8 : i32
    %c2_i32_79 = arith.constant 2 : i32
    %312 = arith.muli %c2_i32_79, %c8_i32 : i32
    %c15_i32_80 = arith.constant 15 : i32
    %313 = arith.subi %c15_i32_80, %312 : i32
    %314 = arith.muli %arg0, %313 : i32
    %315 = arith.addi %c8_i32, %314 : i32
    %316 = arith.index_cast %315 : i32 to index
    %c0_81 = arith.constant 0 : index
    %c0_82 = arith.constant 0 : index
    %317 = vector.load %arg2[%316, %c0_81, %c0_82] : memref<16x8x384xf32, #tpu.memory_space<vmem>>, vector<1x8x384xf32>
    %318 = vector.shape_cast %317 : vector<1x8x384xf32> to vector<8x384xf32>
    %cst_83 = arith.constant dense<0.000000e+00> : vector<8x384xf32>
    %319 = tpu.matmul %307, %4, %cst_83 {dimension_numbers = #tpu.dot_dimension_numbers<[1], [0], [0], [1], [0, 0, 1, 1], [], []>} : vector<8x128xf32>, vector<128x384xf32>, vector<8x384xf32> -> vector<8x384xf32>
    %320 = vector.broadcast %6 : vector<1x384xf32> to vector<8x384xf32>
    %321 = arith.addf %319, %320 : vector<8x384xf32>
    %322 = vector.extract_strided_slice %318 {offsets = [0, 0], sizes = [8, 128], strides = [1, 1]} : vector<8x384xf32> to vector<8x128xf32>
    %323 = vector.extract_strided_slice %321 {offsets = [0, 0], sizes = [8, 128], strides = [1, 1]} : vector<8x384xf32> to vector<8x128xf32>
    %324 = arith.addf %322, %323 : vector<8x128xf32>
    %325 = arith.negf %324 : vector<8x128xf32>
    %326 = math.exp %325 : vector<8x128xf32>
    %cst_84 = arith.constant 1.000000e+00 : f32
    %327 = vector.broadcast %cst_84 : f32 to vector<8x128xf32>
    %328 = arith.addf %327, %326 : vector<8x128xf32>
    %329 = arith.divf %327, %328 : vector<8x128xf32>
    %330 = vector.extract_strided_slice %318 {offsets = [0, 128], sizes = [8, 128], strides = [1, 1]} : vector<8x384xf32> to vector<8x128xf32>
    %331 = vector.extract_strided_slice %321 {offsets = [0, 128], sizes = [8, 128], strides = [1, 1]} : vector<8x384xf32> to vector<8x128xf32>
    %332 = arith.addf %330, %331 : vector<8x128xf32>
    %333 = arith.negf %332 : vector<8x128xf32>
    %334 = math.exp %333 : vector<8x128xf32>
    %cst_85 = arith.constant 1.000000e+00 : f32
    %335 = vector.broadcast %cst_85 : f32 to vector<8x128xf32>
    %336 = arith.addf %335, %334 : vector<8x128xf32>
    %337 = arith.divf %335, %336 : vector<8x128xf32>
    %338 = vector.extract_strided_slice %318 {offsets = [0, 256], sizes = [8, 128], strides = [1, 1]} : vector<8x384xf32> to vector<8x128xf32>
    %339 = vector.extract_strided_slice %321 {offsets = [0, 256], sizes = [8, 128], strides = [1, 1]} : vector<8x384xf32> to vector<8x128xf32>
    %340 = arith.mulf %329, %339 : vector<8x128xf32>
    %341 = arith.addf %338, %340 : vector<8x128xf32>
    %342 = math.tanh %341 : vector<8x128xf32>
    %343 = arith.subf %307, %342 : vector<8x128xf32>
    %344 = arith.mulf %337, %343 : vector<8x128xf32>
    %345 = arith.addf %342, %344 : vector<8x128xf32>
    %346 = arith.index_cast %315 : i32 to index
    %c0_86 = arith.constant 0 : index
    %c0_87 = arith.constant 0 : index
    %347 = vector.load %arg5[%346, %c0_86, %c0_87] : memref<16x8x128xf32, #tpu.memory_space<vmem>>, vector<1x8x128xf32>
    %348 = vector.shape_cast %347 : vector<1x8x128xf32> to vector<8x128xf32>
    %349 = vector.shape_cast %345 : vector<8x128xf32> to vector<1x8x128xf32>
    tpu.vector_store %arg5[%346, %c0_86, %c0_87], %349 {strides = array<i32>} : memref<16x8x128xf32, #tpu.memory_space<vmem>>, vector<1x8x128xf32>,
    %c9_i32 = arith.constant 9 : i32
    %c2_i32_88 = arith.constant 2 : i32
    %350 = arith.muli %c2_i32_88, %c9_i32 : i32
    %c15_i32_89 = arith.constant 15 : i32
    %351 = arith.subi %c15_i32_89, %350 : i32
    %352 = arith.muli %arg0, %351 : i32
    %353 = arith.addi %c9_i32, %352 : i32
    %354 = arith.index_cast %353 : i32 to index
    %c0_90 = arith.constant 0 : index
    %c0_91 = arith.constant 0 : index
    %355 = vector.load %arg2[%354, %c0_90, %c0_91] : memref<16x8x384xf32, #tpu.memory_space<vmem>>, vector<1x8x384xf32>
    %356 = vector.shape_cast %355 : vector<1x8x384xf32> to vector<8x384xf32>
    %cst_92 = arith.constant dense<0.000000e+00> : vector<8x384xf32>
    %357 = tpu.matmul %345, %4, %cst_92 {dimension_numbers = #tpu.dot_dimension_numbers<[1], [0], [0], [1], [0, 0, 1, 1], [], []>} : vector<8x128xf32>, vector<128x384xf32>, vector<8x384xf32> -> vector<8x384xf32>
    %358 = vector.broadcast %6 : vector<1x384xf32> to vector<8x384xf32>
    %359 = arith.addf %357, %358 : vector<8x384xf32>
    %360 = vector.extract_strided_slice %356 {offsets = [0, 0], sizes = [8, 128], strides = [1, 1]} : vector<8x384xf32> to vector<8x128xf32>
    %361 = vector.extract_strided_slice %359 {offsets = [0, 0], sizes = [8, 128], strides = [1, 1]} : vector<8x384xf32> to vector<8x128xf32>
    %362 = arith.addf %360, %361 : vector<8x128xf32>
    %363 = arith.negf %362 : vector<8x128xf32>
    %364 = math.exp %363 : vector<8x128xf32>
    %cst_93 = arith.constant 1.000000e+00 : f32
    %365 = vector.broadcast %cst_93 : f32 to vector<8x128xf32>
    %366 = arith.addf %365, %364 : vector<8x128xf32>
    %367 = arith.divf %365, %366 : vector<8x128xf32>
    %368 = vector.extract_strided_slice %356 {offsets = [0, 128], sizes = [8, 128], strides = [1, 1]} : vector<8x384xf32> to vector<8x128xf32>
    %369 = vector.extract_strided_slice %359 {offsets = [0, 128], sizes = [8, 128], strides = [1, 1]} : vector<8x384xf32> to vector<8x128xf32>
    %370 = arith.addf %368, %369 : vector<8x128xf32>
    %371 = arith.negf %370 : vector<8x128xf32>
    %372 = math.exp %371 : vector<8x128xf32>
    %cst_94 = arith.constant 1.000000e+00 : f32
    %373 = vector.broadcast %cst_94 : f32 to vector<8x128xf32>
    %374 = arith.addf %373, %372 : vector<8x128xf32>
    %375 = arith.divf %373, %374 : vector<8x128xf32>
    %376 = vector.extract_strided_slice %356 {offsets = [0, 256], sizes = [8, 128], strides = [1, 1]} : vector<8x384xf32> to vector<8x128xf32>
    %377 = vector.extract_strided_slice %359 {offsets = [0, 256], sizes = [8, 128], strides = [1, 1]} : vector<8x384xf32> to vector<8x128xf32>
    %378 = arith.mulf %367, %377 : vector<8x128xf32>
    %379 = arith.addf %376, %378 : vector<8x128xf32>
    %380 = math.tanh %379 : vector<8x128xf32>
    %381 = arith.subf %345, %380 : vector<8x128xf32>
    %382 = arith.mulf %375, %381 : vector<8x128xf32>
    %383 = arith.addf %380, %382 : vector<8x128xf32>
    %384 = arith.index_cast %353 : i32 to index
    %c0_95 = arith.constant 0 : index
    %c0_96 = arith.constant 0 : index
    %385 = vector.load %arg5[%384, %c0_95, %c0_96] : memref<16x8x128xf32, #tpu.memory_space<vmem>>, vector<1x8x128xf32>
    %386 = vector.shape_cast %385 : vector<1x8x128xf32> to vector<8x128xf32>
    %387 = vector.shape_cast %383 : vector<8x128xf32> to vector<1x8x128xf32>
    tpu.vector_store %arg5[%384, %c0_95, %c0_96], %387 {strides = array<i32>} : memref<16x8x128xf32, #tpu.memory_space<vmem>>, vector<1x8x128xf32>,
    %c10_i32 = arith.constant 10 : i32
    %c2_i32_97 = arith.constant 2 : i32
    %388 = arith.muli %c2_i32_97, %c10_i32 : i32
    %c15_i32_98 = arith.constant 15 : i32
    %389 = arith.subi %c15_i32_98, %388 : i32
    %390 = arith.muli %arg0, %389 : i32
    %391 = arith.addi %c10_i32, %390 : i32
    %392 = arith.index_cast %391 : i32 to index
    %c0_99 = arith.constant 0 : index
    %c0_100 = arith.constant 0 : index
    %393 = vector.load %arg2[%392, %c0_99, %c0_100] : memref<16x8x384xf32, #tpu.memory_space<vmem>>, vector<1x8x384xf32>
    %394 = vector.shape_cast %393 : vector<1x8x384xf32> to vector<8x384xf32>
    %cst_101 = arith.constant dense<0.000000e+00> : vector<8x384xf32>
    %395 = tpu.matmul %383, %4, %cst_101 {dimension_numbers = #tpu.dot_dimension_numbers<[1], [0], [0], [1], [0, 0, 1, 1], [], []>} : vector<8x128xf32>, vector<128x384xf32>, vector<8x384xf32> -> vector<8x384xf32>
    %396 = vector.broadcast %6 : vector<1x384xf32> to vector<8x384xf32>
    %397 = arith.addf %395, %396 : vector<8x384xf32>
    %398 = vector.extract_strided_slice %394 {offsets = [0, 0], sizes = [8, 128], strides = [1, 1]} : vector<8x384xf32> to vector<8x128xf32>
    %399 = vector.extract_strided_slice %397 {offsets = [0, 0], sizes = [8, 128], strides = [1, 1]} : vector<8x384xf32> to vector<8x128xf32>
    %400 = arith.addf %398, %399 : vector<8x128xf32>
    %401 = arith.negf %400 : vector<8x128xf32>
    %402 = math.exp %401 : vector<8x128xf32>
    %cst_102 = arith.constant 1.000000e+00 : f32
    %403 = vector.broadcast %cst_102 : f32 to vector<8x128xf32>
    %404 = arith.addf %403, %402 : vector<8x128xf32>
    %405 = arith.divf %403, %404 : vector<8x128xf32>
    %406 = vector.extract_strided_slice %394 {offsets = [0, 128], sizes = [8, 128], strides = [1, 1]} : vector<8x384xf32> to vector<8x128xf32>
    %407 = vector.extract_strided_slice %397 {offsets = [0, 128], sizes = [8, 128], strides = [1, 1]} : vector<8x384xf32> to vector<8x128xf32>
    %408 = arith.addf %406, %407 : vector<8x128xf32>
    %409 = arith.negf %408 : vector<8x128xf32>
    %410 = math.exp %409 : vector<8x128xf32>
    %cst_103 = arith.constant 1.000000e+00 : f32
    %411 = vector.broadcast %cst_103 : f32 to vector<8x128xf32>
    %412 = arith.addf %411, %410 : vector<8x128xf32>
    %413 = arith.divf %411, %412 : vector<8x128xf32>
    %414 = vector.extract_strided_slice %394 {offsets = [0, 256], sizes = [8, 128], strides = [1, 1]} : vector<8x384xf32> to vector<8x128xf32>
    %415 = vector.extract_strided_slice %397 {offsets = [0, 256], sizes = [8, 128], strides = [1, 1]} : vector<8x384xf32> to vector<8x128xf32>
    %416 = arith.mulf %405, %415 : vector<8x128xf32>
    %417 = arith.addf %414, %416 : vector<8x128xf32>
    %418 = math.tanh %417 : vector<8x128xf32>
    %419 = arith.subf %383, %418 : vector<8x128xf32>
    %420 = arith.mulf %413, %419 : vector<8x128xf32>
    %421 = arith.addf %418, %420 : vector<8x128xf32>
    %422 = arith.index_cast %391 : i32 to index
    %c0_104 = arith.constant 0 : index
    %c0_105 = arith.constant 0 : index
    %423 = vector.load %arg5[%422, %c0_104, %c0_105] : memref<16x8x128xf32, #tpu.memory_space<vmem>>, vector<1x8x128xf32>
    %424 = vector.shape_cast %423 : vector<1x8x128xf32> to vector<8x128xf32>
    %425 = vector.shape_cast %421 : vector<8x128xf32> to vector<1x8x128xf32>
    tpu.vector_store %arg5[%422, %c0_104, %c0_105], %425 {strides = array<i32>} : memref<16x8x128xf32, #tpu.memory_space<vmem>>, vector<1x8x128xf32>,
    %c11_i32 = arith.constant 11 : i32
    %c2_i32_106 = arith.constant 2 : i32
    %426 = arith.muli %c2_i32_106, %c11_i32 : i32
    %c15_i32_107 = arith.constant 15 : i32
    %427 = arith.subi %c15_i32_107, %426 : i32
    %428 = arith.muli %arg0, %427 : i32
    %429 = arith.addi %c11_i32, %428 : i32
    %430 = arith.index_cast %429 : i32 to index
    %c0_108 = arith.constant 0 : index
    %c0_109 = arith.constant 0 : index
    %431 = vector.load %arg2[%430, %c0_108, %c0_109] : memref<16x8x384xf32, #tpu.memory_space<vmem>>, vector<1x8x384xf32>
    %432 = vector.shape_cast %431 : vector<1x8x384xf32> to vector<8x384xf32>
    %cst_110 = arith.constant dense<0.000000e+00> : vector<8x384xf32>
    %433 = tpu.matmul %421, %4, %cst_110 {dimension_numbers = #tpu.dot_dimension_numbers<[1], [0], [0], [1], [0, 0, 1, 1], [], []>} : vector<8x128xf32>, vector<128x384xf32>, vector<8x384xf32> -> vector<8x384xf32>
    %434 = vector.broadcast %6 : vector<1x384xf32> to vector<8x384xf32>
    %435 = arith.addf %433, %434 : vector<8x384xf32>
    %436 = vector.extract_strided_slice %432 {offsets = [0, 0], sizes = [8, 128], strides = [1, 1]} : vector<8x384xf32> to vector<8x128xf32>
    %437 = vector.extract_strided_slice %435 {offsets = [0, 0], sizes = [8, 128], strides = [1, 1]} : vector<8x384xf32> to vector<8x128xf32>
    %438 = arith.addf %436, %437 : vector<8x128xf32>
    %439 = arith.negf %438 : vector<8x128xf32>
    %440 = math.exp %439 : vector<8x128xf32>
    %cst_111 = arith.constant 1.000000e+00 : f32
    %441 = vector.broadcast %cst_111 : f32 to vector<8x128xf32>
    %442 = arith.addf %441, %440 : vector<8x128xf32>
    %443 = arith.divf %441, %442 : vector<8x128xf32>
    %444 = vector.extract_strided_slice %432 {offsets = [0, 128], sizes = [8, 128], strides = [1, 1]} : vector<8x384xf32> to vector<8x128xf32>
    %445 = vector.extract_strided_slice %435 {offsets = [0, 128], sizes = [8, 128], strides = [1, 1]} : vector<8x384xf32> to vector<8x128xf32>
    %446 = arith.addf %444, %445 : vector<8x128xf32>
    %447 = arith.negf %446 : vector<8x128xf32>
    %448 = math.exp %447 : vector<8x128xf32>
    %cst_112 = arith.constant 1.000000e+00 : f32
    %449 = vector.broadcast %cst_112 : f32 to vector<8x128xf32>
    %450 = arith.addf %449, %448 : vector<8x128xf32>
    %451 = arith.divf %449, %450 : vector<8x128xf32>
    %452 = vector.extract_strided_slice %432 {offsets = [0, 256], sizes = [8, 128], strides = [1, 1]} : vector<8x384xf32> to vector<8x128xf32>
    %453 = vector.extract_strided_slice %435 {offsets = [0, 256], sizes = [8, 128], strides = [1, 1]} : vector<8x384xf32> to vector<8x128xf32>
    %454 = arith.mulf %443, %453 : vector<8x128xf32>
    %455 = arith.addf %452, %454 : vector<8x128xf32>
    %456 = math.tanh %455 : vector<8x128xf32>
    %457 = arith.subf %421, %456 : vector<8x128xf32>
    %458 = arith.mulf %451, %457 : vector<8x128xf32>
    %459 = arith.addf %456, %458 : vector<8x128xf32>
    %460 = arith.index_cast %429 : i32 to index
    %c0_113 = arith.constant 0 : index
    %c0_114 = arith.constant 0 : index
    %461 = vector.load %arg5[%460, %c0_113, %c0_114] : memref<16x8x128xf32, #tpu.memory_space<vmem>>, vector<1x8x128xf32>
    %462 = vector.shape_cast %461 : vector<1x8x128xf32> to vector<8x128xf32>
    %463 = vector.shape_cast %459 : vector<8x128xf32> to vector<1x8x128xf32>
    tpu.vector_store %arg5[%460, %c0_113, %c0_114], %463 {strides = array<i32>} : memref<16x8x128xf32, #tpu.memory_space<vmem>>, vector<1x8x128xf32>,
    %c12_i32 = arith.constant 12 : i32
    %c2_i32_115 = arith.constant 2 : i32
    %464 = arith.muli %c2_i32_115, %c12_i32 : i32
    %c15_i32_116 = arith.constant 15 : i32
    %465 = arith.subi %c15_i32_116, %464 : i32
    %466 = arith.muli %arg0, %465 : i32
    %467 = arith.addi %c12_i32, %466 : i32
    %468 = arith.index_cast %467 : i32 to index
    %c0_117 = arith.constant 0 : index
    %c0_118 = arith.constant 0 : index
    %469 = vector.load %arg2[%468, %c0_117, %c0_118] : memref<16x8x384xf32, #tpu.memory_space<vmem>>, vector<1x8x384xf32>
    %470 = vector.shape_cast %469 : vector<1x8x384xf32> to vector<8x384xf32>
    %cst_119 = arith.constant dense<0.000000e+00> : vector<8x384xf32>
    %471 = tpu.matmul %459, %4, %cst_119 {dimension_numbers = #tpu.dot_dimension_numbers<[1], [0], [0], [1], [0, 0, 1, 1], [], []>} : vector<8x128xf32>, vector<128x384xf32>, vector<8x384xf32> -> vector<8x384xf32>
    %472 = vector.broadcast %6 : vector<1x384xf32> to vector<8x384xf32>
    %473 = arith.addf %471, %472 : vector<8x384xf32>
    %474 = vector.extract_strided_slice %470 {offsets = [0, 0], sizes = [8, 128], strides = [1, 1]} : vector<8x384xf32> to vector<8x128xf32>
    %475 = vector.extract_strided_slice %473 {offsets = [0, 0], sizes = [8, 128], strides = [1, 1]} : vector<8x384xf32> to vector<8x128xf32>
    %476 = arith.addf %474, %475 : vector<8x128xf32>
    %477 = arith.negf %476 : vector<8x128xf32>
    %478 = math.exp %477 : vector<8x128xf32>
    %cst_120 = arith.constant 1.000000e+00 : f32
    %479 = vector.broadcast %cst_120 : f32 to vector<8x128xf32>
    %480 = arith.addf %479, %478 : vector<8x128xf32>
    %481 = arith.divf %479, %480 : vector<8x128xf32>
    %482 = vector.extract_strided_slice %470 {offsets = [0, 128], sizes = [8, 128], strides = [1, 1]} : vector<8x384xf32> to vector<8x128xf32>
    %483 = vector.extract_strided_slice %473 {offsets = [0, 128], sizes = [8, 128], strides = [1, 1]} : vector<8x384xf32> to vector<8x128xf32>
    %484 = arith.addf %482, %483 : vector<8x128xf32>
    %485 = arith.negf %484 : vector<8x128xf32>
    %486 = math.exp %485 : vector<8x128xf32>
    %cst_121 = arith.constant 1.000000e+00 : f32
    %487 = vector.broadcast %cst_121 : f32 to vector<8x128xf32>
    %488 = arith.addf %487, %486 : vector<8x128xf32>
    %489 = arith.divf %487, %488 : vector<8x128xf32>
    %490 = vector.extract_strided_slice %470 {offsets = [0, 256], sizes = [8, 128], strides = [1, 1]} : vector<8x384xf32> to vector<8x128xf32>
    %491 = vector.extract_strided_slice %473 {offsets = [0, 256], sizes = [8, 128], strides = [1, 1]} : vector<8x384xf32> to vector<8x128xf32>
    %492 = arith.mulf %481, %491 : vector<8x128xf32>
    %493 = arith.addf %490, %492 : vector<8x128xf32>
    %494 = math.tanh %493 : vector<8x128xf32>
    %495 = arith.subf %459, %494 : vector<8x128xf32>
    %496 = arith.mulf %489, %495 : vector<8x128xf32>
    %497 = arith.addf %494, %496 : vector<8x128xf32>
    %498 = arith.index_cast %467 : i32 to index
    %c0_122 = arith.constant 0 : index
    %c0_123 = arith.constant 0 : index
    %499 = vector.load %arg5[%498, %c0_122, %c0_123] : memref<16x8x128xf32, #tpu.memory_space<vmem>>, vector<1x8x128xf32>
    %500 = vector.shape_cast %499 : vector<1x8x128xf32> to vector<8x128xf32>
    %501 = vector.shape_cast %497 : vector<8x128xf32> to vector<1x8x128xf32>
    tpu.vector_store %arg5[%498, %c0_122, %c0_123], %501 {strides = array<i32>} : memref<16x8x128xf32, #tpu.memory_space<vmem>>, vector<1x8x128xf32>,
    %c13_i32 = arith.constant 13 : i32
    %c2_i32_124 = arith.constant 2 : i32
    %502 = arith.muli %c2_i32_124, %c13_i32 : i32
    %c15_i32_125 = arith.constant 15 : i32
    %503 = arith.subi %c15_i32_125, %502 : i32
    %504 = arith.muli %arg0, %503 : i32
    %505 = arith.addi %c13_i32, %504 : i32
    %506 = arith.index_cast %505 : i32 to index
    %c0_126 = arith.constant 0 : index
    %c0_127 = arith.constant 0 : index
    %507 = vector.load %arg2[%506, %c0_126, %c0_127] : memref<16x8x384xf32, #tpu.memory_space<vmem>>, vector<1x8x384xf32>
    %508 = vector.shape_cast %507 : vector<1x8x384xf32> to vector<8x384xf32>
    %cst_128 = arith.constant dense<0.000000e+00> : vector<8x384xf32>
    %509 = tpu.matmul %497, %4, %cst_128 {dimension_numbers = #tpu.dot_dimension_numbers<[1], [0], [0], [1], [0, 0, 1, 1], [], []>} : vector<8x128xf32>, vector<128x384xf32>, vector<8x384xf32> -> vector<8x384xf32>
    %510 = vector.broadcast %6 : vector<1x384xf32> to vector<8x384xf32>
    %511 = arith.addf %509, %510 : vector<8x384xf32>
    %512 = vector.extract_strided_slice %508 {offsets = [0, 0], sizes = [8, 128], strides = [1, 1]} : vector<8x384xf32> to vector<8x128xf32>
    %513 = vector.extract_strided_slice %511 {offsets = [0, 0], sizes = [8, 128], strides = [1, 1]} : vector<8x384xf32> to vector<8x128xf32>
    %514 = arith.addf %512, %513 : vector<8x128xf32>
    %515 = arith.negf %514 : vector<8x128xf32>
    %516 = math.exp %515 : vector<8x128xf32>
    %cst_129 = arith.constant 1.000000e+00 : f32
    %517 = vector.broadcast %cst_129 : f32 to vector<8x128xf32>
    %518 = arith.addf %517, %516 : vector<8x128xf32>
    %519 = arith.divf %517, %518 : vector<8x128xf32>
    %520 = vector.extract_strided_slice %508 {offsets = [0, 128], sizes = [8, 128], strides = [1, 1]} : vector<8x384xf32> to vector<8x128xf32>
    %521 = vector.extract_strided_slice %511 {offsets = [0, 128], sizes = [8, 128], strides = [1, 1]} : vector<8x384xf32> to vector<8x128xf32>
    %522 = arith.addf %520, %521 : vector<8x128xf32>
    %523 = arith.negf %522 : vector<8x128xf32>
    %524 = math.exp %523 : vector<8x128xf32>
    %cst_130 = arith.constant 1.000000e+00 : f32
    %525 = vector.broadcast %cst_130 : f32 to vector<8x128xf32>
    %526 = arith.addf %525, %524 : vector<8x128xf32>
    %527 = arith.divf %525, %526 : vector<8x128xf32>
    %528 = vector.extract_strided_slice %508 {offsets = [0, 256], sizes = [8, 128], strides = [1, 1]} : vector<8x384xf32> to vector<8x128xf32>
    %529 = vector.extract_strided_slice %511 {offsets = [0, 256], sizes = [8, 128], strides = [1, 1]} : vector<8x384xf32> to vector<8x128xf32>
    %530 = arith.mulf %519, %529 : vector<8x128xf32>
    %531 = arith.addf %528, %530 : vector<8x128xf32>
    %532 = math.tanh %531 : vector<8x128xf32>
    %533 = arith.subf %497, %532 : vector<8x128xf32>
    %534 = arith.mulf %527, %533 : vector<8x128xf32>
    %535 = arith.addf %532, %534 : vector<8x128xf32>
    %536 = arith.index_cast %505 : i32 to index
    %c0_131 = arith.constant 0 : index
    %c0_132 = arith.constant 0 : index
    %537 = vector.load %arg5[%536, %c0_131, %c0_132] : memref<16x8x128xf32, #tpu.memory_space<vmem>>, vector<1x8x128xf32>
    %538 = vector.shape_cast %537 : vector<1x8x128xf32> to vector<8x128xf32>
    %539 = vector.shape_cast %535 : vector<8x128xf32> to vector<1x8x128xf32>
    tpu.vector_store %arg5[%536, %c0_131, %c0_132], %539 {strides = array<i32>} : memref<16x8x128xf32, #tpu.memory_space<vmem>>, vector<1x8x128xf32>,
    %c14_i32 = arith.constant 14 : i32
    %c2_i32_133 = arith.constant 2 : i32
    %540 = arith.muli %c2_i32_133, %c14_i32 : i32
    %c15_i32_134 = arith.constant 15 : i32
    %541 = arith.subi %c15_i32_134, %540 : i32
    %542 = arith.muli %arg0, %541 : i32
    %543 = arith.addi %c14_i32, %542 : i32
    %544 = arith.index_cast %543 : i32 to index
    %c0_135 = arith.constant 0 : index
    %c0_136 = arith.constant 0 : index
    %545 = vector.load %arg2[%544, %c0_135, %c0_136] : memref<16x8x384xf32, #tpu.memory_space<vmem>>, vector<1x8x384xf32>
    %546 = vector.shape_cast %545 : vector<1x8x384xf32> to vector<8x384xf32>
    %cst_137 = arith.constant dense<0.000000e+00> : vector<8x384xf32>
    %547 = tpu.matmul %535, %4, %cst_137 {dimension_numbers = #tpu.dot_dimension_numbers<[1], [0], [0], [1], [0, 0, 1, 1], [], []>} : vector<8x128xf32>, vector<128x384xf32>, vector<8x384xf32> -> vector<8x384xf32>
    %548 = vector.broadcast %6 : vector<1x384xf32> to vector<8x384xf32>
    %549 = arith.addf %547, %548 : vector<8x384xf32>
    %550 = vector.extract_strided_slice %546 {offsets = [0, 0], sizes = [8, 128], strides = [1, 1]} : vector<8x384xf32> to vector<8x128xf32>
    %551 = vector.extract_strided_slice %549 {offsets = [0, 0], sizes = [8, 128], strides = [1, 1]} : vector<8x384xf32> to vector<8x128xf32>
    %552 = arith.addf %550, %551 : vector<8x128xf32>
    %553 = arith.negf %552 : vector<8x128xf32>
    %554 = math.exp %553 : vector<8x128xf32>
    %cst_138 = arith.constant 1.000000e+00 : f32
    %555 = vector.broadcast %cst_138 : f32 to vector<8x128xf32>
    %556 = arith.addf %555, %554 : vector<8x128xf32>
    %557 = arith.divf %555, %556 : vector<8x128xf32>
    %558 = vector.extract_strided_slice %546 {offsets = [0, 128], sizes = [8, 128], strides = [1, 1]} : vector<8x384xf32> to vector<8x128xf32>
    %559 = vector.extract_strided_slice %549 {offsets = [0, 128], sizes = [8, 128], strides = [1, 1]} : vector<8x384xf32> to vector<8x128xf32>
    %560 = arith.addf %558, %559 : vector<8x128xf32>
    %561 = arith.negf %560 : vector<8x128xf32>
    %562 = math.exp %561 : vector<8x128xf32>
    %cst_139 = arith.constant 1.000000e+00 : f32
    %563 = vector.broadcast %cst_139 : f32 to vector<8x128xf32>
    %564 = arith.addf %563, %562 : vector<8x128xf32>
    %565 = arith.divf %563, %564 : vector<8x128xf32>
    %566 = vector.extract_strided_slice %546 {offsets = [0, 256], sizes = [8, 128], strides = [1, 1]} : vector<8x384xf32> to vector<8x128xf32>
    %567 = vector.extract_strided_slice %549 {offsets = [0, 256], sizes = [8, 128], strides = [1, 1]} : vector<8x384xf32> to vector<8x128xf32>
    %568 = arith.mulf %557, %567 : vector<8x128xf32>
    %569 = arith.addf %566, %568 : vector<8x128xf32>
    %570 = math.tanh %569 : vector<8x128xf32>
    %571 = arith.subf %535, %570 : vector<8x128xf32>
    %572 = arith.mulf %565, %571 : vector<8x128xf32>
    %573 = arith.addf %570, %572 : vector<8x128xf32>
    %574 = arith.index_cast %543 : i32 to index
    %c0_140 = arith.constant 0 : index
    %c0_141 = arith.constant 0 : index
    %575 = vector.load %arg5[%574, %c0_140, %c0_141] : memref<16x8x128xf32, #tpu.memory_space<vmem>>, vector<1x8x128xf32>
    %576 = vector.shape_cast %575 : vector<1x8x128xf32> to vector<8x128xf32>
    %577 = vector.shape_cast %573 : vector<8x128xf32> to vector<1x8x128xf32>
    tpu.vector_store %arg5[%574, %c0_140, %c0_141], %577 {strides = array<i32>} : memref<16x8x128xf32, #tpu.memory_space<vmem>>, vector<1x8x128xf32>,
    %c15_i32_142 = arith.constant 15 : i32
    %c2_i32_143 = arith.constant 2 : i32
    %578 = arith.muli %c2_i32_143, %c15_i32_142 : i32
    %c15_i32_144 = arith.constant 15 : i32
    %579 = arith.subi %c15_i32_144, %578 : i32
    %580 = arith.muli %arg0, %579 : i32
    %581 = arith.addi %c15_i32_142, %580 : i32
    %582 = arith.index_cast %581 : i32 to index
    %c0_145 = arith.constant 0 : index
    %c0_146 = arith.constant 0 : index
    %583 = vector.load %arg2[%582, %c0_145, %c0_146] : memref<16x8x384xf32, #tpu.memory_space<vmem>>, vector<1x8x384xf32>
    %584 = vector.shape_cast %583 : vector<1x8x384xf32> to vector<8x384xf32>
    %cst_147 = arith.constant dense<0.000000e+00> : vector<8x384xf32>
    %585 = tpu.matmul %573, %4, %cst_147 {dimension_numbers = #tpu.dot_dimension_numbers<[1], [0], [0], [1], [0, 0, 1, 1], [], []>} : vector<8x128xf32>, vector<128x384xf32>, vector<8x384xf32> -> vector<8x384xf32>
    %586 = vector.broadcast %6 : vector<1x384xf32> to vector<8x384xf32>
    %587 = arith.addf %585, %586 : vector<8x384xf32>
    %588 = vector.extract_strided_slice %584 {offsets = [0, 0], sizes = [8, 128], strides = [1, 1]} : vector<8x384xf32> to vector<8x128xf32>
    %589 = vector.extract_strided_slice %587 {offsets = [0, 0], sizes = [8, 128], strides = [1, 1]} : vector<8x384xf32> to vector<8x128xf32>
    %590 = arith.addf %588, %589 : vector<8x128xf32>
    %591 = arith.negf %590 : vector<8x128xf32>
    %592 = math.exp %591 : vector<8x128xf32>
    %cst_148 = arith.constant 1.000000e+00 : f32
    %593 = vector.broadcast %cst_148 : f32 to vector<8x128xf32>
    %594 = arith.addf %593, %592 : vector<8x128xf32>
    %595 = arith.divf %593, %594 : vector<8x128xf32>
    %596 = vector.extract_strided_slice %584 {offsets = [0, 128], sizes = [8, 128], strides = [1, 1]} : vector<8x384xf32> to vector<8x128xf32>
    %597 = vector.extract_strided_slice %587 {offsets = [0, 128], sizes = [8, 128], strides = [1, 1]} : vector<8x384xf32> to vector<8x128xf32>
    %598 = arith.addf %596, %597 : vector<8x128xf32>
    %599 = arith.negf %598 : vector<8x128xf32>
    %600 = math.exp %599 : vector<8x128xf32>
    %cst_149 = arith.constant 1.000000e+00 : f32
    %601 = vector.broadcast %cst_149 : f32 to vector<8x128xf32>
    %602 = arith.addf %601, %600 : vector<8x128xf32>
    %603 = arith.divf %601, %602 : vector<8x128xf32>
    %604 = vector.extract_strided_slice %584 {offsets = [0, 256], sizes = [8, 128], strides = [1, 1]} : vector<8x384xf32> to vector<8x128xf32>
    %605 = vector.extract_strided_slice %587 {offsets = [0, 256], sizes = [8, 128], strides = [1, 1]} : vector<8x384xf32> to vector<8x128xf32>
    %606 = arith.mulf %595, %605 : vector<8x128xf32>
    %607 = arith.addf %604, %606 : vector<8x128xf32>
    %608 = math.tanh %607 : vector<8x128xf32>
    %609 = arith.subf %573, %608 : vector<8x128xf32>
    %610 = arith.mulf %603, %609 : vector<8x128xf32>
    %611 = arith.addf %608, %610 : vector<8x128xf32>
    %612 = arith.index_cast %581 : i32 to index
    %c0_150 = arith.constant 0 : index
    %c0_151 = arith.constant 0 : index
    %613 = vector.load %arg5[%612, %c0_150, %c0_151] : memref<16x8x128xf32, #tpu.memory_space<vmem>>, vector<1x8x128xf32>
    %614 = vector.shape_cast %613 : vector<1x8x128xf32> to vector<8x128xf32>
    %615 = vector.shape_cast %611 : vector<8x128xf32> to vector<1x8x128xf32>
    tpu.vector_store %arg5[%612, %c0_150, %c0_151], %615 {strides = array<i32>} : memref<16x8x128xf32, #tpu.memory_space<vmem>>, vector<1x8x128xf32>,
    %c16_i32 = arith.constant 16 : i32
    %c0_152 = arith.constant 0 : index
    %c0_153 = arith.constant 0 : index
    %616 = vector.load %arg7[%c0_152, %c0_153] : memref<8x128xf32, #tpu.memory_space<vmem>>, vector<8x128xf32>
    tpu.vector_store %arg7[%c0_152, %c0_153], %611 {strides = array<i32>} : memref<8x128xf32, #tpu.memory_space<vmem>>, vector<8x128xf32>,
    %c0_154 = arith.constant 0 : index
    %c0_155 = arith.constant 0 : index
    %c0_156 = arith.constant 0 : index
    %617 = vector.load %arg6[%c0_154, %c0_155, %c0_156] : memref<1x8x128xf32, #tpu.memory_space<vmem>>, vector<1x8x128xf32>
    %618 = vector.shape_cast %617 : vector<1x8x128xf32> to vector<8x128xf32>
    %619 = vector.shape_cast %611 : vector<8x128xf32> to vector<1x8x128xf32>
    tpu.vector_store %arg6[%c0_154, %c0_155, %c0_156], %619 {strides = array<i32>} : memref<1x8x128xf32, #tpu.memory_space<vmem>>, vector<1x8x128xf32>,
    return
  }
  func.func @transform_0(%arg0: i32, %arg1: i32) -> (i32, i32, i32) {
    %c2_i32 = arith.constant 2 : i32
    %0 = arith.muli %c2_i32, %arg1 : i32
    %c1_i32 = arith.constant 1 : i32
    %1 = arith.subi %c1_i32, %0 : i32
    %2 = arith.muli %arg0, %1 : i32
    %3 = arith.addi %arg1, %2 : i32
    %c0_i32 = arith.constant 0 : i32
    %c0_i32_0 = arith.constant 0 : i32
    return %3, %c0_i32, %arg0 : i32, i32, i32
  }
  func.func @transform_1(%arg0: i32, %arg1: i32) -> (i32, i32, i32) {
    %c0_i32 = arith.constant 0 : i32
    %c0_i32_0 = arith.constant 0 : i32
    %c0_i32_1 = arith.constant 0 : i32
    return %arg0, %c0_i32, %c0_i32_0 : i32, i32, i32
  }
  func.func @transform_2(%arg0: i32, %arg1: i32) -> (i32, i32, i32) {
    %c0_i32 = arith.constant 0 : i32
    %c0_i32_0 = arith.constant 0 : i32
    %c0_i32_1 = arith.constant 0 : i32
    return %arg0, %c0_i32, %c0_i32_0 : i32, i32, i32
  }
  func.func @transform_3(%arg0: i32, %arg1: i32) -> (i32, i32, i32) {
    %c2_i32 = arith.constant 2 : i32
    %0 = arith.muli %c2_i32, %arg1 : i32
    %c1_i32 = arith.constant 1 : i32
    %1 = arith.subi %c1_i32, %0 : i32
    %2 = arith.muli %arg0, %1 : i32
    %3 = arith.addi %arg1, %2 : i32
    %c0_i32 = arith.constant 0 : i32
    %c0_i32_0 = arith.constant 0 : i32
    return %3, %c0_i32, %arg0 : i32, i32, i32
  }
  func.func @transform_4(%arg0: i32, %arg1: i32) -> (i32, i32, i32) {
    %c0_i32 = arith.constant 0 : i32
    %c0_i32_0 = arith.constant 0 : i32
    %c0_i32_1 = arith.constant 0 : i32
    return %arg0, %c0_i32, %c0_i32_0 : i32, i32, i32
  }
}

</mosaic_0001>

<bundles_post_ra>
// kernel: bi_gru_forward.2
= control target key start
LH: loop header
LB: loop body
LE: loop exit
PB: predicated region body
PF: predicated region fallthrough
CT: control target
= control target key end

     0   :  { %v1303_v3 = vmov 0.0   ;;  %vm126_vm0 = vcmask 523264   ;;  %s2715_s1 = inlined_call_operand.vmem [shape: f32[64,768], index: 1, kind: input, shape index: {}]   ;;  %s2716_s0 = inlined_call_operand.vmem [shape: f32[256,64], index: 0, kind: input, shape index: {}]   ;;  %s2717_s2 = inlined_call_operand.vmem [shape: f32[1,768], index: 2, kind: input, shape index: {}]   ;;  %s2718_s3 = inlined_call_operand.vmem [shape: f32[256,768], index: 3, kind: output, shape index: {}]  }
   0x1   :  { %v89_v0 = vld [vmem:[%s2715_s1 + $0x158] sm:$0xff]  ;;  %v88_v1 = vld [vmem:[%s2715_s1 + $0x150] sm:$0xff]  ;;  %v83_v2 = vld [vmem:[%s2715_s1 + $0x128] sm:$0xff]  ;;  %287 = vmatprep.mubr.f32.mxu0 %v1303_v3  ;;  %383 = vmatprep.mubr.f32.mxu1 %v1303_v3 }
   0x2   :  { %239 = vmatprep.subr.mxu0 %v89_v0  ;;  %1286 = vmatprep.subr.mxu1 %v89_v0  ;;  %v82_v4 = vld [vmem:[%s2715_s1 + $0x120] sm:$0xff]  ;;  %v77_v5 = vld [vmem:[%s2715_s1 + $0xf8] sm:$0xff]  ;;  %v76_v6 = vld [vmem:[%s2715_s1 + $0xf0] sm:$0xff] }
   0x3   :  { %240 = vmatpush1.msra.mxu0 %v88_v1  ;;  %1294 = vmatpush1.msra.mxu1 %v88_v1  ;;  %v71_v7 = vld [vmem:[%s2715_s1 + $0xc8] sm:$0xff]  ;;  %v70_v8 = vld [vmem:[%s2715_s1 + $0xc0] sm:$0xff]  ;;  %v65_v9 = vld [vmem:[%s2715_s1 + $0x98] sm:$0xff] }
   0x4   :  { %241 = vmatprep.subr.mxu0 %v83_v2  ;;  %1287 = vmatprep.subr.mxu1 %v83_v2  ;;  %v64_v10 = vld [vmem:[%s2715_s1 + $0x90] sm:$0xff]  ;;  %v59_v11 = vld [vmem:[%s2715_s1 + $0x68] sm:$0xff]  ;;  %v58_v12 = vld [vmem:[%s2715_s1 + $0x60] sm:$0xff] }
   0x5   :  { %242 = vmatpush1.msra.mxu0 %v82_v4  ;;  %1295 = vmatpush1.msra.mxu1 %v82_v4  ;;  %v53_v13 = vld [vmem:[%s2715_s1 + $0x38] sm:$0xff]  ;;  %v52_v14 = vld [vmem:[%s2715_s1 + $0x30] sm:$0xff]  ;;  %v47_v15 = vld [vmem:[%s2715_s1 + $0x8] sm:$0xff] }
   0x6   :  { %243 = vmatprep.subr.mxu0 %v77_v5  ;;  %1288 = vmatprep.subr.mxu1 %v77_v5  ;;  %v46_v16 = vld [vmem:[%s2715_s1] sm:$0xff]  ;;  %v91_v19 = vld [vmem:[%s2715_s1 + $0x168] sm:$0xff]  ;;  %v93_v20 = vld [vmem:[%s2715_s1 + $0x178] sm:$0xff] }
   0x7   :  { %244 = vmatpush1.msra.mxu0 %v76_v6  ;;  %1296 = vmatpush1.msra.mxu1 %v76_v6  ;;  %v1377_v17 = vld [vmem:[%s2716_s0] sm:$0xff]  ;;  %v92_v22 = vld [vmem:[%s2715_s1 + $0x170] sm:$0xff]  ;;  %v1403_v23 = vld [vmem:[%s2716_s0 + $0x8] sm:$0xff] }
   0x8   :  { %245 = vmatprep.subr.mxu0 %v71_v7  ;;  %1289 = vmatprep.subr.mxu1 %v71_v7  ;;  %v1382_v18 = vld [vmem:[%s2716_s0 + $0x80] sm:$0xff]  ;;  %v1408_v24 = vld [vmem:[%s2716_s0 + $0x88] sm:$0xff]  ;;  %v85_v25 = vld [vmem:[%s2715_s1 + $0x138] sm:$0xff] }
   0x9   :  { %246 = vmatpush1.msra.mxu0 %v70_v8  ;;  %1297 = vmatpush1.msra.mxu1 %v70_v8  ;;  %v90_v21 = vld [vmem:[%s2715_s1 + $0x160] sm:$0xff]  ;;  %v87_v26 = vld [vmem:[%s2715_s1 + $0x148] sm:$0xff]  ;;  %v84_v27 = vld [vmem:[%s2715_s1 + $0x130] sm:$0xff] }
   0xa   :  { %247 = vmatprep.subr.mxu0 %v65_v9  ;;  %1290 = vmatprep.subr.mxu1 %v65_v9  ;;  %v86_v28 = vld [vmem:[%s2715_s1 + $0x140] sm:$0xff]  ;;  %v1433_v29 = vld [vmem:[%s2716_s0 + $0x10] sm:$0xff]  ;;  %v79_v31 = vld [vmem:[%s2715_s1 + $0x108] sm:$0xff] }
   0xb   :  { %248 = vmatpush1.msra.mxu0 %v64_v10  ;;  %1298 = vmatpush1.msra.mxu1 %v64_v10  ;;  %v1438_v30 = vld [vmem:[%s2716_s0 + $0x90] sm:$0xff]  ;;  %v81_v32 = vld [vmem:[%s2715_s1 + $0x118] sm:$0xff]  ;;  %v78_v33 = vld [vmem:[%s2715_s1 + $0x100] sm:$0xff] }
   0xc   :  { %249 = vmatprep.subr.mxu0 %v59_v11  ;;  %1291 = vmatprep.subr.mxu1 %v59_v11  ;;  %v80_v34 = vld [vmem:[%s2715_s1 + $0x110] sm:$0xff]  ;;  %v1461_v35 = vld [vmem:[%s2716_s0 + $0x18] sm:$0xff]  ;;  %v75_v38 = vld [vmem:[%s2715_s1 + $0xe8] sm:$0xff] }
   0xd   :  { %250 = vmatpush1.msra.mxu0 %v58_v12  ;;  %1299 = vmatpush1.msra.mxu1 %v58_v12  ;;  %v1466_v36 = vld [vmem:[%s2716_s0 + $0x98] sm:$0xff]  ;;  %v72_v39 = vld [vmem:[%s2715_s1 + $0xd0] sm:$0xff]  ;;  %v74_v40 = vld [vmem:[%s2715_s1 + $0xe0] sm:$0xff] }
   0xe   :  { %251 = vmatprep.subr.mxu0 %v53_v13  ;;  %1292 = vmatprep.subr.mxu1 %v53_v13  ;;  %v73_v37 = vld [vmem:[%s2715_s1 + $0xd8] sm:$0xff]  ;;  %v1489_v41 = vld [vmem:[%s2716_s0 + $0x20] sm:$0xff]  ;;  %v67_v43 = vld [vmem:[%s2715_s1 + $0xa8] sm:$0xff] }
   0xf   :  { %252 = vmatpush1.msra.mxu0 %v52_v14  ;;  %1300 = vmatpush1.msra.mxu1 %v52_v14  ;;  %v1494_v42 = vld [vmem:[%s2716_s0 + $0xa0] sm:$0xff]  ;;  %v69_v44 = vld [vmem:[%s2715_s1 + $0xb8] sm:$0xff]  ;;  %v68_v46 = vld [vmem:[%s2715_s1 + $0xb0] sm:$0xff] }
  0x10   :  { %253 = vmatprep.subr.mxu0 %v47_v15  ;;  %1293 = vmatprep.subr.mxu1 %v47_v15  ;;  %v66_v45 = vld [vmem:[%s2715_s1 + $0xa0] sm:$0xff]  ;;  %v1517_v47 = vld [vmem:[%s2716_s0 + $0x28] sm:$0xff]  ;;  %v61_v49 = vld [vmem:[%s2715_s1 + $0x78] sm:$0xff] }
  0x11   :  { %254 = vmatpush1.msra.mxu0 %v46_v16  ;;  %1301 = vmatpush1.msra.mxu1 %v46_v16  ;;  %v1522_v48 = vld [vmem:[%s2716_s0 + $0xa8] sm:$0xff]  ;;  %v60_v51 = vld [vmem:[%s2715_s1 + $0x70] sm:$0xff]  ;;  %v62_v52 = vld [vmem:[%s2715_s1 + $0x80] sm:$0xff] }
  0x12   :  { %1190 = vmatmul.mubr.msk.f32.vlgmr.msra.gmra.mxu0 %vm126_vm0, %v1377_v17  ;;  %1206 = vmatmul.mubr.msk.f32.vlgmr.msra.gmra.mxu1 %vm126_vm0, %v1382_v18  ;;  %v63_v50 = vld [vmem:[%s2715_s1 + $0x88] sm:$0xff]  ;;  %v1545_v53 = vld [vmem:[%s2716_s0 + $0x30] sm:$0xff]  ;;  %v57_v56 = vld [vmem:[%s2715_s1 + $0x58] sm:$0xff] }
  0x13   :  { %496 = vmatprep.subr.mxu1 %v91_v19  ;;  %753 = vmatprep.subr.mxu0 %v93_v20  ;;  %v1550_v54 = vld [vmem:[%s2716_s0 + $0xb0] sm:$0xff]  ;;  %v55_v55 = vld [vmem:[%s2715_s1 + $0x48] sm:$0xff]  ;;  %v54_v57 = vld [vmem:[%s2715_s1 + $0x40] sm:$0xff] }
  0x14   :  { %497 = vmatpush1.msra.mxu1 %v90_v21  ;;  %754 = vmatpush1.msra.mxu0 %v92_v22  ;;  %v56_v58 = vld [vmem:[%s2715_s1 + $0x50] sm:$0xff]  ;;  %v1573_v59 = vld [vmem:[%s2716_s0 + $0x38] sm:$0xff]  ;;  %v51_v62 = vld [vmem:[%s2715_s1 + $0x28] sm:$0xff] }
  0x15   :  { %293 = vmatprep.mubr.f32.mxu0 %v1303_v3  ;;  %389 = vmatprep.mubr.f32.mxu1 %v1303_v3  ;;  %v1578_v60 = vld [vmem:[%s2716_s0 + $0xb8] sm:$0xff]  ;;  %v48_v63 = vld [vmem:[%s2715_s1 + $0x10] sm:$0xff]  ;;  %v50_v0 = vld [vmem:[%s2715_s1 + $0x20] sm:$0xff] }
  0x16   :  { %1191 = vmatmul.mubr.msk.f32.gmra.mxu0 %vm126_vm0, %v1403_v23  ;;  %1207 = vmatmul.mubr.msk.f32.gmra.mxu1 %vm126_vm0, %v1408_v24  ;;  %v49_v61 = vld [vmem:[%s2715_s1 + $0x18] sm:$0xff]  ;;  %v1601_v1 = vld [vmem:[%s2716_s0 + $0x40] sm:$0xff]  ;;  %v1617_v4 = vld [vmem:[%s2716_s0 + $0x48] sm:$0xff] }
  0x17   :  { %299 = vmatprep.mubr.f32.mxu0 %v1303_v3  ;;  %395 = vmatprep.mubr.f32.mxu1 %v1303_v3  ;;  %v1606_v2 = vld [vmem:[%s2716_s0 + $0xc0] sm:$0xff]  ;;  %v1622_v5 = vld [vmem:[%s2716_s0 + $0xc8] sm:$0xff]  ;;  %v1633_v6 = vld [vmem:[%s2716_s0 + $0x50] sm:$0xff] }
  0x18   :  { %498 = vmatprep.subr.mxu1 %v85_v25  ;;  %755 = vmatprep.subr.mxu0 %v87_v26  ;;  %v1638_v7 = vld [vmem:[%s2716_s0 + $0xd0] sm:$0xff]  ;;  %v1649_v8 = vld [vmem:[%s2716_s0 + $0x58] sm:$0xff]  ;;  %v1665_v10 = vld [vmem:[%s2716_s0 + $0x60] sm:$0xff] }
  0x19   :  { %499 = vmatpush1.msra.mxu1 %v84_v27  ;;  %756 = vmatpush1.msra.mxu0 %v86_v28  ;;  %v1654_v9 = vld [vmem:[%s2716_s0 + $0xd8] sm:$0xff]  ;;  %v1670_v11 = vld [vmem:[%s2716_s0 + $0xe0] sm:$0xff]  ;;  %v1681_v12 = vld [vmem:[%s2716_s0 + $0x68] sm:$0xff] }
  0x1a   :  { %1192 = vmatmul.mubr.msk.f32.gmra.mxu0 %vm126_vm0, %v1433_v29  ;;  %1208 = vmatmul.mubr.msk.f32.gmra.mxu1 %vm126_vm0, %v1438_v30  ;;  %v1686_v13 = vld [vmem:[%s2716_s0 + $0xe8] sm:$0xff]  ;;  %v1697_v14 = vld [vmem:[%s2716_s0 + $0x70] sm:$0xff]  ;;  %v1713_v16 = vld [vmem:[%s2716_s0 + $0x78] sm:$0xff] }
  0x1b   :  { %305 = vmatprep.mubr.f32.mxu0 %v1303_v3  ;;  %401 = vmatprep.mubr.f32.mxu1 %v1303_v3  ;;  %v1702_v15 = vld [vmem:[%s2716_s0 + $0xf0] sm:$0xff]  ;;  %v1718_v19 = vld [vmem:[%s2716_s0 + $0xf8] sm:$0xff]  ;;  %v1918_v21 = vld [vmem:[%s2717_s2] sm:$0x3f] }
  0x1c   :  { %500 = vmatprep.subr.mxu1 %v79_v31  ;;  %757 = vmatprep.subr.mxu0 %v81_v32 }
  0x1d   :  { %501 = vmatpush1.msra.mxu1 %v78_v33  ;;  %758 = vmatpush1.msra.mxu0 %v80_v34 }
  0x1e   :  { %1193 = vmatmul.mubr.msk.f32.gmra.mxu0 %vm126_vm0, %v1461_v35  ;;  %1209 = vmatmul.mubr.msk.f32.gmra.mxu1 %vm126_vm0, %v1466_v36 }
  0x1f   :  { %311 = vmatprep.mubr.f32.mxu0 %v1303_v3  ;;  %407 = vmatprep.mubr.f32.mxu1 %v1303_v3 }
  0x20   :  { %502 = vmatprep.subr.mxu1 %v73_v37  ;;  %759 = vmatprep.subr.mxu0 %v75_v38 }
  0x21   :  { %503 = vmatpush1.msra.mxu1 %v72_v39  ;;  %760 = vmatpush1.msra.mxu0 %v74_v40 }
  0x22   :  { %1194 = vmatmul.mubr.msk.f32.gmra.mxu0 %vm126_vm0, %v1489_v41  ;;  %1210 = vmatmul.mubr.msk.f32.gmra.mxu1 %vm126_vm0, %v1494_v42 }
  0x23   :  { %317 = vmatprep.mubr.f32.mxu0 %v1303_v3  ;;  %413 = vmatprep.mubr.f32.mxu1 %v1303_v3 }
  0x24   :  { %504 = vmatprep.subr.mxu1 %v67_v43  ;;  %761 = vmatprep.subr.mxu0 %v69_v44 }
  0x25   :  { %505 = vmatpush1.msra.mxu1 %v66_v45  ;;  %762 = vmatpush1.msra.mxu0 %v68_v46 }
  0x26   :  { %1195 = vmatmul.mubr.msk.f32.gmra.mxu0 %vm126_vm0, %v1517_v47  ;;  %1211 = vmatmul.mubr.msk.f32.gmra.mxu1 %vm126_vm0, %v1522_v48 }
  0x27   :  { %323 = vmatprep.mubr.f32.mxu0 %v1303_v3  ;;  %419 = vmatprep.mubr.f32.mxu1 %v1303_v3 }
  0x28   :  { %506 = vmatprep.subr.mxu1 %v61_v49  ;;  %763 = vmatprep.subr.mxu0 %v63_v50 }
  0x29   :  { %507 = vmatpush1.msra.mxu1 %v60_v51  ;;  %764 = vmatpush1.msra.mxu0 %v62_v52 }
  0x2a   :  { %1196 = vmatmul.mubr.msk.f32.gmra.mxu0 %vm126_vm0, %v1545_v53  ;;  %1212 = vmatmul.mubr.msk.f32.gmra.mxu1 %vm126_vm0, %v1550_v54 }
  0x2b   :  { %329 = vmatprep.mubr.f32.mxu0 %v1303_v3  ;;  %425 = vmatprep.mubr.f32.mxu1 %v1303_v3 }
  0x2c   :  { %508 = vmatprep.subr.mxu1 %v55_v55  ;;  %765 = vmatprep.subr.mxu0 %v57_v56 }
  0x2d   :  { %509 = vmatpush1.msra.mxu1 %v54_v57  ;;  %766 = vmatpush1.msra.mxu0 %v56_v58 }
  0x2e   :  { %1197 = vmatmul.mubr.msk.f32.gmra.mxu0 %vm126_vm0, %v1573_v59  ;;  %1213 = vmatmul.mubr.msk.f32.gmra.mxu1 %vm126_vm0, %v1578_v60 }
  0x2f   :  { %335 = vmatprep.mubr.f32.mxu0 %v1303_v3  ;;  %431 = vmatprep.mubr.f32.mxu1 %v1303_v3 }
  0x30   :  { %510 = vmatprep.subr.mxu1 %v49_v61  ;;  %767 = vmatprep.subr.mxu0 %v51_v62 }
  0x31   :  { %511 = vmatpush1.msra.mxu1 %v48_v63  ;;  %768 = vmatpush1.msra.mxu0 %v50_v0 }
  0x32   :  { %1198 = vmatmul.mubr.msk.f32.gmra.mxu0 %vm126_vm0, %v1601_v1  ;;  %1214 = vmatmul.mubr.msk.f32.gmra.mxu1 %vm126_vm0, %v1606_v2 }
  0x33   :  { %341 = vmatprep.mubr.f32.mxu0 %v1303_v3  ;;  %437 = vmatprep.mubr.f32.mxu1 %v1303_v3 }
  0x36   :  { %1199 = vmatmul.mubr.msk.f32.gmra.mxu0 %vm126_vm0, %v1617_v4  ;;  %1215 = vmatmul.mubr.msk.f32.gmra.mxu1 %vm126_vm0, %v1622_v5 }
  0x37   :  { %347 = vmatprep.mubr.f32.mxu0 %v1303_v3  ;;  %443 = vmatprep.mubr.f32.mxu1 %v1303_v3 }
  0x3a   :  { %1200 = vmatmul.mubr.msk.f32.gmra.mxu0 %vm126_vm0, %v1633_v6  ;;  %1216 = vmatmul.mubr.msk.f32.gmra.mxu1 %vm126_vm0, %v1638_v7 }
  0x3b   :  { %353 = vmatprep.mubr.f32.mxu0 %v1303_v3  ;;  %449 = vmatprep.mubr.f32.mxu1 %v1303_v3 }
  0x3e   :  { %1201 = vmatmul.mubr.msk.f32.gmra.mxu0 %vm126_vm0, %v1649_v8  ;;  %1217 = vmatmul.mubr.msk.f32.gmra.mxu1 %vm126_vm0, %v1654_v9 }
  0x3f   :  { %359 = vmatprep.mubr.f32.mxu0 %v1303_v3  ;;  %455 = vmatprep.mubr.f32.mxu1 %v1303_v3 }
  0x42   :  { %1202 = vmatmul.mubr.msk.f32.gmra.mxu0 %vm126_vm0, %v1665_v10  ;;  %1218 = vmatmul.mubr.msk.f32.gmra.mxu1 %vm126_vm0, %v1670_v11 }
  0x43   :  { %365 = vmatprep.mubr.f32.mxu0 %v1303_v3  ;;  %461 = vmatprep.mubr.f32.mxu1 %v1303_v3 }
  0x46   :  { %1203 = vmatmul.mubr.msk.f32.gmra.mxu0 %vm126_vm0, %v1681_v12  ;;  %1219 = vmatmul.mubr.msk.f32.gmra.mxu1 %vm126_vm0, %v1686_v13 }
  0x47   :  { %371 = vmatprep.mubr.f32.mxu0 %v1303_v3  ;;  %467 = vmatprep.mubr.f32.mxu1 %v1303_v3 }
  0x4a   :  { %1204 = vmatmul.mubr.msk.f32.gmra.mxu0 %vm126_vm0, %v1697_v14  ;;  %1220 = vmatmul.mubr.msk.f32.gmra.mxu1 %vm126_vm0, %v1702_v15 }
  0x4b   :  { %377 = vmatprep.mubr.f32.mxu0 %v1303_v3  ;;  %473 = vmatprep.mubr.f32.mxu1 %v1303_v3 }
  0x4e   :  { %1205 = vmatmul.mubr.msk.f32.gmra.mxu0 %vm126_vm0, %v1713_v16  ;;  %1221 = vmatmul.mubr.msk.f32.gmra.mxu1 %vm126_vm0, %v1718_v19 }
  0x4f   :  { %544 = vmatprep.mubr.f32.mxu1 %v1303_v3  ;;  %801 = vmatprep.mubr.f32.mxu0 %v1303_v3 }
  0x52   :  { %1222 = vmatmul.mubr.msk.f32.vlgmr.msra.gmra.mxu1 %vm126_vm0, %v1377_v17  ;;  %1254 = vmatmul.mubr.msk.f32.vlgmr.msra.gmra.mxu0 %vm126_vm0, %v1377_v17  ;;  %v96_v17 = vlaneseq }
  0x53   :  { %550 = vmatprep.mubr.f32.mxu1 %v1303_v3  ;;  %807 = vmatprep.mubr.f32.mxu0 %v1303_v3 }
  0x56   :  { %1223 = vmatmul.mubr.msk.f32.gmra.mxu1 %vm126_vm0, %v1403_v23  ;;  %1255 = vmatmul.mubr.msk.f32.gmra.mxu0 %vm126_vm0, %v1403_v23 }
  0x57   :  { %556 = vmatprep.mubr.f32.mxu1 %v1303_v3  ;;  %813 = vmatprep.mubr.f32.mxu0 %v1303_v3 }
  0x5a   :  { %1224 = vmatmul.mubr.msk.f32.gmra.mxu1 %vm126_vm0, %v1433_v29  ;;  %1256 = vmatmul.mubr.msk.f32.gmra.mxu0 %vm126_vm0, %v1433_v29 }
  0x5b   :  { %562 = vmatprep.mubr.f32.mxu1 %v1303_v3  ;;  %819 = vmatprep.mubr.f32.mxu0 %v1303_v3 }
  0x5e   :  { %1225 = vmatmul.mubr.msk.f32.gmra.mxu1 %vm126_vm0, %v1461_v35  ;;  %1257 = vmatmul.mubr.msk.f32.gmra.mxu0 %vm126_vm0, %v1461_v35 }
  0x5f   :  { %568 = vmatprep.mubr.f32.mxu1 %v1303_v3  ;;  %825 = vmatprep.mubr.f32.mxu0 %v1303_v3 }
  0x62   :  { %1226 = vmatmul.mubr.msk.f32.gmra.mxu1 %vm126_vm0, %v1489_v41  ;;  %1258 = vmatmul.mubr.msk.f32.gmra.mxu0 %vm126_vm0, %v1489_v41 }
  0x63   :  { %574 = vmatprep.mubr.f32.mxu1 %v1303_v3  ;;  %831 = vmatprep.mubr.f32.mxu0 %v1303_v3 }
  0x66   :  { %1227 = vmatmul.mubr.msk.f32.gmra.mxu1 %vm126_vm0, %v1517_v47  ;;  %1259 = vmatmul.mubr.msk.f32.gmra.mxu0 %vm126_vm0, %v1517_v47 }
  0x67   :  { %580 = vmatprep.mubr.f32.mxu1 %v1303_v3  ;;  %837 = vmatprep.mubr.f32.mxu0 %v1303_v3 }
  0x6a   :  { %1228 = vmatmul.mubr.msk.f32.gmra.mxu1 %vm126_vm0, %v1545_v53  ;;  %1260 = vmatmul.mubr.msk.f32.gmra.mxu0 %vm126_vm0, %v1545_v53 }
  0x6b   :  { %586 = vmatprep.mubr.f32.mxu1 %v1303_v3  ;;  %843 = vmatprep.mubr.f32.mxu0 %v1303_v3 }
  0x6e   :  { %1229 = vmatmul.mubr.msk.f32.gmra.mxu1 %vm126_vm0, %v1573_v59  ;;  %1261 = vmatmul.mubr.msk.f32.gmra.mxu0 %vm126_vm0, %v1573_v59 }
  0x6f   :  { %592 = vmatprep.mubr.f32.mxu1 %v1303_v3  ;;  %849 = vmatprep.mubr.f32.mxu0 %v1303_v3 }
  0x72   :  { %1230 = vmatmul.mubr.msk.f32.gmra.mxu1 %vm126_vm0, %v1601_v1  ;;  %1262 = vmatmul.mubr.msk.f32.gmra.mxu0 %vm126_vm0, %v1601_v1 }
  0x73   :  { %598 = vmatprep.mubr.f32.mxu1 %v1303_v3  ;;  %855 = vmatprep.mubr.f32.mxu0 %v1303_v3 }
  0x76   :  { %1231 = vmatmul.mubr.msk.f32.gmra.mxu1 %vm126_vm0, %v1617_v4  ;;  %1263 = vmatmul.mubr.msk.f32.gmra.mxu0 %vm126_vm0, %v1617_v4 }
  0x77   :  { %604 = vmatprep.mubr.f32.mxu1 %v1303_v3  ;;  %861 = vmatprep.mubr.f32.mxu0 %v1303_v3 }
  0x7a   :  { %1232 = vmatmul.mubr.msk.f32.gmra.mxu1 %vm126_vm0, %v1633_v6  ;;  %1264 = vmatmul.mubr.msk.f32.gmra.mxu0 %vm126_vm0, %v1633_v6 }
  0x7b   :  { %610 = vmatprep.mubr.f32.mxu1 %v1303_v3  ;;  %867 = vmatprep.mubr.f32.mxu0 %v1303_v3 }
  0x7e   :  { %1233 = vmatmul.mubr.msk.f32.gmra.mxu1 %vm126_vm0, %v1649_v8  ;;  %1265 = vmatmul.mubr.msk.f32.gmra.mxu0 %vm126_vm0, %v1649_v8 }
  0x7f   :  { %616 = vmatprep.mubr.f32.mxu1 %v1303_v3  ;;  %873 = vmatprep.mubr.f32.mxu0 %v1303_v3 }
  0x82   :  { %1234 = vmatmul.mubr.msk.f32.gmra.mxu1 %vm126_vm0, %v1665_v10  ;;  %1266 = vmatmul.mubr.msk.f32.gmra.mxu0 %vm126_vm0, %v1665_v10 }
  0x83   :  { %622 = vmatprep.mubr.f32.mxu1 %v1303_v3  ;;  %879 = vmatprep.mubr.f32.mxu0 %v1303_v3 }
  0x86   :  { %1235 = vmatmul.mubr.msk.f32.gmra.mxu1 %vm126_vm0, %v1681_v12  ;;  %1267 = vmatmul.mubr.msk.f32.gmra.mxu0 %vm126_vm0, %v1681_v12 }
  0x87   :  { %628 = vmatprep.mubr.f32.mxu1 %v1303_v3  ;;  %885 = vmatprep.mubr.f32.mxu0 %v1303_v3 }
  0x8a   :  { %1236 = vmatmul.mubr.msk.f32.gmra.mxu1 %vm126_vm0, %v1697_v14  ;;  %1268 = vmatmul.mubr.msk.f32.gmra.mxu0 %vm126_vm0, %v1697_v14 }
  0x8b   :  { %634 = vmatprep.mubr.f32.mxu1 %v1303_v3  ;;  %891 = vmatprep.mubr.f32.mxu0 %v1303_v3 }
  0x8e   :  { %1237 = vmatmul.mubr.msk.f32.gmra.mxu1 %vm126_vm0, %v1713_v16  ;;  %1269 = vmatmul.mubr.msk.f32.gmra.mxu0 %vm126_vm0, %v1713_v16 }
  0x8f   :  { %640 = vmatprep.mubr.f32.mxu1 %v1303_v3  ;;  %897 = vmatprep.mubr.f32.mxu0 %v1303_v3 }
  0x92   :  { %1238 = vmatmul.mubr.msk.f32.gmra.mxu1 %vm126_vm0, %v1382_v18  ;;  %1270 = vmatmul.mubr.msk.f32.gmra.mxu0 %vm126_vm0, %v1382_v18  ;;  %v1906_v18 = vshrl.u32 %v96_v17, 7 }
  0x93   :  { %646 = vmatprep.mubr.f32.mxu1 %v1303_v3  ;;  %903 = vmatprep.mubr.f32.mxu0 %v1303_v3 }
  0x94   :  { %v98_v20 = vsub.s32 0, %v1906_v18  ;;  %v102_v22 = vsub.s32 1, %v1906_v18 }
  0x96   :  { %1239 = vmatmul.mubr.msk.f32.gmra.mxu1 %vm126_vm0, %v1408_v24  ;;  %1271 = vmatmul.mubr.msk.f32.gmra.mxu0 %vm126_vm0, %v1408_v24  ;;  %v1926_v23 = vrot.slane %v1918_v21, %v98_v20 }
  0x97   :  { %652 = vmatprep.mubr.f32.mxu1 %v1303_v3  ;;  %909 = vmatprep.mubr.f32.mxu0 %v1303_v3 }
  0x9a   :  { %1240 = vmatmul.mubr.msk.f32.gmra.mxu1 %vm126_vm0, %v1438_v30  ;;  %1272 = vmatmul.mubr.msk.f32.gmra.mxu0 %vm126_vm0, %v1438_v30 }
  0x9b   :  { %658 = vmatprep.mubr.f32.mxu1 %v1303_v3  ;;  %915 = vmatprep.mubr.f32.mxu0 %v1303_v3 }
  0x9e   :  { %1241 = vmatmul.mubr.msk.f32.gmra.mxu1 %vm126_vm0, %v1466_v36  ;;  %1273 = vmatmul.mubr.msk.f32.gmra.mxu0 %vm126_vm0, %v1466_v36 }
  0x9f   :  { %664 = vmatprep.mubr.f32.mxu1 %v1303_v3  ;;  %921 = vmatprep.mubr.f32.mxu0 %v1303_v3 }
  0xa2   :  { %1242 = vmatmul.mubr.msk.f32.gmra.mxu1 %vm126_vm0, %v1494_v42  ;;  %1274 = vmatmul.mubr.msk.f32.gmra.mxu0 %vm126_vm0, %v1494_v42 }
  0xa3   :  { %670 = vmatprep.mubr.f32.mxu1 %v1303_v3  ;;  %927 = vmatprep.mubr.f32.mxu0 %v1303_v3 }
  0xa6   :  { %1243 = vmatmul.mubr.msk.f32.gmra.mxu1 %vm126_vm0, %v1522_v48  ;;  %1275 = vmatmul.mubr.msk.f32.gmra.mxu0 %vm126_vm0, %v1522_v48 }
  0xa7   :  { %676 = vmatprep.mubr.f32.mxu1 %v1303_v3  ;;  %933 = vmatprep.mubr.f32.mxu0 %v1303_v3 }
  0xaa   :  { %1244 = vmatmul.mubr.msk.f32.gmra.mxu1 %vm126_vm0, %v1550_v54  ;;  %1276 = vmatmul.mubr.msk.f32.gmra.mxu0 %vm126_vm0, %v1550_v54 }
  0xab   :  { %682 = vmatprep.mubr.f32.mxu1 %v1303_v3  ;;  %939 = vmatprep.mubr.f32.mxu0 %v1303_v3 }
  0xae   :  { %1245 = vmatmul.mubr.msk.f32.gmra.mxu1 %vm126_vm0, %v1578_v60  ;;  %1277 = vmatmul.mubr.msk.f32.gmra.mxu0 %vm126_vm0, %v1578_v60 }
  0xaf   :  { %688 = vmatprep.mubr.f32.mxu1 %v1303_v3  ;;  %945 = vmatprep.mubr.f32.mxu0 %v1303_v3 }
  0xb2   :  { %1246 = vmatmul.mubr.msk.f32.gmra.mxu1 %vm126_vm0, %v1606_v2  ;;  %1278 = vmatmul.mubr.msk.f32.gmra.mxu0 %vm126_vm0, %v1606_v2 }
  0xb3   :  { %694 = vmatprep.mubr.f32.mxu1 %v1303_v3  ;;  %951 = vmatprep.mubr.f32.mxu0 %v1303_v3 }
  0xb6   :  { %1247 = vmatmul.mubr.msk.f32.gmra.mxu1 %vm126_vm0, %v1622_v5  ;;  %1279 = vmatmul.mubr.msk.f32.gmra.mxu0 %vm126_vm0, %v1622_v5 }
  0xb7   :  { %700 = vmatprep.mubr.f32.mxu1 %v1303_v3  ;;  %957 = vmatprep.mubr.f32.mxu0 %v1303_v3 }
  0xba   :  { %1248 = vmatmul.mubr.msk.f32.gmra.mxu1 %vm126_vm0, %v1638_v7  ;;  %1280 = vmatmul.mubr.msk.f32.gmra.mxu0 %vm126_vm0, %v1638_v7 }
  0xbb   :  { %706 = vmatprep.mubr.f32.mxu1 %v1303_v3  ;;  %963 = vmatprep.mubr.f32.mxu0 %v1303_v3 }
  0xbe   :  { %1249 = vmatmul.mubr.msk.f32.gmra.mxu1 %vm126_vm0, %v1654_v9  ;;  %1281 = vmatmul.mubr.msk.f32.gmra.mxu0 %vm126_vm0, %v1654_v9 }
  0xbf   :  { %712 = vmatprep.mubr.f32.mxu1 %v1303_v3  ;;  %969 = vmatprep.mubr.f32.mxu0 %v1303_v3 }
  0xc2   :  { %1250 = vmatmul.mubr.msk.f32.gmra.mxu1 %vm126_vm0, %v1670_v11  ;;  %1282 = vmatmul.mubr.msk.f32.gmra.mxu0 %vm126_vm0, %v1670_v11 }
  0xc3   :  { %718 = vmatprep.mubr.f32.mxu1 %v1303_v3  ;;  %975 = vmatprep.mubr.f32.mxu0 %v1303_v3 }
  0xc6   :  { %1251 = vmatmul.mubr.msk.f32.gmra.mxu1 %vm126_vm0, %v1686_v13  ;;  %1283 = vmatmul.mubr.msk.f32.gmra.mxu0 %vm126_vm0, %v1686_v13 }
  0xc7   :  { %724 = vmatprep.mubr.f32.mxu1 %v1303_v3  ;;  %981 = vmatprep.mubr.f32.mxu0 %v1303_v3 }
  0xca   :  { %1252 = vmatmul.mubr.msk.f32.gmra.mxu1 %vm126_vm0, %v1702_v15  ;;  %1284 = vmatmul.mubr.msk.f32.gmra.mxu0 %vm126_vm0, %v1702_v15 }
  0xcb   :  { %730 = vmatprep.mubr.f32.mxu1 %v1303_v3  ;;  %987 = vmatprep.mubr.f32.mxu0 %v1303_v3  ;;  %v1929_v3 = vrot.slane %v1918_v21, %v102_v22 }
  0xce   :  { %1253 = vmatmul.mubr.msk.f32.gmra.mxu1 %vm126_vm0, %v1718_v19  ;;  %1285 = vmatmul.mubr.msk.f32.gmra.mxu0 %vm126_vm0, %v1718_v19 }
  0xd2   :  { %v289_v24 = vpop.f32.mrf.mxu0  ;;  %v385_v25 = vpop.f32.mrf.mxu1 }
  0xd3   :  { %v290_v26 = vadd.f32 %v289_v24, %v1926_v23  ;;  %v386_v27 = vadd.f32 %v385_v25, %v1926_v23 }
  0xd4   :  { %v291_v28 = vpop.f32.mrf.mxu0  ;;  %v387_v29 = vpop.f32.mrf.mxu1 }
  0xd5   :  { %994 = vst [vmem:[%s2718_s3] sm:$0xff] %v290_v26  ;;  %1090 = vst [vmem:[%s2718_s3 + $0x300] sm:$0xff] %v386_v27  ;;  %v292_v30 = vadd.f32 %v291_v28, %v1929_v3  ;;  %v388_v31 = vadd.f32 %v387_v29, %v1929_v3 }
  0xd6   :  { %v295_v32 = vpop.f32.mrf.mxu0  ;;  %v391_v33 = vpop.f32.mrf.mxu1 }
  0xd7   :  { %995 = vst [vmem:[%s2718_s3 + $0x8] sm:$0xff] %v292_v30  ;;  %1091 = vst [vmem:[%s2718_s3 + $0x308] sm:$0xff] %v388_v31  ;;  %v296_v34 = vadd.f32 %v295_v32, %v1926_v23  ;;  %v392_v35 = vadd.f32 %v391_v33, %v1926_v23 }
  0xd8   :  { %v297_v36 = vpop.f32.mrf.mxu0  ;;  %v393_v37 = vpop.f32.mrf.mxu1 }
  0xd9   :  { %1000 = vst [vmem:[%s2718_s3 + $0x30] sm:$0xff] %v296_v34  ;;  %1096 = vst [vmem:[%s2718_s3 + $0x330] sm:$0xff] %v392_v35  ;;  %v298_v38 = vadd.f32 %v297_v36, %v1929_v3  ;;  %v394_v39 = vadd.f32 %v393_v37, %v1929_v3 }
  0xda   :  { %v301_v40 = vpop.f32.mrf.mxu0  ;;  %v397_v41 = vpop.f32.mrf.mxu1 }
  0xdb   :  { %1001 = vst [vmem:[%s2718_s3 + $0x38] sm:$0xff] %v298_v38  ;;  %1097 = vst [vmem:[%s2718_s3 + $0x338] sm:$0xff] %v394_v39  ;;  %v302_v42 = vadd.f32 %v301_v40, %v1926_v23  ;;  %v398_v43 = vadd.f32 %v397_v41, %v1926_v23 }
  0xdc   :  { %v303_v44 = vpop.f32.mrf.mxu0  ;;  %v399_v45 = vpop.f32.mrf.mxu1 }
  0xdd   :  { %1006 = vst [vmem:[%s2718_s3 + $0x60] sm:$0xff] %v302_v42  ;;  %1102 = vst [vmem:[%s2718_s3 + $0x360] sm:$0xff] %v398_v43  ;;  %v304_v46 = vadd.f32 %v303_v44, %v1929_v3  ;;  %v400_v47 = vadd.f32 %v399_v45, %v1929_v3 }
  0xde   :  { %v307_v48 = vpop.f32.mrf.mxu0  ;;  %v403_v49 = vpop.f32.mrf.mxu1 }
  0xdf   :  { %1007 = vst [vmem:[%s2718_s3 + $0x68] sm:$0xff] %v304_v46  ;;  %1103 = vst [vmem:[%s2718_s3 + $0x368] sm:$0xff] %v400_v47  ;;  %v308_v50 = vadd.f32 %v307_v48, %v1926_v23  ;;  %v404_v51 = vadd.f32 %v403_v49, %v1926_v23 }
  0xe0   :  { %v309_v52 = vpop.f32.mrf.mxu0  ;;  %v405_v53 = vpop.f32.mrf.mxu1 }
  0xe1   :  { %1012 = vst [vmem:[%s2718_s3 + $0x90] sm:$0xff] %v308_v50  ;;  %1108 = vst [vmem:[%s2718_s3 + $0x390] sm:$0xff] %v404_v51  ;;  %v310_v54 = vadd.f32 %v309_v52, %v1929_v3  ;;  %v406_v55 = vadd.f32 %v405_v53, %v1929_v3 }
  0xe2   :  { %v313_v56 = vpop.f32.mrf.mxu0  ;;  %v409_v57 = vpop.f32.mrf.mxu1 }
  0xe3   :  { %1013 = vst [vmem:[%s2718_s3 + $0x98] sm:$0xff] %v310_v54  ;;  %1109 = vst [vmem:[%s2718_s3 + $0x398] sm:$0xff] %v406_v55  ;;  %v314_v58 = vadd.f32 %v313_v56, %v1926_v23  ;;  %v410_v59 = vadd.f32 %v409_v57, %v1926_v23 }
  0xe4   :  { %v315_v60 = vpop.f32.mrf.mxu0  ;;  %v411_v61 = vpop.f32.mrf.mxu1 }
  0xe5   :  { %1018 = vst [vmem:[%s2718_s3 + $0xc0] sm:$0xff] %v314_v58  ;;  %1114 = vst [vmem:[%s2718_s3 + $0x3c0] sm:$0xff] %v410_v59  ;;  %v316_v62 = vadd.f32 %v315_v60, %v1929_v3  ;;  %v412_v63 = vadd.f32 %v411_v61, %v1929_v3 }
  0xe6   :  { %v319_v0 = vpop.f32.mrf.mxu0  ;;  %v415_v1 = vpop.f32.mrf.mxu1 }
  0xe7   :  { %1019 = vst [vmem:[%s2718_s3 + $0xc8] sm:$0xff] %v316_v62  ;;  %1115 = vst [vmem:[%s2718_s3 + $0x3c8] sm:$0xff] %v412_v63  ;;  %v320_v2 = vadd.f32 %v319_v0, %v1926_v23  ;;  %v416_v4 = vadd.f32 %v415_v1, %v1926_v23 }
  0xe8   :  { %v321_v5 = vpop.f32.mrf.mxu0  ;;  %v417_v6 = vpop.f32.mrf.mxu1 }
  0xe9   :  { %1024 = vst [vmem:[%s2718_s3 + $0xf0] sm:$0xff] %v320_v2  ;;  %1120 = vst [vmem:[%s2718_s3 + $0x3f0] sm:$0xff] %v416_v4  ;;  %v322_v7 = vadd.f32 %v321_v5, %v1929_v3  ;;  %v418_v8 = vadd.f32 %v417_v6, %v1929_v3 }
  0xea   :  { %v325_v9 = vpop.f32.mrf.mxu0  ;;  %v421_v10 = vpop.f32.mrf.mxu1 }
  0xeb   :  { %1025 = vst [vmem:[%s2718_s3 + $0xf8] sm:$0xff] %v322_v7  ;;  %1121 = vst [vmem:[%s2718_s3 + $0x3f8] sm:$0xff] %v418_v8  ;;  %v326_v11 = vadd.f32 %v325_v9, %v1926_v23  ;;  %v422_v12 = vadd.f32 %v421_v10, %v1926_v23 }
  0xec   :  { %v327_v13 = vpop.f32.mrf.mxu0  ;;  %v423_v14 = vpop.f32.mrf.mxu1 }
  0xed   :  { %1030 = vst [vmem:[%s2718_s3 + $0x120] sm:$0xff] %v326_v11  ;;  %1126 = vst [vmem:[%s2718_s3 + $0x420] sm:$0xff] %v422_v12  ;;  %v328_v15 = vadd.f32 %v327_v13, %v1929_v3  ;;  %v424_v16 = vadd.f32 %v423_v14, %v1929_v3 }
  0xee   :  { %v331_v19 = vpop.f32.mrf.mxu0  ;;  %v427_v17 = vpop.f32.mrf.mxu1 }
  0xef   :  { %1031 = vst [vmem:[%s2718_s3 + $0x128] sm:$0xff] %v328_v15  ;;  %1127 = vst [vmem:[%s2718_s3 + $0x428] sm:$0xff] %v424_v16  ;;  %v332_v20 = vadd.f32 %v331_v19, %v1926_v23  ;;  %v428_v22 = vadd.f32 %v427_v17, %v1926_v23  ;;  %v106_v19 = vsub.s32 2, %v1906_v18  ;;  %v114_v17 = vsub.s32 4, %v1906_v18 }
  0xf0   :  { %v333_v24 = vpop.f32.mrf.mxu0  ;;  %v429_v25 = vpop.f32.mrf.mxu1 }
  0xf1   :  { %1036 = vst [vmem:[%s2718_s3 + $0x150] sm:$0xff] %v332_v20  ;;  %1132 = vst [vmem:[%s2718_s3 + $0x450] sm:$0xff] %v428_v22  ;;  %v334_v26 = vadd.f32 %v333_v24, %v1929_v3  ;;  %v430_v27 = vadd.f32 %v429_v25, %v1929_v3 }
  0xf2   :  { %v337_v28 = vpop.f32.mrf.mxu0  ;;  %v433_v29 = vpop.f32.mrf.mxu1 }
  0xf3   :  { %1037 = vst [vmem:[%s2718_s3 + $0x158] sm:$0xff] %v334_v26  ;;  %1133 = vst [vmem:[%s2718_s3 + $0x458] sm:$0xff] %v430_v27  ;;  %v338_v30 = vadd.f32 %v337_v28, %v1926_v23  ;;  %v434_v31 = vadd.f32 %v433_v29, %v1926_v23  ;;  %v110_v26 = vsub.s32 3, %v1906_v18  ;;  %v118_v27 = vsub.s32 5, %v1906_v18 }
  0xf4   :  { %v339_v32 = vpop.f32.mrf.mxu0  ;;  %v435_v33 = vpop.f32.mrf.mxu1 }
  0xf5   :  { %1042 = vst [vmem:[%s2718_s3 + $0x180] sm:$0xff] %v338_v30  ;;  %1138 = vst [vmem:[%s2718_s3 + $0x480] sm:$0xff] %v434_v31  ;;  %v340_v34 = vadd.f32 %v339_v32, %v1929_v3  ;;  %v436_v35 = vadd.f32 %v435_v33, %v1929_v3  ;;  %v2178_v32 = vrot.slane %v1918_v21, %v106_v19 }
  0xf6   :  { %v343_v36 = vpop.f32.mrf.mxu0  ;;  %v439_v37 = vpop.f32.mrf.mxu1  ;;  %v2181_v33 = vrot.slane %v1918_v21, %v114_v17 }
  0xf7   :  { %1043 = vst [vmem:[%s2718_s3 + $0x188] sm:$0xff] %v340_v34  ;;  %1139 = vst [vmem:[%s2718_s3 + $0x488] sm:$0xff] %v436_v35  ;;  %v344_v38 = vadd.f32 %v343_v36, %v1926_v23  ;;  %v440_v39 = vadd.f32 %v439_v37, %v1926_v23  ;;  %v2192_v36 = vrot.slane %v1918_v21, %v110_v26 }
  0xf8   :  { %v345_v40 = vpop.f32.mrf.mxu0  ;;  %v441_v41 = vpop.f32.mrf.mxu1  ;;  %v2195_v37 = vrot.slane %v1918_v21, %v118_v27 }
  0xf9   :  { %1048 = vst [vmem:[%s2718_s3 + $0x1b0] sm:$0xff] %v344_v38  ;;  %1144 = vst [vmem:[%s2718_s3 + $0x4b0] sm:$0xff] %v440_v39  ;;  %v346_v42 = vadd.f32 %v345_v40, %v1929_v3  ;;  %v442_v43 = vadd.f32 %v441_v41, %v1929_v3 }
  0xfa   :  { %v349_v44 = vpop.f32.mrf.mxu0  ;;  %v445_v45 = vpop.f32.mrf.mxu1 }
  0xfb   :  { %1049 = vst [vmem:[%s2718_s3 + $0x1b8] sm:$0xff] %v346_v42  ;;  %1145 = vst [vmem:[%s2718_s3 + $0x4b8] sm:$0xff] %v442_v43  ;;  %v350_v46 = vadd.f32 %v349_v44, %v1926_v23  ;;  %v446_v47 = vadd.f32 %v445_v45, %v1926_v23 }
  0xfc   :  { %v351_v48 = vpop.f32.mrf.mxu0  ;;  %v447_v49 = vpop.f32.mrf.mxu1 }
  0xfd   :  { %1054 = vst [vmem:[%s2718_s3 + $0x1e0] sm:$0xff] %v350_v46  ;;  %1150 = vst [vmem:[%s2718_s3 + $0x4e0] sm:$0xff] %v446_v47  ;;  %v352_v50 = vadd.f32 %v351_v48, %v1929_v3  ;;  %v448_v51 = vadd.f32 %v447_v49, %v1929_v3 }
  0xfe   :  { %v355_v52 = vpop.f32.mrf.mxu0  ;;  %v451_v53 = vpop.f32.mrf.mxu1 }
  0xff   :  { %1055 = vst [vmem:[%s2718_s3 + $0x1e8] sm:$0xff] %v352_v50  ;;  %1151 = vst [vmem:[%s2718_s3 + $0x4e8] sm:$0xff] %v448_v51  ;;  %v356_v54 = vadd.f32 %v355_v52, %v1926_v23  ;;  %v452_v55 = vadd.f32 %v451_v53, %v1926_v23 }
 0x100   :  { %v357_v56 = vpop.f32.mrf.mxu0  ;;  %v453_v57 = vpop.f32.mrf.mxu1 }
 0x101   :  { %1060 = vst [vmem:[%s2718_s3 + $0x210] sm:$0xff] %v356_v54  ;;  %1156 = vst [vmem:[%s2718_s3 + $0x510] sm:$0xff] %v452_v55  ;;  %v358_v58 = vadd.f32 %v357_v56, %v1929_v3  ;;  %v454_v59 = vadd.f32 %v453_v57, %v1929_v3 }
 0x102   :  { %v361_v60 = vpop.f32.mrf.mxu0  ;;  %v457_v61 = vpop.f32.mrf.mxu1 }
 0x103   :  { %1061 = vst [vmem:[%s2718_s3 + $0x218] sm:$0xff] %v358_v58  ;;  %1157 = vst [vmem:[%s2718_s3 + $0x518] sm:$0xff] %v454_v59  ;;  %v362_v62 = vadd.f32 %v361_v60, %v1926_v23  ;;  %v458_v63 = vadd.f32 %v457_v61, %v1926_v23 }
 0x104   :  { %v363_v0 = vpop.f32.mrf.mxu0  ;;  %v459_v1 = vpop.f32.mrf.mxu1 }
 0x105   :  { %1066 = vst [vmem:[%s2718_s3 + $0x240] sm:$0xff] %v362_v62  ;;  %1162 = vst [vmem:[%s2718_s3 + $0x540] sm:$0xff] %v458_v63  ;;  %v364_v2 = vadd.f32 %v363_v0, %v1929_v3  ;;  %v460_v4 = vadd.f32 %v459_v1, %v1929_v3 }
 0x106   :  { %v367_v5 = vpop.f32.mrf.mxu0  ;;  %v463_v6 = vpop.f32.mrf.mxu1 }
 0x107   :  { %1067 = vst [vmem:[%s2718_s3 + $0x248] sm:$0xff] %v364_v2  ;;  %1163 = vst [vmem:[%s2718_s3 + $0x548] sm:$0xff] %v460_v4  ;;  %v368_v7 = vadd.f32 %v367_v5, %v1926_v23  ;;  %v464_v8 = vadd.f32 %v463_v6, %v1926_v23 }
 0x108   :  { %v369_v9 = vpop.f32.mrf.mxu0  ;;  %v465_v10 = vpop.f32.mrf.mxu1 }
 0x109   :  { %1072 = vst [vmem:[%s2718_s3 + $0x270] sm:$0xff] %v368_v7  ;;  %1168 = vst [vmem:[%s2718_s3 + $0x570] sm:$0xff] %v464_v8  ;;  %v370_v11 = vadd.f32 %v369_v9, %v1929_v3  ;;  %v466_v12 = vadd.f32 %v465_v10, %v1929_v3 }
 0x10a   :  { %v373_v13 = vpop.f32.mrf.mxu0  ;;  %v469_v14 = vpop.f32.mrf.mxu1 }
 0x10b   :  { %1073 = vst [vmem:[%s2718_s3 + $0x278] sm:$0xff] %v370_v11  ;;  %1169 = vst [vmem:[%s2718_s3 + $0x578] sm:$0xff] %v466_v12  ;;  %v374_v15 = vadd.f32 %v373_v13, %v1926_v23  ;;  %v470_v16 = vadd.f32 %v469_v14, %v1926_v23 }
 0x10c   :  { %v375_v20 = vpop.f32.mrf.mxu0  ;;  %v471_v22 = vpop.f32.mrf.mxu1 }
 0x10d   :  { %1078 = vst [vmem:[%s2718_s3 + $0x2a0] sm:$0xff] %v374_v15  ;;  %1174 = vst [vmem:[%s2718_s3 + $0x5a0] sm:$0xff] %v470_v16  ;;  %v376_v24 = vadd.f32 %v375_v20, %v1929_v3  ;;  %v472_v25 = vadd.f32 %v471_v22, %v1929_v3 }
 0x10e   :  { %v379_v28 = vpop.f32.mrf.mxu0  ;;  %v475_v29 = vpop.f32.mrf.mxu1 }
 0x10f   :  { %1079 = vst [vmem:[%s2718_s3 + $0x2a8] sm:$0xff] %v376_v24  ;;  %1175 = vst [vmem:[%s2718_s3 + $0x5a8] sm:$0xff] %v472_v25  ;;  %v380_v30 = vadd.f32 %v379_v28, %v1926_v23  ;;  %v476_v31 = vadd.f32 %v475_v29, %v1926_v23 }
 0x110   :  { %v381_v18 = vpop.f32.mrf.mxu0  ;;  %v477_v34 = vpop.f32.mrf.mxu1 }
 0x111   :  { %1084 = vst [vmem:[%s2718_s3 + $0x2d0] sm:$0xff] %v380_v30  ;;  %1180 = vst [vmem:[%s2718_s3 + $0x5d0] sm:$0xff] %v476_v31  ;;  %v382_v35 = vadd.f32 %v381_v18, %v1929_v3  ;;  %v478_v23 = vadd.f32 %v477_v34, %v1929_v3 }
 0x112   :  { %v546_v38 = vpop.f32.mrf.mxu1  ;;  %v803_v39 = vpop.f32.mrf.mxu0 }
 0x113   :  { %1085 = vst [vmem:[%s2718_s3 + $0x2d8] sm:$0xff] %v382_v35  ;;  %1181 = vst [vmem:[%s2718_s3 + $0x5d8] sm:$0xff] %v478_v23  ;;  %v547_v40 = vadd.f32 %v546_v38, %v2178_v32  ;;  %v804_v3 = vadd.f32 %v803_v39, %v2181_v33 }
 0x114   :  { %v548_v41 = vpop.f32.mrf.mxu1  ;;  %v805_v42 = vpop.f32.mrf.mxu0 }
 0x115   :  { %996 = vst [vmem:[%s2718_s3 + $0x10] sm:$0xff] %v547_v40  ;;  %998 = vst [vmem:[%s2718_s3 + $0x20] sm:$0xff] %v804_v3  ;;  %v549_v21 = vadd.f32 %v548_v41, %v2192_v36  ;;  %v806_v43 = vadd.f32 %v805_v42, %v2195_v37 }
 0x116   :  { %v552_v44 = vpop.f32.mrf.mxu1  ;;  %v809_v45 = vpop.f32.mrf.mxu0 }
 0x117   :  { %997 = vst [vmem:[%s2718_s3 + $0x18] sm:$0xff] %v549_v21  ;;  %999 = vst [vmem:[%s2718_s3 + $0x28] sm:$0xff] %v806_v43  ;;  %v553_v46 = vadd.f32 %v552_v44, %v2178_v32  ;;  %v810_v47 = vadd.f32 %v809_v45, %v2181_v33 }
 0x118   :  { %v554_v48 = vpop.f32.mrf.mxu1  ;;  %v811_v49 = vpop.f32.mrf.mxu0 }
 0x119   :  { %1002 = vst [vmem:[%s2718_s3 + $0x40] sm:$0xff] %v553_v46  ;;  %1004 = vst [vmem:[%s2718_s3 + $0x50] sm:$0xff] %v810_v47  ;;  %v555_v50 = vadd.f32 %v554_v48, %v2192_v36  ;;  %v812_v51 = vadd.f32 %v811_v49, %v2195_v37 }
 0x11a   :  { %v558_v52 = vpop.f32.mrf.mxu1  ;;  %v815_v53 = vpop.f32.mrf.mxu0 }
 0x11b   :  { %1003 = vst [vmem:[%s2718_s3 + $0x48] sm:$0xff] %v555_v50  ;;  %1005 = vst [vmem:[%s2718_s3 + $0x58] sm:$0xff] %v812_v51  ;;  %v559_v54 = vadd.f32 %v558_v52, %v2178_v32  ;;  %v816_v55 = vadd.f32 %v815_v53, %v2181_v33 }
 0x11c   :  { %v560_v56 = vpop.f32.mrf.mxu1  ;;  %v817_v57 = vpop.f32.mrf.mxu0 }
 0x11d   :  { %1008 = vst [vmem:[%s2718_s3 + $0x70] sm:$0xff] %v559_v54  ;;  %1010 = vst [vmem:[%s2718_s3 + $0x80] sm:$0xff] %v816_v55  ;;  %v561_v58 = vadd.f32 %v560_v56, %v2192_v36  ;;  %v818_v59 = vadd.f32 %v817_v57, %v2195_v37 }
 0x11e   :  { %v564_v60 = vpop.f32.mrf.mxu1  ;;  %v821_v61 = vpop.f32.mrf.mxu0 }
 0x11f   :  { %1009 = vst [vmem:[%s2718_s3 + $0x78] sm:$0xff] %v561_v58  ;;  %1011 = vst [vmem:[%s2718_s3 + $0x88] sm:$0xff] %v818_v59  ;;  %v565_v62 = vadd.f32 %v564_v60, %v2178_v32  ;;  %v822_v63 = vadd.f32 %v821_v61, %v2181_v33 }
 0x120   :  { %v566_v0 = vpop.f32.mrf.mxu1  ;;  %v823_v1 = vpop.f32.mrf.mxu0 }
 0x121   :  { %1014 = vst [vmem:[%s2718_s3 + $0xa0] sm:$0xff] %v565_v62  ;;  %1016 = vst [vmem:[%s2718_s3 + $0xb0] sm:$0xff] %v822_v63  ;;  %v567_v2 = vadd.f32 %v566_v0, %v2192_v36  ;;  %v824_v4 = vadd.f32 %v823_v1, %v2195_v37 }
 0x122   :  { %v570_v5 = vpop.f32.mrf.mxu1  ;;  %v827_v6 = vpop.f32.mrf.mxu0 }
 0x123   :  { %1015 = vst [vmem:[%s2718_s3 + $0xa8] sm:$0xff] %v567_v2  ;;  %1017 = vst [vmem:[%s2718_s3 + $0xb8] sm:$0xff] %v824_v4  ;;  %v571_v7 = vadd.f32 %v570_v5, %v2178_v32  ;;  %v828_v8 = vadd.f32 %v827_v6, %v2181_v33 }
 0x124   :  { %v572_v9 = vpop.f32.mrf.mxu1  ;;  %v829_v10 = vpop.f32.mrf.mxu0 }
 0x125   :  { %1020 = vst [vmem:[%s2718_s3 + $0xd0] sm:$0xff] %v571_v7  ;;  %1022 = vst [vmem:[%s2718_s3 + $0xe0] sm:$0xff] %v828_v8  ;;  %v573_v11 = vadd.f32 %v572_v9, %v2192_v36  ;;  %v830_v12 = vadd.f32 %v829_v10, %v2195_v37 }
 0x126   :  { %v576_v13 = vpop.f32.mrf.mxu1  ;;  %v833_v14 = vpop.f32.mrf.mxu0 }
 0x127   :  { %1021 = vst [vmem:[%s2718_s3 + $0xd8] sm:$0xff] %v573_v11  ;;  %1023 = vst [vmem:[%s2718_s3 + $0xe8] sm:$0xff] %v830_v12  ;;  %v577_v15 = vadd.f32 %v576_v13, %v2178_v32  ;;  %v834_v16 = vadd.f32 %v833_v14, %v2181_v33 }
 0x128   :  { %v578_v19 = vpop.f32.mrf.mxu1  ;;  %v835_v17 = vpop.f32.mrf.mxu0 }
 0x129   :  { %1026 = vst [vmem:[%s2718_s3 + $0x100] sm:$0xff] %v577_v15  ;;  %1028 = vst [vmem:[%s2718_s3 + $0x110] sm:$0xff] %v834_v16  ;;  %v579_v20 = vadd.f32 %v578_v19, %v2192_v36  ;;  %v836_v22 = vadd.f32 %v835_v17, %v2195_v37 }
 0x12a   :  { %v582_v24 = vpop.f32.mrf.mxu1  ;;  %v839_v25 = vpop.f32.mrf.mxu0 }
 0x12b   :  { %1027 = vst [vmem:[%s2718_s3 + $0x108] sm:$0xff] %v579_v20  ;;  %1029 = vst [vmem:[%s2718_s3 + $0x118] sm:$0xff] %v836_v22  ;;  %v583_v26 = vadd.f32 %v582_v24, %v2178_v32  ;;  %v840_v27 = vadd.f32 %v839_v25, %v2181_v33 }
 0x12c   :  { %v584_v28 = vpop.f32.mrf.mxu1  ;;  %v841_v29 = vpop.f32.mrf.mxu0 }
 0x12d   :  { %1032 = vst [vmem:[%s2718_s3 + $0x130] sm:$0xff] %v583_v26  ;;  %1034 = vst [vmem:[%s2718_s3 + $0x140] sm:$0xff] %v840_v27  ;;  %v585_v30 = vadd.f32 %v584_v28, %v2192_v36  ;;  %v842_v31 = vadd.f32 %v841_v29, %v2195_v37 }
 0x12e   :  { %v588_v18 = vpop.f32.mrf.mxu1  ;;  %v845_v34 = vpop.f32.mrf.mxu0 }
 0x12f   :  { %1033 = vst [vmem:[%s2718_s3 + $0x138] sm:$0xff] %v585_v30  ;;  %1035 = vst [vmem:[%s2718_s3 + $0x148] sm:$0xff] %v842_v31  ;;  %v589_v35 = vadd.f32 %v588_v18, %v2178_v32  ;;  %v846_v23 = vadd.f32 %v845_v34, %v2181_v33 }
 0x130   :  { %v590_v38 = vpop.f32.mrf.mxu1  ;;  %v847_v39 = vpop.f32.mrf.mxu0 }
 0x131   :  { %1038 = vst [vmem:[%s2718_s3 + $0x160] sm:$0xff] %v589_v35  ;;  %1040 = vst [vmem:[%s2718_s3 + $0x170] sm:$0xff] %v846_v23  ;;  %v591_v40 = vadd.f32 %v590_v38, %v2192_v36  ;;  %v848_v3 = vadd.f32 %v847_v39, %v2195_v37 }
 0x132   :  { %v594_v41 = vpop.f32.mrf.mxu1  ;;  %v851_v42 = vpop.f32.mrf.mxu0 }
 0x133   :  { %1039 = vst [vmem:[%s2718_s3 + $0x168] sm:$0xff] %v591_v40  ;;  %1041 = vst [vmem:[%s2718_s3 + $0x178] sm:$0xff] %v848_v3  ;;  %v595_v21 = vadd.f32 %v594_v41, %v2178_v32  ;;  %v852_v43 = vadd.f32 %v851_v42, %v2181_v33 }
 0x134   :  { %v596_v44 = vpop.f32.mrf.mxu1  ;;  %v853_v45 = vpop.f32.mrf.mxu0 }
 0x135   :  { %1044 = vst [vmem:[%s2718_s3 + $0x190] sm:$0xff] %v595_v21  ;;  %1046 = vst [vmem:[%s2718_s3 + $0x1a0] sm:$0xff] %v852_v43  ;;  %v597_v46 = vadd.f32 %v596_v44, %v2192_v36  ;;  %v854_v47 = vadd.f32 %v853_v45, %v2195_v37 }
 0x136   :  { %v600_v48 = vpop.f32.mrf.mxu1  ;;  %v857_v49 = vpop.f32.mrf.mxu0 }
 0x137   :  { %1045 = vst [vmem:[%s2718_s3 + $0x198] sm:$0xff] %v597_v46  ;;  %1047 = vst [vmem:[%s2718_s3 + $0x1a8] sm:$0xff] %v854_v47  ;;  %v601_v50 = vadd.f32 %v600_v48, %v2178_v32  ;;  %v858_v51 = vadd.f32 %v857_v49, %v2181_v33 }
 0x138   :  { %v602_v52 = vpop.f32.mrf.mxu1  ;;  %v859_v53 = vpop.f32.mrf.mxu0 }
 0x139   :  { %1050 = vst [vmem:[%s2718_s3 + $0x1c0] sm:$0xff] %v601_v50  ;;  %1052 = vst [vmem:[%s2718_s3 + $0x1d0] sm:$0xff] %v858_v51  ;;  %v603_v54 = vadd.f32 %v602_v52, %v2192_v36  ;;  %v860_v55 = vadd.f32 %v859_v53, %v2195_v37 }
 0x13a   :  { %v606_v56 = vpop.f32.mrf.mxu1  ;;  %v863_v57 = vpop.f32.mrf.mxu0 }
 0x13b   :  { %1051 = vst [vmem:[%s2718_s3 + $0x1c8] sm:$0xff] %v603_v54  ;;  %1053 = vst [vmem:[%s2718_s3 + $0x1d8] sm:$0xff] %v860_v55  ;;  %v607_v58 = vadd.f32 %v606_v56, %v2178_v32  ;;  %v864_v59 = vadd.f32 %v863_v57, %v2181_v33 }
 0x13c   :  { %v608_v60 = vpop.f32.mrf.mxu1  ;;  %v865_v61 = vpop.f32.mrf.mxu0 }
 0x13d   :  { %1056 = vst [vmem:[%s2718_s3 + $0x1f0] sm:$0xff] %v607_v58  ;;  %1058 = vst [vmem:[%s2718_s3 + $0x200] sm:$0xff] %v864_v59  ;;  %v609_v62 = vadd.f32 %v608_v60, %v2192_v36  ;;  %v866_v63 = vadd.f32 %v865_v61, %v2195_v37 }
 0x13e   :  { %v612_v0 = vpop.f32.mrf.mxu1  ;;  %v869_v1 = vpop.f32.mrf.mxu0 }
 0x13f   :  { %1057 = vst [vmem:[%s2718_s3 + $0x1f8] sm:$0xff] %v609_v62  ;;  %1059 = vst [vmem:[%s2718_s3 + $0x208] sm:$0xff] %v866_v63  ;;  %v613_v2 = vadd.f32 %v612_v0, %v2178_v32  ;;  %v870_v4 = vadd.f32 %v869_v1, %v2181_v33 }
 0x140   :  { %v614_v5 = vpop.f32.mrf.mxu1  ;;  %v871_v6 = vpop.f32.mrf.mxu0 }
 0x141   :  { %1062 = vst [vmem:[%s2718_s3 + $0x220] sm:$0xff] %v613_v2  ;;  %1064 = vst [vmem:[%s2718_s3 + $0x230] sm:$0xff] %v870_v4  ;;  %v615_v7 = vadd.f32 %v614_v5, %v2192_v36  ;;  %v872_v8 = vadd.f32 %v871_v6, %v2195_v37 }
 0x142   :  { %v618_v9 = vpop.f32.mrf.mxu1  ;;  %v875_v10 = vpop.f32.mrf.mxu0 }
 0x143   :  { %1063 = vst [vmem:[%s2718_s3 + $0x228] sm:$0xff] %v615_v7  ;;  %1065 = vst [vmem:[%s2718_s3 + $0x238] sm:$0xff] %v872_v8  ;;  %v619_v11 = vadd.f32 %v618_v9, %v2178_v32  ;;  %v876_v12 = vadd.f32 %v875_v10, %v2181_v33 }
 0x144   :  { %v620_v13 = vpop.f32.mrf.mxu1  ;;  %v877_v14 = vpop.f32.mrf.mxu0 }
 0x145   :  { %1068 = vst [vmem:[%s2718_s3 + $0x250] sm:$0xff] %v619_v11  ;;  %1070 = vst [vmem:[%s2718_s3 + $0x260] sm:$0xff] %v876_v12  ;;  %v621_v15 = vadd.f32 %v620_v13, %v2192_v36  ;;  %v878_v16 = vadd.f32 %v877_v14, %v2195_v37 }
 0x146   :  { %v624_v19 = vpop.f32.mrf.mxu1  ;;  %v881_v17 = vpop.f32.mrf.mxu0 }
 0x147   :  { %1069 = vst [vmem:[%s2718_s3 + $0x258] sm:$0xff] %v621_v15  ;;  %1071 = vst [vmem:[%s2718_s3 + $0x268] sm:$0xff] %v878_v16  ;;  %v625_v20 = vadd.f32 %v624_v19, %v2178_v32  ;;  %v882_v22 = vadd.f32 %v881_v17, %v2181_v33 }
 0x148   :  { %v626_v24 = vpop.f32.mrf.mxu1  ;;  %v883_v25 = vpop.f32.mrf.mxu0 }
 0x149   :  { %1074 = vst [vmem:[%s2718_s3 + $0x280] sm:$0xff] %v625_v20  ;;  %1076 = vst [vmem:[%s2718_s3 + $0x290] sm:$0xff] %v882_v22  ;;  %v627_v26 = vadd.f32 %v626_v24, %v2192_v36  ;;  %v884_v27 = vadd.f32 %v883_v25, %v2195_v37 }
 0x14a   :  { %v630_v28 = vpop.f32.mrf.mxu1  ;;  %v887_v29 = vpop.f32.mrf.mxu0 }
 0x14b   :  { %1075 = vst [vmem:[%s2718_s3 + $0x288] sm:$0xff] %v627_v26  ;;  %1077 = vst [vmem:[%s2718_s3 + $0x298] sm:$0xff] %v884_v27  ;;  %v631_v30 = vadd.f32 %v630_v28, %v2178_v32  ;;  %v888_v31 = vadd.f32 %v887_v29, %v2181_v33 }
 0x14c   :  { %v632_v18 = vpop.f32.mrf.mxu1  ;;  %v889_v34 = vpop.f32.mrf.mxu0 }
 0x14d   :  { %1080 = vst [vmem:[%s2718_s3 + $0x2b0] sm:$0xff] %v631_v30  ;;  %1082 = vst [vmem:[%s2718_s3 + $0x2c0] sm:$0xff] %v888_v31  ;;  %v633_v35 = vadd.f32 %v632_v18, %v2192_v36  ;;  %v890_v23 = vadd.f32 %v889_v34, %v2195_v37 }
 0x14e   :  { %v636_v38 = vpop.f32.mrf.mxu1  ;;  %v893_v39 = vpop.f32.mrf.mxu0 }
 0x14f   :  { %1081 = vst [vmem:[%s2718_s3 + $0x2b8] sm:$0xff] %v633_v35  ;;  %1083 = vst [vmem:[%s2718_s3 + $0x2c8] sm:$0xff] %v890_v23  ;;  %v637_v40 = vadd.f32 %v636_v38, %v2178_v32  ;;  %v894_v3 = vadd.f32 %v893_v39, %v2181_v33 }
 0x150   :  { %v638_v41 = vpop.f32.mrf.mxu1  ;;  %v895_v42 = vpop.f32.mrf.mxu0 }
 0x151   :  { %1086 = vst [vmem:[%s2718_s3 + $0x2e0] sm:$0xff] %v637_v40  ;;  %1088 = vst [vmem:[%s2718_s3 + $0x2f0] sm:$0xff] %v894_v3  ;;  %v639_v21 = vadd.f32 %v638_v41, %v2192_v36  ;;  %v896_v43 = vadd.f32 %v895_v42, %v2195_v37 }
 0x152   :  { %v642_v44 = vpop.f32.mrf.mxu1  ;;  %v899_v45 = vpop.f32.mrf.mxu0 }
 0x153   :  { %1087 = vst [vmem:[%s2718_s3 + $0x2e8] sm:$0xff] %v639_v21  ;;  %1089 = vst [vmem:[%s2718_s3 + $0x2f8] sm:$0xff] %v896_v43  ;;  %v643_v46 = vadd.f32 %v642_v44, %v2178_v32  ;;  %v900_v47 = vadd.f32 %v899_v45, %v2181_v33 }
 0x154   :  { %v644_v48 = vpop.f32.mrf.mxu1  ;;  %v901_v49 = vpop.f32.mrf.mxu0 }
 0x155   :  { %1092 = vst [vmem:[%s2718_s3 + $0x310] sm:$0xff] %v643_v46  ;;  %1094 = vst [vmem:[%s2718_s3 + $0x320] sm:$0xff] %v900_v47  ;;  %v645_v50 = vadd.f32 %v644_v48, %v2192_v36  ;;  %v902_v51 = vadd.f32 %v901_v49, %v2195_v37 }
 0x156   :  { %v648_v52 = vpop.f32.mrf.mxu1  ;;  %v905_v53 = vpop.f32.mrf.mxu0 }
 0x157   :  { %1093 = vst [vmem:[%s2718_s3 + $0x318] sm:$0xff] %v645_v50  ;;  %1095 = vst [vmem:[%s2718_s3 + $0x328] sm:$0xff] %v902_v51  ;;  %v649_v54 = vadd.f32 %v648_v52, %v2178_v32  ;;  %v906_v55 = vadd.f32 %v905_v53, %v2181_v33 }
 0x158   :  { %v650_v56 = vpop.f32.mrf.mxu1  ;;  %v907_v57 = vpop.f32.mrf.mxu0 }
 0x159   :  { %1098 = vst [vmem:[%s2718_s3 + $0x340] sm:$0xff] %v649_v54  ;;  %1100 = vst [vmem:[%s2718_s3 + $0x350] sm:$0xff] %v906_v55  ;;  %v651_v58 = vadd.f32 %v650_v56, %v2192_v36  ;;  %v908_v59 = vadd.f32 %v907_v57, %v2195_v37 }
 0x15a   :  { %v654_v60 = vpop.f32.mrf.mxu1  ;;  %v911_v61 = vpop.f32.mrf.mxu0 }
 0x15b   :  { %1099 = vst [vmem:[%s2718_s3 + $0x348] sm:$0xff] %v651_v58  ;;  %1101 = vst [vmem:[%s2718_s3 + $0x358] sm:$0xff] %v908_v59  ;;  %v655_v62 = vadd.f32 %v654_v60, %v2178_v32  ;;  %v912_v63 = vadd.f32 %v911_v61, %v2181_v33 }
 0x15c   :  { %v656_v0 = vpop.f32.mrf.mxu1  ;;  %v913_v1 = vpop.f32.mrf.mxu0 }
 0x15d   :  { %1104 = vst [vmem:[%s2718_s3 + $0x370] sm:$0xff] %v655_v62  ;;  %1106 = vst [vmem:[%s2718_s3 + $0x380] sm:$0xff] %v912_v63  ;;  %v657_v2 = vadd.f32 %v656_v0, %v2192_v36  ;;  %v914_v4 = vadd.f32 %v913_v1, %v2195_v37 }
 0x15e   :  { %v660_v5 = vpop.f32.mrf.mxu1  ;;  %v917_v6 = vpop.f32.mrf.mxu0 }
 0x15f   :  { %1105 = vst [vmem:[%s2718_s3 + $0x378] sm:$0xff] %v657_v2  ;;  %1107 = vst [vmem:[%s2718_s3 + $0x388] sm:$0xff] %v914_v4  ;;  %v661_v7 = vadd.f32 %v660_v5, %v2178_v32  ;;  %v918_v8 = vadd.f32 %v917_v6, %v2181_v33 }
 0x160   :  { %v662_v9 = vpop.f32.mrf.mxu1  ;;  %v919_v10 = vpop.f32.mrf.mxu0 }
 0x161   :  { %1110 = vst [vmem:[%s2718_s3 + $0x3a0] sm:$0xff] %v661_v7  ;;  %1112 = vst [vmem:[%s2718_s3 + $0x3b0] sm:$0xff] %v918_v8  ;;  %v663_v11 = vadd.f32 %v662_v9, %v2192_v36  ;;  %v920_v12 = vadd.f32 %v919_v10, %v2195_v37 }
 0x162   :  { %v666_v13 = vpop.f32.mrf.mxu1  ;;  %v923_v14 = vpop.f32.mrf.mxu0 }
 0x163   :  { %1111 = vst [vmem:[%s2718_s3 + $0x3a8] sm:$0xff] %v663_v11  ;;  %1113 = vst [vmem:[%s2718_s3 + $0x3b8] sm:$0xff] %v920_v12  ;;  %v667_v15 = vadd.f32 %v666_v13, %v2178_v32  ;;  %v924_v16 = vadd.f32 %v923_v14, %v2181_v33 }
 0x164   :  { %v668_v19 = vpop.f32.mrf.mxu1  ;;  %v925_v17 = vpop.f32.mrf.mxu0 }
 0x165   :  { %1116 = vst [vmem:[%s2718_s3 + $0x3d0] sm:$0xff] %v667_v15  ;;  %1118 = vst [vmem:[%s2718_s3 + $0x3e0] sm:$0xff] %v924_v16  ;;  %v669_v20 = vadd.f32 %v668_v19, %v2192_v36  ;;  %v926_v22 = vadd.f32 %v925_v17, %v2195_v37 }
 0x166   :  { %v672_v24 = vpop.f32.mrf.mxu1  ;;  %v929_v25 = vpop.f32.mrf.mxu0 }
 0x167   :  { %1117 = vst [vmem:[%s2718_s3 + $0x3d8] sm:$0xff] %v669_v20  ;;  %1119 = vst [vmem:[%s2718_s3 + $0x3e8] sm:$0xff] %v926_v22  ;;  %v673_v26 = vadd.f32 %v672_v24, %v2178_v32  ;;  %v930_v27 = vadd.f32 %v929_v25, %v2181_v33 }
 0x168   :  { %v674_v28 = vpop.f32.mrf.mxu1  ;;  %v931_v29 = vpop.f32.mrf.mxu0 }
 0x169   :  { %1122 = vst [vmem:[%s2718_s3 + $0x400] sm:$0xff] %v673_v26  ;;  %1124 = vst [vmem:[%s2718_s3 + $0x410] sm:$0xff] %v930_v27  ;;  %v675_v30 = vadd.f32 %v674_v28, %v2192_v36  ;;  %v932_v31 = vadd.f32 %v931_v29, %v2195_v37 }
 0x16a   :  { %v678_v18 = vpop.f32.mrf.mxu1  ;;  %v935_v34 = vpop.f32.mrf.mxu0 }
 0x16b   :  { %1123 = vst [vmem:[%s2718_s3 + $0x408] sm:$0xff] %v675_v30  ;;  %1125 = vst [vmem:[%s2718_s3 + $0x418] sm:$0xff] %v932_v31  ;;  %v679_v35 = vadd.f32 %v678_v18, %v2178_v32  ;;  %v936_v23 = vadd.f32 %v935_v34, %v2181_v33 }
 0x16c   :  { %v680_v38 = vpop.f32.mrf.mxu1  ;;  %v937_v39 = vpop.f32.mrf.mxu0 }
 0x16d   :  { %1128 = vst [vmem:[%s2718_s3 + $0x430] sm:$0xff] %v679_v35  ;;  %1130 = vst [vmem:[%s2718_s3 + $0x440] sm:$0xff] %v936_v23  ;;  %v681_v40 = vadd.f32 %v680_v38, %v2192_v36  ;;  %v938_v3 = vadd.f32 %v937_v39, %v2195_v37 }
 0x16e   :  { %v684_v41 = vpop.f32.mrf.mxu1  ;;  %v941_v42 = vpop.f32.mrf.mxu0 }
 0x16f   :  { %1129 = vst [vmem:[%s2718_s3 + $0x438] sm:$0xff] %v681_v40  ;;  %1131 = vst [vmem:[%s2718_s3 + $0x448] sm:$0xff] %v938_v3  ;;  %v685_v21 = vadd.f32 %v684_v41, %v2178_v32  ;;  %v942_v43 = vadd.f32 %v941_v42, %v2181_v33 }
 0x170   :  { %v686_v44 = vpop.f32.mrf.mxu1  ;;  %v943_v45 = vpop.f32.mrf.mxu0 }
 0x171   :  { %1134 = vst [vmem:[%s2718_s3 + $0x460] sm:$0xff] %v685_v21  ;;  %1136 = vst [vmem:[%s2718_s3 + $0x470] sm:$0xff] %v942_v43  ;;  %v687_v46 = vadd.f32 %v686_v44, %v2192_v36  ;;  %v944_v47 = vadd.f32 %v943_v45, %v2195_v37 }
 0x172   :  { %v690_v48 = vpop.f32.mrf.mxu1  ;;  %v947_v49 = vpop.f32.mrf.mxu0 }
 0x173   :  { %1135 = vst [vmem:[%s2718_s3 + $0x468] sm:$0xff] %v687_v46  ;;  %1137 = vst [vmem:[%s2718_s3 + $0x478] sm:$0xff] %v944_v47  ;;  %v691_v50 = vadd.f32 %v690_v48, %v2178_v32  ;;  %v948_v51 = vadd.f32 %v947_v49, %v2181_v33 }
 0x174   :  { %v692_v52 = vpop.f32.mrf.mxu1  ;;  %v949_v53 = vpop.f32.mrf.mxu0 }
 0x175   :  { %1140 = vst [vmem:[%s2718_s3 + $0x490] sm:$0xff] %v691_v50  ;;  %1142 = vst [vmem:[%s2718_s3 + $0x4a0] sm:$0xff] %v948_v51  ;;  %v693_v54 = vadd.f32 %v692_v52, %v2192_v36  ;;  %v950_v55 = vadd.f32 %v949_v53, %v2195_v37 }
 0x176   :  { %v696_v56 = vpop.f32.mrf.mxu1  ;;  %v953_v57 = vpop.f32.mrf.mxu0 }
 0x177   :  { %1141 = vst [vmem:[%s2718_s3 + $0x498] sm:$0xff] %v693_v54  ;;  %1143 = vst [vmem:[%s2718_s3 + $0x4a8] sm:$0xff] %v950_v55  ;;  %v697_v58 = vadd.f32 %v696_v56, %v2178_v32  ;;  %v954_v59 = vadd.f32 %v953_v57, %v2181_v33 }
 0x178   :  { %v698_v60 = vpop.f32.mrf.mxu1  ;;  %v955_v61 = vpop.f32.mrf.mxu0 }
 0x179   :  { %1146 = vst [vmem:[%s2718_s3 + $0x4c0] sm:$0xff] %v697_v58  ;;  %1148 = vst [vmem:[%s2718_s3 + $0x4d0] sm:$0xff] %v954_v59  ;;  %v699_v62 = vadd.f32 %v698_v60, %v2192_v36  ;;  %v956_v63 = vadd.f32 %v955_v61, %v2195_v37 }
 0x17a   :  { %v702_v0 = vpop.f32.mrf.mxu1  ;;  %v959_v1 = vpop.f32.mrf.mxu0 }
 0x17b   :  { %1147 = vst [vmem:[%s2718_s3 + $0x4c8] sm:$0xff] %v699_v62  ;;  %1149 = vst [vmem:[%s2718_s3 + $0x4d8] sm:$0xff] %v956_v63  ;;  %v703_v2 = vadd.f32 %v702_v0, %v2178_v32  ;;  %v960_v4 = vadd.f32 %v959_v1, %v2181_v33 }
 0x17c   :  { %v704_v5 = vpop.f32.mrf.mxu1  ;;  %v961_v6 = vpop.f32.mrf.mxu0 }
 0x17d   :  { %1152 = vst [vmem:[%s2718_s3 + $0x4f0] sm:$0xff] %v703_v2  ;;  %1154 = vst [vmem:[%s2718_s3 + $0x500] sm:$0xff] %v960_v4  ;;  %v705_v7 = vadd.f32 %v704_v5, %v2192_v36  ;;  %v962_v8 = vadd.f32 %v961_v6, %v2195_v37 }
 0x17e   :  { %v708_v9 = vpop.f32.mrf.mxu1  ;;  %v965_v10 = vpop.f32.mrf.mxu0 }
 0x17f   :  { %1153 = vst [vmem:[%s2718_s3 + $0x4f8] sm:$0xff] %v705_v7  ;;  %1155 = vst [vmem:[%s2718_s3 + $0x508] sm:$0xff] %v962_v8  ;;  %v709_v11 = vadd.f32 %v708_v9, %v2178_v32  ;;  %v966_v12 = vadd.f32 %v965_v10, %v2181_v33 }
 0x180   :  { %v710_v13 = vpop.f32.mrf.mxu1  ;;  %v967_v14 = vpop.f32.mrf.mxu0 }
 0x181   :  { %1158 = vst [vmem:[%s2718_s3 + $0x520] sm:$0xff] %v709_v11  ;;  %1160 = vst [vmem:[%s2718_s3 + $0x530] sm:$0xff] %v966_v12  ;;  %v711_v15 = vadd.f32 %v710_v13, %v2192_v36  ;;  %v968_v16 = vadd.f32 %v967_v14, %v2195_v37 }
 0x182   :  { %v714_v19 = vpop.f32.mrf.mxu1  ;;  %v971_v17 = vpop.f32.mrf.mxu0 }
 0x183   :  { %1159 = vst [vmem:[%s2718_s3 + $0x528] sm:$0xff] %v711_v15  ;;  %1161 = vst [vmem:[%s2718_s3 + $0x538] sm:$0xff] %v968_v16  ;;  %v715_v20 = vadd.f32 %v714_v19, %v2178_v32  ;;  %v972_v22 = vadd.f32 %v971_v17, %v2181_v33 }
 0x184   :  { %v716_v24 = vpop.f32.mrf.mxu1  ;;  %v973_v25 = vpop.f32.mrf.mxu0 }
 0x185   :  { %1164 = vst [vmem:[%s2718_s3 + $0x550] sm:$0xff] %v715_v20  ;;  %1166 = vst [vmem:[%s2718_s3 + $0x560] sm:$0xff] %v972_v22  ;;  %v717_v26 = vadd.f32 %v716_v24, %v2192_v36  ;;  %v974_v27 = vadd.f32 %v973_v25, %v2195_v37 }
 0x186   :  { %v720_v28 = vpop.f32.mrf.mxu1  ;;  %v977_v29 = vpop.f32.mrf.mxu0 }
 0x187   :  { %1165 = vst [vmem:[%s2718_s3 + $0x558] sm:$0xff] %v717_v26  ;;  %1167 = vst [vmem:[%s2718_s3 + $0x568] sm:$0xff] %v974_v27  ;;  %v721_v30 = vadd.f32 %v720_v28, %v2178_v32  ;;  %v978_v31 = vadd.f32 %v977_v29, %v2181_v33 }
 0x188   :  { %v722_v18 = vpop.f32.mrf.mxu1  ;;  %v979_v34 = vpop.f32.mrf.mxu0 }
 0x189   :  { %1170 = vst [vmem:[%s2718_s3 + $0x580] sm:$0xff] %v721_v30  ;;  %1172 = vst [vmem:[%s2718_s3 + $0x590] sm:$0xff] %v978_v31  ;;  %v723_v35 = vadd.f32 %v722_v18, %v2192_v36  ;;  %v980_v23 = vadd.f32 %v979_v34, %v2195_v37 }
 0x18a   :  { %v726_v38 = vpop.f32.mrf.mxu1  ;;  %v983_v39 = vpop.f32.mrf.mxu0 }
 0x18b   :  { %1171 = vst [vmem:[%s2718_s3 + $0x588] sm:$0xff] %v723_v35  ;;  %1173 = vst [vmem:[%s2718_s3 + $0x598] sm:$0xff] %v980_v23  ;;  %v727_v40 = vadd.f32 %v726_v38, %v2178_v32  ;;  %v984_v3 = vadd.f32 %v983_v39, %v2181_v33 }
 0x18c   :  { %v728_v41 = vpop.f32.mrf.mxu1  ;;  %v985_v42 = vpop.f32.mrf.mxu0 }
 0x18d   :  { %1176 = vst [vmem:[%s2718_s3 + $0x5b0] sm:$0xff] %v727_v40  ;;  %1178 = vst [vmem:[%s2718_s3 + $0x5c0] sm:$0xff] %v984_v3  ;;  %v729_v21 = vadd.f32 %v728_v41, %v2192_v36  ;;  %v986_v43 = vadd.f32 %v985_v42, %v2195_v37 }
 0x18e   :  { %v732_v44 = vpop.f32.mrf.mxu1  ;;  %v989_v45 = vpop.f32.mrf.mxu0 }
 0x18f   :  { %1177 = vst [vmem:[%s2718_s3 + $0x5b8] sm:$0xff] %v729_v21  ;;  %1179 = vst [vmem:[%s2718_s3 + $0x5c8] sm:$0xff] %v986_v43  ;;  %v733_v46 = vadd.f32 %v732_v44, %v2178_v32  ;;  %v990_v47 = vadd.f32 %v989_v45, %v2181_v33 }
 0x190   :  { %v734_v48 = vpop.f32.mrf.mxu1  ;;  %v991_v49 = vpop.f32.mrf.mxu0 }
 0x191   :  { %1182 = vst [vmem:[%s2718_s3 + $0x5e0] sm:$0xff] %v733_v46  ;;  %1184 = vst [vmem:[%s2718_s3 + $0x5f0] sm:$0xff] %v990_v47  ;;  %v735_v50 = vadd.f32 %v734_v48, %v2192_v36  ;;  %v992_v51 = vadd.f32 %v991_v49, %v2195_v37 }
 0x193   :  { %1183 = vst [vmem:[%s2718_s3 + $0x5e8] sm:$0xff] %v735_v50  ;;  %1185 = vst [vmem:[%s2718_s3 + $0x5f8] sm:$0xff] %v992_v51 }

// kernel: bi_gru_forward.3
= control target key start
LH: loop header
LB: loop body
LE: loop exit
PB: predicated region body
PF: predicated region fallthrough
CT: control target
= control target key end

     0   :  { %s7186_s0 = inlined_call_operand.vmem [shape: f32[32,8,768], index: 0, kind: input, shape index: {}]   ;;  %s7187_s1 = inlined_call_operand.vmem [shape: f32[2,128,384], index: 1, kind: input, shape index: {}]   ;;  %s7188_s2 = inlined_call_operand.vmem [shape: f32[2,1,384], index: 2, kind: input, shape index: {}]   ;;  %s7189_s3 = inlined_call_operand.hbm [shape: f32[32,8,256], index: 3, kind: output, shape index: {0}]   ;;  %s7190_s4 = inlined_call_operand.hbm [shape: f32[2,8,128], index: 4, kind: output, shape index: {1}]  }
   0x1   :  { %7234 = sst [smem:[#allocation23_spill]] %s7186_s0 }
   0x2   :  { %7235 = sst [smem:[#allocation24_spill]] %s7190_s4 }
   0x3   :  { %10 = vsyncpa [#allocation5], 0 }
   0x4   :  { %12 = vsyncpa [#allocation5 + $0x1], 0 }
   0x5   :  { %13 = vsyncpa [#allocation7], 0 }
   0x6   :  { %15 = vsyncpa [#allocation7 + $0x1], 0  ;;  %s5092_s15 = smov 0   ;;  %s5094_s16 = smov 0  }
   0x7   :  { %s5096_s17 = smov 0   ;;  %s5098_s18 = smov 0  }
   0x8   :  { %s5100_s19 = smov 0   ;;  %s5102_s20 = smov 0  }
   0x9   :  { %s5104_s21 = smov 0   ;;  %s5106_s22 = smov 0  }
   0xa   :  { %s5108_s23 = smov 0   ;;  %s5110_s24 = smov 0  }
   0xb   :  { %s5112_s25 = smov 0  }
   0xc LB: > { %7236 = sst [smem:[#allocation10_spill]] %s5033_s19  ;;  %s3528_s26 = sadd.s32 4294967295, %s5057_s25   ;;  %s5057_s25 = sphi %s5112_s25, %s21_s25   ;;  %s5053_s24 = sphi %s5110_s24, %s7319_s24   ;;  %s5049_s23 = sphi %s5108_s23, %s7323_s23   ;;  %s5045_s22 = sphi %s5106_s22, %s7317_s22   ;;  %s5041_s21 = sphi %s5104_s21, %s7316_s21   ;;  %s5037_s20 = sphi %s5102_s20, %s7315_s20   ;;  %s5033_s19 = sphi %s5100_s19, %s7314_s19   ;;  %s5029_s18 = sphi %s5098_s18, %s7313_s18   ;;  %s5025_s17 = sphi %s5096_s17, %s7322_s17   ;;  %s5021_s16 = sphi %s5094_s16, %s7321_s16   ;;  %s5017_s15 = sphi %s5092_s15, %s7320_s15  }
   0xd   : > { %7237 = sst [smem:[#allocation11_spill]] %s5037_s20  ;;  %s3529_s27 = sadd.s32 4294967294, %s5057_s25  }
   0xe   : > { %7238 = sst [smem:[#allocation12_spill]] %s5049_s23  ;;  %s30_s28 = sadd.s32 1, %s5049_s23 }
   0xf   : > { %7239 = sst [smem:[#allocation13_spill]] %s5053_s24  ;;  %s33_s29 = sadd.s32 1, %s5053_s24 }
  0x10   : > { %p31_p0 = scmp.ge.s32.totalorder %s30_s28, 2  ;;  %s3530_s30 = sshll.u32 %s5049_s23, 1 }
  0x11   : > { %s38_s5 = ssub.s32 1, %s3530_s30  ;;  %s50_s6 = sadd.s32 1, %s5037_s20 }
  0x12   : > { %s7325_s28 = smov (%p31_p0, %s30_s28), 0  ;;  %s7327_s29 = smov (!%p31_p0, %s33_s29), %s5053_s24 }
  0x13   : > { %7240 = sst [smem:[#allocation14_spill]] %s7325_s28  ;;  %s39_s7 = smul.u32 %s5053_s24, %s38_s5 }
  0x14   : > { %s3531_s8 = sshll.u32 %s7325_s28, 1  ;;  %p35_p1 = scmp.ge.s32.totalorder %s7327_s29, 2 }
  0x15   : > { %s42_s9 = ssub.s32 1, %s3531_s8  ;;  %s5159_s10 = sadd.s32 %s5049_s23, %s39_s7 }
  0x16   : > { %p57_p2 = scmp.ne.s32.totalorder %s5037_s20, %s5033_s19  ;;  %s7329_s29 = smov (%p35_p1, %s7327_s29), 0 }
  0x17   : > { %7241 = sst [smem:[#allocation15_spill]] %s7329_s29  ;;  %p58_p3 = scmp.eq.s32.totalorder %s5057_s25, 0 }
  0x18   : > { %p5166_p4 = scmp.eq.s32.totalorder %s3528_s26, 3  ;;  %s43_s12 = smul.u32 %s42_s9, %s7329_s29 }
  0x19   : > { %s46_s13 = ssub.s32 %s5053_s24, %s7329_s29  ;;  %p5173_p5 = por %p58_p3, %p57_p2 }
  0x1a   : > { %p5179_p6 = por %p5166_p4, %p57_p2  ;;  %s44_s26 = sadd.s32 %s43_s12, %s7325_s28 }
  0x1b   : > { %p154_p7 = scmp.ne.s32.totalorder %s5033_s19, %s5029_s18  ;;  %s45_s5 = ssub.s32 %s5159_s10, %s44_s26 }
  0x1c   : > { %p155_p8 = scmp.eq.s32.totalorder %s3529_s27, 3  ;;  %s47_s7 = sor.u32 %s46_s13, %s45_s5 }
  0x1d   : > { %p162_p9 = scmp.eq.s32.totalorder %s46_s13, 0  ;;  %p48_p10 = scmp.eq.s32.totalorder %s47_s7, 0 }
  0x1e   : > { %p5187_p11 = por %p155_p8, %p154_p7  ;;  %s164_s9 = sadd.s32 1, %s5025_s17 }
  0x1f   : > { %p174_p12 = scmp.ne.s32.totalorder %s5025_s17, %s5021_s16  ;;  %p180_p0 = scmp.ne.s32.totalorder %s5021_s16, %s5017_s15 }
  0x20   : > { %s5195_s29 = scalar_select %p48_p10, %s5037_s20, %s50_s6  }
  0x21   : > { %s5198_s23 = scalar_select %p162_p9, %s5025_s17, %s164_s9  }
  0x22   : > { %7246 = sst [smem:[#allocation16_spill]] %s5195_s29  ;;  %p5202_p13 = por %p174_p12, %p5166_p4 }
  0x23   : > { %p5208_p1 = por %p180_p0, %p155_p8  ;;  %p3535_p2 = scmp.ge.s32.totalorder %s5057_s25, 4 }
  0x25   : > { %197 = sbr.rel (%p3535_p2) target bundleno = 75 (0x4b), region = 16 }
  0x2a   : > { %200 = sbr.rel (!%p5173_p5) target bundleno = 75 (0x4b), region = 20  ;;  %s202_s6 = sand.u32 (%p5173_p5), 1, %s5037_s20  }
  0x2b   : > { %s210_s11 = smul.u32 (%p5173_p5), 3, %s5053_s24  ;;  %s7249_s0 = sld [smem:[#allocation23_spill]] (%p5173_p5) }
  0x2c   : > { %s4509_s12 = smul.u32 (%p5173_p5), 384, %s202_s6 }
  0x2d   : > { %s4510_s13 = smul.u32 (%p5173_p5), 96, %s5159_s10 }
  0x2e   : > { %s5226_s10 = scalar_lea.vmem (%p5173_p5), [#allocation3], %s4509_s12 }
  0x2f   : > { %s212_s26 = sadd.s32 %s4510_s13, %s210_s11 }
  0x30   : > { %s3539_s5 = sshll.u32 %s212_s26, 3 }
  0x31   : > { %s5221_s28 = scalar_lea.vmem %s7249_s0, %s3539_s5 }
  0x32   : > { %v227_v0 = vld [vmem:[%s5221_s28] sm:$0xff]  ;;  %v229_v1 = vld [vmem:[%s5221_s28 + $0x8] sm:$0xff]  ;;  %v231_v2 = vld [vmem:[%s5221_s28 + $0x10] sm:$0xff] }
  0x33   : > { %228 = vst [vmem:[%s5226_s10] sm:$0xff] %v227_v0  ;;  %230 = vst [vmem:[%s5226_s10 + $0x8] sm:$0xff] %v229_v1  ;;  %v233_v3 = vld [vmem:[%s5221_s28 + $0x30] sm:$0xff]  ;;  %v235_v4 = vld [vmem:[%s5221_s28 + $0x38] sm:$0xff] }
  0x34   : > { %232 = vst [vmem:[%s5226_s10 + $0x10] sm:$0xff] %v231_v2  ;;  %v237_v5 = vld [vmem:[%s5221_s28 + $0x40] sm:$0xff]  ;;  %234 = vst [vmem:[%s5226_s10 + $0x18] sm:$0xff] %v233_v3  ;;  %v241_v7 = vld [vmem:[%s5221_s28 + $0x68] sm:$0xff] }
  0x35   : > { %236 = vst [vmem:[%s5226_s10 + $0x20] sm:$0xff] %v235_v4  ;;  %238 = vst [vmem:[%s5226_s10 + $0x28] sm:$0xff] %v237_v5  ;;  %v239_v6 = vld [vmem:[%s5221_s28 + $0x60] sm:$0xff]  ;;  %v243_v8 = vld [vmem:[%s5221_s28 + $0x70] sm:$0xff] }
  0x36   : > { %240 = vst [vmem:[%s5226_s10 + $0x30] sm:$0xff] %v239_v6  ;;  %242 = vst [vmem:[%s5226_s10 + $0x38] sm:$0xff] %v241_v7  ;;  %v245_v9 = vld [vmem:[%s5221_s28 + $0x90] sm:$0xff]  ;;  %v247_v10 = vld [vmem:[%s5221_s28 + $0x98] sm:$0xff] }
  0x37   : > { %244 = vst [vmem:[%s5226_s10 + $0x40] sm:$0xff] %v243_v8  ;;  %v249_v11 = vld [vmem:[%s5221_s28 + $0xa0] sm:$0xff]  ;;  %246 = vst [vmem:[%s5226_s10 + $0x48] sm:$0xff] %v245_v9  ;;  %v253_v13 = vld [vmem:[%s5221_s28 + $0xc8] sm:$0xff] }
  0x38   : > { %248 = vst [vmem:[%s5226_s10 + $0x50] sm:$0xff] %v247_v10  ;;  %250 = vst [vmem:[%s5226_s10 + $0x58] sm:$0xff] %v249_v11  ;;  %v251_v12 = vld [vmem:[%s5221_s28 + $0xc0] sm:$0xff]  ;;  %v255_v14 = vld [vmem:[%s5221_s28 + $0xd0] sm:$0xff] }
  0x39   : > { %252 = vst [vmem:[%s5226_s10 + $0x60] sm:$0xff] %v251_v12  ;;  %254 = vst [vmem:[%s5226_s10 + $0x68] sm:$0xff] %v253_v13  ;;  %v257_v15 = vld [vmem:[%s5221_s28 + $0xf0] sm:$0xff]  ;;  %v259_v16 = vld [vmem:[%s5221_s28 + $0xf8] sm:$0xff] }
  0x3a   : > { %256 = vst [vmem:[%s5226_s10 + $0x70] sm:$0xff] %v255_v14  ;;  %v261_v17 = vld [vmem:[%s5221_s28 + $0x100] sm:$0xff]  ;;  %258 = vst [vmem:[%s5226_s10 + $0x78] sm:$0xff] %v257_v15  ;;  %v265_v19 = vld [vmem:[%s5221_s28 + $0x128] sm:$0xff] }
  0x3b   : > { %260 = vst [vmem:[%s5226_s10 + $0x80] sm:$0xff] %v259_v16  ;;  %262 = vst [vmem:[%s5226_s10 + $0x88] sm:$0xff] %v261_v17  ;;  %v263_v18 = vld [vmem:[%s5221_s28 + $0x120] sm:$0xff]  ;;  %v267_v20 = vld [vmem:[%s5221_s28 + $0x130] sm:$0xff] }
  0x3c   : > { %264 = vst [vmem:[%s5226_s10 + $0x90] sm:$0xff] %v263_v18  ;;  %266 = vst [vmem:[%s5226_s10 + $0x98] sm:$0xff] %v265_v19  ;;  %v269_v21 = vld [vmem:[%s5221_s28 + $0x150] sm:$0xff]  ;;  %v271_v22 = vld [vmem:[%s5221_s28 + $0x158] sm:$0xff] }
  0x3d   : > { %268 = vst [vmem:[%s5226_s10 + $0xa0] sm:$0xff] %v267_v20  ;;  %v273_v23 = vld [vmem:[%s5221_s28 + $0x160] sm:$0xff]  ;;  %270 = vst [vmem:[%s5226_s10 + $0xa8] sm:$0xff] %v269_v21  ;;  %v277_v25 = vld [vmem:[%s5221_s28 + $0x188] sm:$0xff] }
  0x3e   : > { %272 = vst [vmem:[%s5226_s10 + $0xb0] sm:$0xff] %v271_v22  ;;  %274 = vst [vmem:[%s5226_s10 + $0xb8] sm:$0xff] %v273_v23  ;;  %v275_v24 = vld [vmem:[%s5221_s28 + $0x180] sm:$0xff]  ;;  %v279_v26 = vld [vmem:[%s5221_s28 + $0x190] sm:$0xff] }
  0x3f   : > { %276 = vst [vmem:[%s5226_s10 + $0xc0] sm:$0xff] %v275_v24  ;;  %278 = vst [vmem:[%s5226_s10 + $0xc8] sm:$0xff] %v277_v25  ;;  %v281_v27 = vld [vmem:[%s5221_s28 + $0x1b0] sm:$0xff]  ;;  %v283_v28 = vld [vmem:[%s5221_s28 + $0x1b8] sm:$0xff] }
  0x40   : > { %280 = vst [vmem:[%s5226_s10 + $0xd0] sm:$0xff] %v279_v26  ;;  %v285_v29 = vld [vmem:[%s5221_s28 + $0x1c0] sm:$0xff]  ;;  %282 = vst [vmem:[%s5226_s10 + $0xd8] sm:$0xff] %v281_v27  ;;  %v289_v31 = vld [vmem:[%s5221_s28 + $0x1e8] sm:$0xff] }
  0x41   : > { %284 = vst [vmem:[%s5226_s10 + $0xe0] sm:$0xff] %v283_v28  ;;  %286 = vst [vmem:[%s5226_s10 + $0xe8] sm:$0xff] %v285_v29  ;;  %v287_v30 = vld [vmem:[%s5221_s28 + $0x1e0] sm:$0xff]  ;;  %v291_v32 = vld [vmem:[%s5221_s28 + $0x1f0] sm:$0xff] }
  0x42   : > { %288 = vst [vmem:[%s5226_s10 + $0xf0] sm:$0xff] %v287_v30  ;;  %290 = vst [vmem:[%s5226_s10 + $0xf8] sm:$0xff] %v289_v31  ;;  %v293_v33 = vld [vmem:[%s5221_s28 + $0x210] sm:$0xff]  ;;  %v295_v34 = vld [vmem:[%s5221_s28 + $0x218] sm:$0xff] }
  0x43   : > { %292 = vst [vmem:[%s5226_s10 + $0x100] sm:$0xff] %v291_v32  ;;  %v297_v35 = vld [vmem:[%s5221_s28 + $0x220] sm:$0xff]  ;;  %294 = vst [vmem:[%s5226_s10 + $0x108] sm:$0xff] %v293_v33  ;;  %v301_v37 = vld [vmem:[%s5221_s28 + $0x248] sm:$0xff] }
  0x44   : > { %296 = vst [vmem:[%s5226_s10 + $0x110] sm:$0xff] %v295_v34  ;;  %298 = vst [vmem:[%s5226_s10 + $0x118] sm:$0xff] %v297_v35  ;;  %v299_v36 = vld [vmem:[%s5221_s28 + $0x240] sm:$0xff]  ;;  %v303_v38 = vld [vmem:[%s5221_s28 + $0x250] sm:$0xff] }
  0x45   : > { %300 = vst [vmem:[%s5226_s10 + $0x120] sm:$0xff] %v299_v36  ;;  %302 = vst [vmem:[%s5226_s10 + $0x128] sm:$0xff] %v301_v37  ;;  %v305_v39 = vld [vmem:[%s5221_s28 + $0x270] sm:$0xff]  ;;  %v307_v40 = vld [vmem:[%s5221_s28 + $0x278] sm:$0xff] }
  0x46   : > { %304 = vst [vmem:[%s5226_s10 + $0x130] sm:$0xff] %v303_v38  ;;  %v309_v41 = vld [vmem:[%s5221_s28 + $0x280] sm:$0xff]  ;;  %306 = vst [vmem:[%s5226_s10 + $0x138] sm:$0xff] %v305_v39  ;;  %v313_v43 = vld [vmem:[%s5221_s28 + $0x2a8] sm:$0xff] }
  0x47   : > { %308 = vst [vmem:[%s5226_s10 + $0x140] sm:$0xff] %v307_v40  ;;  %310 = vst [vmem:[%s5226_s10 + $0x148] sm:$0xff] %v309_v41  ;;  %v311_v42 = vld [vmem:[%s5221_s28 + $0x2a0] sm:$0xff]  ;;  %v315_v44 = vld [vmem:[%s5221_s28 + $0x2b0] sm:$0xff] }
  0x48   : > { %312 = vst [vmem:[%s5226_s10 + $0x150] sm:$0xff] %v311_v42  ;;  %314 = vst [vmem:[%s5226_s10 + $0x158] sm:$0xff] %v313_v43  ;;  %v317_v45 = vld [vmem:[%s5221_s28 + $0x2d0] sm:$0xff]  ;;  %v319_v46 = vld [vmem:[%s5221_s28 + $0x2d8] sm:$0xff] }
  0x49   : > { %316 = vst [vmem:[%s5226_s10 + $0x160] sm:$0xff] %v315_v44  ;;  %v321_v47 = vld [vmem:[%s5221_s28 + $0x2e0] sm:$0xff]  ;;  %318 = vst [vmem:[%s5226_s10 + $0x168] sm:$0xff] %v317_v45 }
  0x4a   : > { %320 = vst [vmem:[%s5226_s10 + $0x170] sm:$0xff] %v319_v46  ;;  %322 = vst [vmem:[%s5226_s10 + $0x178] sm:$0xff] %v321_v47 }
  0x4b PF: > { %p3540_p3 = scmp.ge.s32.totalorder %s5057_s25, 1  ;;  %p342_p4 = scmp.lt.s32.totalorder %s5057_s25, 5 }
  0x4d   : > { %p343_p5 = pnand %p3540_p3, %p342_p4 }
  0x4f   : > { %346 = sbr.rel (%p343_p5) target bundleno = 4218 (0x107a), region = 51 }
  0x54   : > { %s5324_s14 = sand.u32 1, %s5033_s19   ;;  %s7198_s28 = sand.u32 1, %s5021_s16  }
  0x55   : > { %s4511_s6 = smul.u32 384, %s5324_s14  ;;  %s3541_s11 = sshll.u32 %s5324_s14, 7 }
  0x56   : > { %s5331_s12 = sshll.u32 %s7198_s28, 3  ;;  %p394_p7 = scmp.lt.s32.totalorder %s5045_s22, 1 }
  0x57   : > { %s5345_s20 = scalar_lea.vmem [#allocation3], %s4511_s6  ;;  %s5347_s19 = scalar_lea.vmem [#allocation4], %s3541_s11 }
  0x58   : > { %s395_s13 = scalar_select %p394_p7, %s5045_s22, 1 }
  0x59   : > { %s387_s28 = scalar_lea.vmem [#allocation6], %s5331_s12  ;;  %p3544_p8 = scmp.ne.s32.totalorder %s5041_s21, 0 }
  0x5a   : > { %s4512_s26 = smul.u32 384, %s395_s13 }
  0x5b   : > { %s4513_s5 = smul.u32 3, %s395_s13 }
  0x5c   : > { %s5338_s10 = scalar_lea.vmem %s7187_s1, %s4512_s26  ;;  %411 = sbr.rel (%p3544_p8) target bundleno = 99 (0x63), region = 59 }
  0x5d   : > { %s5343_s29 = scalar_lea.vmem %s7188_s2, %s4513_s5 }
  0x61   : > { %v5059_v48 = vmov 0.0  }
  0x62   : > { %412 = vst [vmem:[#allocation2] sm:$0xff] %v5059_v48 }
  0x63 PF: > { %v5352_v49 = vld [vmem:[%s5338_s10 + $0x170] sm:$0xff]  ;;  %v5355_v50 = vld [vmem:[%s5338_s10 + $0x168] sm:$0xff]  ;;  %v5358_v51 = vld [vmem:[%s5338_s10 + $0x158] sm:$0xff]  ;;  %v7199_v53 = vmov 0.0   ;;  %vm5061_vm0 = vmmov 0   ;;  %v471_v35 = vlaneseq  ;;  %s3674_s0 = smul.u32 360, %s5045_s22 }
  0x64   : > { %7250 = vst [vmem:[#allocation17_spill] sm:$0xff] %v5352_v49  ;;  %486 = vmatprep.subr.mxu0 %v5352_v49  ;;  %v5362_v52 = vld [vmem:[%s5338_s10 + $0x150] sm:$0xff]  ;;  %550 = vmatprep.mubr.f32.mxu0 %v7199_v53  ;;  %v5367_v54 = vld [vmem:[%s5338_s10 + $0x140] sm:$0xff]  ;;  %v5372_v55 = vld [vmem:[%s5338_s10 + $0x138] sm:$0xff]  ;;  %s3550_s11 = smul.u32 312, %s5045_s22 }
  0x65   : > { %487 = vmatpush1.msra.mxu0 %v5355_v50  ;;  %3949 = vmatprep.subr.mxu1 %v7199_v53  ;;  %v5378_v56 = vld [vmem:[%s5338_s10 + $0x128] sm:$0xff]  ;;  %v5382_v57 = vld [vmem:[%s5338_s10 + $0x120] sm:$0xff]  ;;  %v5386_v58 = vld [vmem:[%s5338_s10 + $0x110] sm:$0xff]  ;;  %v472_v36 = vshrl.u32 %v471_v35, 7  ;;  %s466_s24 = scalar_lea.vmem %s5345_s20, %s3674_s0 [#allocation3]  ;;  %s3556_s26 = smul.u32 104, %s5045_s22 }
  0x66   : > { %488 = vmatprep.subr.mxu0 %v5358_v51  ;;  %3981 = vmatprep.mubr.msk.f32.mxu1 %vm5061_vm0, %v7199_v53  ;;  %v5390_v59 = vld [vmem:[%s5338_s10 + $0x108] sm:$0xff]  ;;  %v5394_v60 = vld [vmem:[%s5338_s10 + $0xf8] sm:$0xff]  ;;  %v5398_v61 = vld [vmem:[%s5338_s10 + $0xf0] sm:$0xff]  ;;  %s3340_s13 = scalar_lea.vmem %s5345_s20, %s3550_s11 [#allocation3]  ;;  %s3558_s7 = smul.u32 264, %s5045_s22 }
  0x67   : > { %489 = vmatpush1.msra.mxu0 %v5362_v52  ;;  %v5402_v62 = vld [vmem:[%s5338_s10 + $0xe0] sm:$0xff]  ;;  %v5406_v63 = vld [vmem:[%s5338_s10 + $0xd8] sm:$0xff]  ;;  %v5416_v2 = vld [vmem:[%s5338_s10 + $0xc8] sm:$0xff]  ;;  %v473_v37 = vsub.s32 0, %v472_v36  ;;  %v477_v43 = vsub.s32 1, %v472_v36  ;;  %s3344_s5 = scalar_lea.vmem %s5347_s19, %s3556_s26 [#allocation4]  ;;  %s3564_s0 = smul.u32 88, %s5045_s22 }
  0x68   : > { %490 = vmatprep.subr.mxu0 %v5367_v54  ;;  %v5409_v0 = vld [vmem:[%s5338_s10 + $0x178] sm:$0xff]  ;;  %v5412_v1 = vld [vmem:[%s5338_s10 + $0x160] sm:$0xff]  ;;  %v5425_v4 = vld [vmem:[%s5338_s10 + $0x148] sm:$0xff]  ;;  %s3348_s9 = scalar_lea.vmem %s5345_s20, %s3558_s7 [#allocation3] }
  0x69   : > { %491 = vmatpush1.msra.mxu0 %v5372_v55  ;;  %3950 = vmatpush3.msra.mxu1 %v5409_v0  ;;  %v5421_v3 = vld [vmem:[%s5338_s10 + $0xc0] sm:$0xff]  ;;  %v5429_v5 = vld [vmem:[%s5338_s10 + $0xb0] sm:$0xff]  ;;  %v5434_v6 = vld [vmem:[%s5338_s10 + $0xa8] sm:$0xff] }
  0x6a   : > { %492 = vmatprep.subr.mxu0 %v5378_v56  ;;  %3951 = vmatprep.subr.mxu1 %v7199_v53  ;;  %v5438_v7 = vld [vmem:[%s5338_s10 + $0x130] sm:$0xff]  ;;  %v5442_v8 = vld [vmem:[%s5338_s10 + $0x98] sm:$0xff]  ;;  %v5455_v11 = vld [vmem:[%s5338_s10 + $0x80] sm:$0xff] }
  0x6b   : > { %493 = vmatpush1.msra.mxu0 %v5382_v57  ;;  %3952 = vmatpush3.msra.mxu1 %v5412_v1  ;;  %v5447_v9 = vld [vmem:[%s5338_s10 + $0x90] sm:$0xff]  ;;  %v5451_v10 = vld [vmem:[%s5338_s10 + $0x118] sm:$0xff]  ;;  %v5464_v13 = vld [vmem:[%s5338_s10 + $0x100] sm:$0xff] }
  0x6c   : > { %494 = vmatprep.subr.mxu0 %v5386_v58  ;;  %3953 = vmatprep.subr.mxu1 %v7199_v53  ;;  %v5460_v12 = vld [vmem:[%s5338_s10 + $0x78] sm:$0xff]  ;;  %v5468_v14 = vld [vmem:[%s5338_s10 + $0x68] sm:$0xff]  ;;  %v5473_v15 = vld [vmem:[%s5338_s10 + $0x60] sm:$0xff] }
  0x6d   : > { %495 = vmatpush1.msra.mxu0 %v5390_v59  ;;  %3954 = vmatpush3.msra.mxu1 %v5425_v4  ;;  %v5477_v16 = vld [vmem:[%s5338_s10 + $0xe8] sm:$0xff]  ;;  %v5481_v17 = vld [vmem:[%s5338_s10 + $0x50] sm:$0xff]  ;;  %v5494_v20 = vld [vmem:[%s5338_s10 + $0x38] sm:$0xff] }
  0x6e   : > { %496 = vmatprep.subr.mxu0 %v5394_v60  ;;  %3955 = vmatprep.subr.mxu1 %v7199_v53  ;;  %v5486_v18 = vld [vmem:[%s5338_s10 + $0x48] sm:$0xff]  ;;  %v5490_v19 = vld [vmem:[%s5338_s10 + $0xd0] sm:$0xff]  ;;  %v5503_v22 = vld [vmem:[%s5338_s10 + $0xb8] sm:$0xff] }
  0x6f   : > { %497 = vmatpush1.msra.mxu0 %v5398_v61  ;;  %3956 = vmatpush3.msra.mxu1 %v5438_v7  ;;  %v5499_v21 = vld [vmem:[%s5338_s10 + $0x30] sm:$0xff]  ;;  %v5507_v23 = vld [vmem:[%s5338_s10 + $0x20] sm:$0xff]  ;;  %v5512_v24 = vld [vmem:[%s5338_s10 + $0x18] sm:$0xff] }
  0x70   : > { %498 = vmatprep.subr.mxu0 %v5402_v62  ;;  %3957 = vmatprep.subr.mxu1 %v7199_v53  ;;  %v5516_v25 = vld [vmem:[%s5338_s10 + $0xa0] sm:$0xff]  ;;  %v5520_v26 = vld [vmem:[%s5338_s10 + $0x8] sm:$0xff]  ;;  %v5538_v30 = vld [vmem:[%s5338_s10 + $0x70] sm:$0xff] }
  0x71   : > { %499 = vmatpush1.msra.mxu0 %v5406_v63  ;;  %3958 = vmatpush3.msra.mxu1 %v5451_v10  ;;  %7251 = vst [vmem:[#allocation18_spill] sm:$0xff] %v5520_v26  ;;  %v5525_v27 = vld [vmem:[%s5338_s10] sm:$0xff]  ;;  %v5529_v28 = vld [vmem:[%s5338_s10 + $0x88] sm:$0xff]  ;;  %v5545_v31 = vld [vmem:[%s5338_s10 + $0x58] sm:$0xff] }
  0x72   : > { %500 = vmatprep.subr.mxu0 %v5416_v2  ;;  %3959 = vmatprep.subr.mxu1 %v7199_v53  ;;  %7252 = vst [vmem:[#allocation19_spill] sm:$0xff] %v5525_v27  ;;  %v5532_v29 = vld [vmem:[#allocation2] sm:$0xff]  ;;  %v5558_v33 = vld [vmem:[%s5338_s10 + $0x28] sm:$0xff]  ;;  %v5565_v34 = vld [vmem:[%s5338_s10 + $0x10] sm:$0xff] }
  0x73   : > { %501 = vmatpush1.msra.mxu0 %v5421_v3  ;;  %3960 = vmatpush3.msra.mxu1 %v5464_v13  ;;  %v5551_v32 = vld [vmem:[%s5338_s10 + $0x40] sm:$0xff]  ;;  %7253 = vst [vmem:[#allocation20_spill] sm:$0xff] %v5558_v33  ;;  %7254 = vst [vmem:[#allocation21_spill] sm:$0xff] %v5565_v34 }
  0x74   : > { %502 = vmatprep.subr.mxu0 %v5429_v5  ;;  %3961 = vmatprep.subr.mxu1 %v7199_v53  ;;  %v461_v38 = vld [vmem:[%s5343_s29] sm:$0x7]  ;;  %s3549_s29 = smul.u32 120, %s5045_s22 }
  0x75   : > { %503 = vmatpush1.msra.mxu0 %v5434_v6  ;;  %3962 = vmatpush3.msra.mxu1 %v5477_v16  ;;  %v5638_v39 = vrot.slane %v461_v38, %v473_v37  ;;  %v467_v40 = vld [vmem:[%s466_s24] sm:$0xff]  ;;  %v5641_v46 = vrot.slane %v461_v38, %v477_v43 }
  0x76   : > { %504 = vmatprep.subr.mxu0 %v5442_v8  ;;  %3963 = vmatprep.subr.mxu1 %v7199_v53  ;;  %s648_s6 = scalar_lea.vmem %s5347_s19, %s3549_s29 [#allocation4] }
  0x77   : > { %505 = vmatpush1.msra.mxu0 %v5447_v9  ;;  %3964 = vmatpush3.msra.mxu1 %v5490_v19  ;;  %7255 = vst [vmem:[#allocation22_spill] sm:$0xff] %v5641_v46 }
  0x78   : > { %506 = vmatprep.subr.mxu0 %v5455_v11  ;;  %3965 = vmatprep.subr.mxu1 %v7199_v53 }
  0x79   : > { %507 = vmatpush1.msra.mxu0 %v5460_v12  ;;  %3966 = vmatpush3.msra.mxu1 %v5503_v22 }
  0x7a   : > { %508 = vmatprep.subr.mxu0 %v5468_v14  ;;  %3967 = vmatprep.subr.mxu1 %v7199_v53 }
  0x7b   : > { %509 = vmatpush1.msra.mxu0 %v5473_v15  ;;  %3968 = vmatpush3.msra.mxu1 %v5516_v25 }
  0x7c   : > { %510 = vmatprep.subr.mxu0 %v5481_v17  ;;  %3969 = vmatprep.subr.mxu1 %v7199_v53 }
  0x7d   : > { %511 = vmatpush1.msra.mxu0 %v5486_v18  ;;  %3970 = vmatpush3.msra.mxu1 %v5529_v28 }
  0x7e   : > { %512 = vmatprep.subr.mxu0 %v5494_v20  ;;  %3971 = vmatprep.subr.mxu1 %v7199_v53 }
  0x7f   : > { %513 = vmatpush1.msra.mxu0 %v5499_v21  ;;  %3972 = vmatpush3.msra.mxu1 %v5538_v30 }
  0x80   : > { %514 = vmatprep.subr.mxu0 %v5507_v23  ;;  %3973 = vmatprep.subr.mxu1 %v7199_v53 }
  0x81   : > { %515 = vmatpush1.msra.mxu0 %v5512_v24  ;;  %3974 = vmatpush3.msra.mxu1 %v5545_v31 }
  0x82   : > { %516 = vmatprep.subr.mxu0 %v5520_v26  ;;  %3975 = vmatprep.subr.mxu1 %v7199_v53 }
  0x83   : > { %517 = vmatpush1.msra.mxu0 %v5525_v27  ;;  %3976 = vmatpush3.msra.mxu1 %v5551_v32 }
  0x84   : > { %551 = vmatmul.mubr.f32.vlgmr.msra.gmra.mxu0 %v5532_v29  ;;  %658 = vmatprep.subr.mxu0 %v5352_v49 }
  0x85   : > { %659 = vmatpush1.msra.mxu0 %v5355_v50  ;;  %3977 = vmatprep.subr.mxu1 %v7199_v53 }
  0x86   : > { %660 = vmatprep.subr.mxu0 %v5358_v51  ;;  %3978 = vmatpush3.msra.mxu1 %v5558_v33 }
  0x87   : > { %661 = vmatpush1.msra.mxu0 %v5362_v52  ;;  %3979 = vmatprep.subr.mxu1 %v7199_v53 }
  0x88   : > { %662 = vmatprep.subr.mxu0 %v5367_v54  ;;  %3980 = vmatpush3.msra.mxu1 %v5565_v34 }
  0x89   : > { %663 = vmatpush1.msra.mxu0 %v5372_v55  ;;  %3982 = vmatmul.mubr.f32.vlgmr.msra.gmra.mxu1 %v5532_v29 }
  0x8a   : > { %664 = vmatprep.subr.mxu0 %v5378_v56  ;;  %3984 = vmatprep.subr.mxu1 %v7199_v53 }
  0x8b   : > { %665 = vmatpush1.msra.mxu0 %v5382_v57  ;;  %3985 = vmatpush3.msra.mxu1 %v5409_v0 }
  0x8c   : > { %666 = vmatprep.subr.mxu0 %v5386_v58  ;;  %3986 = vmatprep.subr.mxu1 %v7199_v53 }
  0x8d   : > { %667 = vmatpush1.msra.mxu0 %v5390_v59  ;;  %3987 = vmatpush3.msra.mxu1 %v5412_v1 }
  0x8e   : > { %668 = vmatprep.subr.mxu0 %v5394_v60  ;;  %3988 = vmatprep.subr.mxu1 %v7199_v53 }
  0x8f   : > { %669 = vmatpush1.msra.mxu0 %v5398_v61  ;;  %3989 = vmatpush3.msra.mxu1 %v5425_v4 }
  0x90   : > { %670 = vmatprep.subr.mxu0 %v5402_v62  ;;  %3990 = vmatprep.subr.mxu1 %v7199_v53 }
  0x91   : > { %671 = vmatpush1.msra.mxu0 %v5406_v63  ;;  %3991 = vmatpush3.msra.mxu1 %v5438_v7 }
  0x92   : > { %672 = vmatprep.subr.mxu0 %v5416_v2  ;;  %3992 = vmatprep.subr.mxu1 %v7199_v53 }
  0x93   : > { %673 = vmatpush1.msra.mxu0 %v5421_v3  ;;  %3993 = vmatpush3.msra.mxu1 %v5451_v10 }
  0x94   : > { %674 = vmatprep.subr.mxu0 %v5429_v5  ;;  %3994 = vmatprep.subr.mxu1 %v7199_v53 }
  0x95   : > { %675 = vmatpush1.msra.mxu0 %v5434_v6  ;;  %3995 = vmatpush3.msra.mxu1 %v5464_v13 }
  0x96   : > { %676 = vmatprep.subr.mxu0 %v5442_v8  ;;  %3996 = vmatprep.subr.mxu1 %v7199_v53 }
  0x97   : > { %677 = vmatpush1.msra.mxu0 %v5447_v9  ;;  %3997 = vmatpush3.msra.mxu1 %v5477_v16 }
  0x98   : > { %678 = vmatprep.subr.mxu0 %v5455_v11  ;;  %3998 = vmatprep.subr.mxu1 %v7199_v53 }
  0x99   : > { %679 = vmatpush1.msra.mxu0 %v5460_v12  ;;  %3999 = vmatpush3.msra.mxu1 %v5490_v19 }
  0x9a   : > { %680 = vmatprep.subr.mxu0 %v5468_v14  ;;  %4000 = vmatprep.subr.mxu1 %v7199_v53 }
  0x9b   : > { %681 = vmatpush1.msra.mxu0 %v5473_v15  ;;  %4001 = vmatpush3.msra.mxu1 %v5503_v22 }
  0x9c   : > { %682 = vmatprep.subr.mxu0 %v5481_v17  ;;  %4002 = vmatprep.subr.mxu1 %v7199_v53 }
  0x9d   : > { %683 = vmatpush1.msra.mxu0 %v5486_v18  ;;  %4003 = vmatpush3.msra.mxu1 %v5516_v25 }
  0x9e   : > { %684 = vmatprep.subr.mxu0 %v5494_v20  ;;  %4004 = vmatprep.subr.mxu1 %v7199_v53 }
  0x9f   : > { %685 = vmatpush1.msra.mxu0 %v5499_v21  ;;  %4005 = vmatpush3.msra.mxu1 %v5529_v28 }
  0xa0   : > { %686 = vmatprep.subr.mxu0 %v5507_v23  ;;  %4006 = vmatprep.subr.mxu1 %v7199_v53 }
  0xa1   : > { %687 = vmatpush1.msra.mxu0 %v5512_v24  ;;  %4007 = vmatpush3.msra.mxu1 %v5538_v30 }
  0xa2   : > { %688 = vmatprep.subr.mxu0 %v5520_v26  ;;  %4008 = vmatprep.subr.mxu1 %v7199_v53 }
  0xa3   : > { %689 = vmatpush1.msra.mxu0 %v5525_v27  ;;  %722 = vmatprep.mubr.f32.mxu0 %v7199_v53 }
  0xa4   : > { %4009 = vmatpush3.msra.mxu1 %v5545_v31  ;;  %4016 = vmatprep.mubr.msk.f32.mxu1 %vm5061_vm0, %v7199_v53 }
  0xa5   : > { %4010 = vmatprep.subr.mxu1 %v7199_v53  ;;  %830 = vmatprep.subr.mxu0 %v5352_v49 }
  0xa6   : > { %4011 = vmatpush3.msra.mxu1 %v5551_v32 }
  0xa7   : > { %4012 = vmatprep.subr.mxu1 %v7199_v53 }
  0xa8   : > { %4013 = vmatpush3.msra.mxu1 %v5558_v33 }
  0xa9   : > { %4014 = vmatprep.subr.mxu1 %v7199_v53 }
  0xaa   : > { %4015 = vmatpush3.msra.mxu1 %v5565_v34 }
  0xab   : > { %4019 = vmatprep.subr.mxu1 %v7199_v53  ;;  %v468_v53 = vld [vmem:[%s466_s24 + $0x8] sm:$0xff] }
 0x144   : > { %v552_v41 = vpop.f32.mrf.mxu0 }
 0x145   : > { %v553_v42 = vadd.f32 %v552_v41, %v5638_v39  ;;  %v481_v41 = vsub.s32 2, %v472_v36 }
 0x146   : > { %v554_v47 = vpop.f32.mrf.mxu0 }
 0x147   : > { %v627_v44 = vadd.f32 %v553_v42, %v467_v40  ;;  %v555_v48 = vadd.f32 %v554_v47, %v5641_v46  ;;  %v5644_v40 = vrot.slane %v461_v38, %v481_v41  ;;  %v7256_v38 = vmov 0.0  }
 0x149   : > { %v3547_v45 = vmul.f32 -1.442695, %v627_v44  ;;  %v623_v35 = vpop.f32.mrf.mxu1  ;;  %v634_v34 = vadd.f32 %v555_v48, %v468_v53  ;;  %v7259_v48 = vld [vmem:[#allocation21_spill] sm:$0xff] }
 0x14a   : > { %v624_v42 = vadd.f32 %v623_v35, %v5644_v40  ;;  %v7260_v35 = vld [vmem:[#allocation17_spill] sm:$0xff] }
 0x14b   : > { %4620 = vpow2.f32 %v3547_v45  ;;  %v3983_v49 = vpop.f32.mrf.mxu1  ;;  %v3548_v27 = vmul.f32 -1.442695, %v634_v34  ;;  %v469_v45 = vld [vmem:[%s466_s24 + $0x10] sm:$0xff]  ;;  %s3352_s24 = scalar_lea.vmem %s5347_s19, %s3564_s0 [#allocation4] }
 0x14d   : > { %4622 = vpow2.f32 %v3548_v27 }
 0x158   : > { %v4621_v37 = vpop.eup %4620 }
 0x159   : > { %v631_v26 = vadd.f32 1.0, %v4621_v37  ;;  %v3551_v37 = vld [vmem:[%s3340_s13 + $0x18] sm:$0xff] }
 0x15a   : > { %v4623_v43 = vpop.eup %4622 }
 0x15b   : > { %4624 = vrcp.f32 %v631_v26  ;;  %v638_v46 = vadd.f32 1.0, %v4623_v43 }
 0x168   : > { %v4625_v44 = vpop.eup %4624 }
 0x169   : > { %v641_v47 = vmul.f32 %v4625_v44, %v624_v42 }
 0x16b   : > { %v642_v49 = vadd.f32 %v641_v47, %v469_v45 }
 0x16d   : > { %4626 = vtanh.f32 %v642_v49 }
 0x16e   : > { %4628 = vrcp.f32 %v638_v46  ;;  %v7258_v46 = vld [vmem:[#allocation19_spill] sm:$0xff] }
 0x17a   : > { %v4627_v53 = vpop.eup %4626 }
 0x17b   : > { %v644_v27 = vsub.f32 %v5532_v29, %v4627_v53  ;;  %v4629_v26 = vpop.eup %4628  ;;  %v7257_v29 = vld [vmem:[#allocation18_spill] sm:$0xff] }
 0x17d   : > { %v645_v34 = vmul.f32 %v4629_v26, %v644_v27  ;;  %v3552_v26 = vld [vmem:[%s3340_s13 + $0x20] sm:$0xff] }
 0x17f   : > { %v5652_v36 = vadd.f32 %v4627_v53, %v645_v34  ;;  %v7261_v53 = vld [vmem:[#allocation22_spill] sm:$0xff] }
 0x181   : > { %723 = vmatmul.mubr.f32.vlgmr.msra.gmra.mxu0 %v5652_v36  ;;  %4017 = vmatmul.mubr.f32.vlgmr.msra.gmra.mxu1 %v5652_v36  ;;  %649 = vst [vmem:[%s648_s6] sm:$0xff] %v5652_v36  ;;  %s3566_s6 = smul.u32 216, %s5045_s22 }
 0x182   : > { %831 = vmatpush1.msra.mxu0 %v5355_v50  ;;  %4020 = vmatpush3.msra.mxu1 %v5409_v0 }
 0x183   : > { %832 = vmatprep.subr.mxu0 %v5358_v51  ;;  %4021 = vmatprep.subr.mxu1 %v7256_v38  ;;  %s3356_s11 = scalar_lea.vmem %s5345_s20, %s3566_s6 [#allocation3] }
 0x184   : > { %833 = vmatpush1.msra.mxu0 %v5362_v52  ;;  %4022 = vmatpush3.msra.mxu1 %v5412_v1 }
 0x185   : > { %834 = vmatprep.subr.mxu0 %v5367_v54  ;;  %4023 = vmatprep.subr.mxu1 %v7256_v38 }
 0x186   : > { %835 = vmatpush1.msra.mxu0 %v5372_v55  ;;  %4024 = vmatpush3.msra.mxu1 %v5425_v4 }
 0x187   : > { %836 = vmatprep.subr.mxu0 %v5378_v56  ;;  %4025 = vmatprep.subr.mxu1 %v7256_v38 }
 0x188   : > { %837 = vmatpush1.msra.mxu0 %v5382_v57  ;;  %4026 = vmatpush3.msra.mxu1 %v5438_v7 }
 0x189   : > { %838 = vmatprep.subr.mxu0 %v5386_v58  ;;  %4027 = vmatprep.subr.mxu1 %v7256_v38 }
 0x18a   : > { %839 = vmatpush1.msra.mxu0 %v5390_v59  ;;  %4028 = vmatpush3.msra.mxu1 %v5451_v10 }
 0x18b   : > { %840 = vmatprep.subr.mxu0 %v5394_v60  ;;  %4029 = vmatprep.subr.mxu1 %v7256_v38 }
 0x18c   : > { %841 = vmatpush1.msra.mxu0 %v5398_v61  ;;  %4030 = vmatpush3.msra.mxu1 %v5464_v13 }
 0x18d   : > { %842 = vmatprep.subr.mxu0 %v5402_v62  ;;  %4031 = vmatprep.subr.mxu1 %v7256_v38 }
 0x18e   : > { %843 = vmatpush1.msra.mxu0 %v5406_v63  ;;  %4032 = vmatpush3.msra.mxu1 %v5477_v16 }
 0x18f   : > { %844 = vmatprep.subr.mxu0 %v5416_v2  ;;  %4033 = vmatprep.subr.mxu1 %v7256_v38 }
 0x190   : > { %845 = vmatpush1.msra.mxu0 %v5421_v3  ;;  %4034 = vmatpush3.msra.mxu1 %v5490_v19 }
 0x191   : > { %846 = vmatprep.subr.mxu0 %v5429_v5  ;;  %4035 = vmatprep.subr.mxu1 %v7256_v38 }
 0x192   : > { %847 = vmatpush1.msra.mxu0 %v5434_v6  ;;  %4036 = vmatpush3.msra.mxu1 %v5503_v22 }
 0x193   : > { %848 = vmatprep.subr.mxu0 %v5442_v8  ;;  %4037 = vmatprep.subr.mxu1 %v7256_v38 }
 0x194   : > { %849 = vmatpush1.msra.mxu0 %v5447_v9  ;;  %4038 = vmatpush3.msra.mxu1 %v5516_v25 }
 0x195   : > { %850 = vmatprep.subr.mxu0 %v5455_v11  ;;  %4039 = vmatprep.subr.mxu1 %v7256_v38 }
 0x196   : > { %851 = vmatpush1.msra.mxu0 %v5460_v12  ;;  %4040 = vmatpush3.msra.mxu1 %v5529_v28 }
 0x197   : > { %852 = vmatprep.subr.mxu0 %v5468_v14  ;;  %4041 = vmatprep.subr.mxu1 %v7256_v38 }
 0x198   : > { %853 = vmatpush1.msra.mxu0 %v5473_v15  ;;  %4042 = vmatpush3.msra.mxu1 %v5538_v30 }
 0x199   : > { %854 = vmatprep.subr.mxu0 %v5481_v17  ;;  %4043 = vmatprep.subr.mxu1 %v7256_v38 }
 0x19a   : > { %855 = vmatpush1.msra.mxu0 %v5486_v18  ;;  %4044 = vmatpush3.msra.mxu1 %v5545_v31 }
 0x19b   : > { %856 = vmatprep.subr.mxu0 %v5494_v20  ;;  %4045 = vmatprep.subr.mxu1 %v7256_v38 }
 0x19c   : > { %857 = vmatpush1.msra.mxu0 %v5499_v21  ;;  %4046 = vmatpush3.msra.mxu1 %v5551_v32 }
 0x19d   : > { %858 = vmatprep.subr.mxu0 %v5507_v23  ;;  %4047 = vmatprep.subr.mxu1 %v7256_v38 }
 0x19e   : > { %859 = vmatpush1.msra.mxu0 %v5512_v24  ;;  %4048 = vmatpush3.msra.mxu1 %v5558_v33 }
 0x19f   : > { %860 = vmatprep.subr.mxu0 %v7257_v29  ;;  %4049 = vmatprep.subr.mxu1 %v7256_v38 }
 0x1a0   : > { %861 = vmatpush1.msra.mxu0 %v7258_v46  ;;  %894 = vmatprep.mubr.f32.mxu0 %v7256_v38 }
 0x1a1   : > { %4050 = vmatpush3.msra.mxu1 %v7259_v48  ;;  %4051 = vmatprep.mubr.msk.f32.mxu1 %vm5061_vm0, %v7256_v38 }
 0x1a2   : > { %1002 = vmatprep.subr.mxu0 %v7260_v35  ;;  %4054 = vmatprep.subr.mxu1 %v7256_v38 }
 0x241   : > { %v724_v41 = vpop.f32.mrf.mxu0  ;;  %v795_v42 = vpop.f32.mrf.mxu1 }
 0x242   : > { %v725_v43 = vadd.f32 %v724_v41, %v5638_v39  ;;  %v796_v33 = vadd.f32 %v795_v42, %v5644_v40  ;;  %v3559_v42 = vld [vmem:[%s3348_s9 + $0x30] sm:$0xff] }
 0x243   : > { %v4018_v44 = vpop.f32.mrf.mxu1  ;;  %v726_v49 = vpop.f32.mrf.mxu0 }
 0x244   : > { %v799_v45 = vadd.f32 %v3551_v37, %v725_v43  ;;  %v727_v27 = vadd.f32 %v726_v49, %v7261_v53  ;;  %v3553_v44 = vld [vmem:[%s3340_s13 + $0x28] sm:$0xff]  ;;  %s3572_s13 = smul.u32 72, %s5045_s22 }
 0x246   : > { %v3554_v47 = vmul.f32 -1.442695, %v799_v45  ;;  %v806_v34 = vadd.f32 %v3552_v26, %v727_v27  ;;  %s3360_s26 = scalar_lea.vmem %s5347_s19, %s3572_s13 [#allocation4] }
 0x248   : > { %4630 = vpow2.f32 %v3554_v47  ;;  %v3555_v35 = vmul.f32 -1.442695, %v806_v34 }
 0x24a   : > { %4632 = vpow2.f32 %v3555_v35  ;;  %v7266_v35 = vld [vmem:[#allocation17_spill] sm:$0xff] }
 0x255   : > { %v4631_v48 = vpop.eup %4630 }
 0x256   : > { %v803_v46 = vadd.f32 1.0, %v4631_v48 }
 0x257   : > { %v4633_v29 = vpop.eup %4632 }
 0x258   : > { %4634 = vrcp.f32 %v803_v46  ;;  %v810_v45 = vadd.f32 1.0, %v4633_v29  ;;  %v7264_v29 = vld [vmem:[#allocation19_spill] sm:$0xff]  ;;  %v7265_v46 = vld [vmem:[#allocation21_spill] sm:$0xff] }
 0x265   : > { %v4635_v41 = vpop.eup %4634 }
 0x266   : > { %v813_v37 = vmul.f32 %v4635_v41, %v796_v33  ;;  %v7262_v33 = vld [vmem:[#allocation20_spill] sm:$0xff] }
 0x268   : > { %v814_v43 = vadd.f32 %v3553_v44, %v813_v37 }
 0x26a   : > { %4636 = vtanh.f32 %v814_v43 }
 0x26b   : > { %4638 = vrcp.f32 %v810_v45 }
 0x277   : > { %v4637_v47 = vpop.eup %4636 }
 0x278   : > { %v816_v49 = vsub.f32 %v5652_v36, %v4637_v47  ;;  %v4639_v27 = vpop.eup %4638  ;;  %v7263_v36 = vld [vmem:[#allocation18_spill] sm:$0xff] }
 0x27a   : > { %v817_v26 = vmul.f32 %v4639_v27, %v816_v49  ;;  %v3560_v27 = vld [vmem:[%s3348_s9 + $0x38] sm:$0xff] }
 0x27c   : > { %v5732_v48 = vadd.f32 %v4637_v47, %v817_v26 }
 0x27e   : > { %895 = vmatmul.mubr.f32.vlgmr.msra.gmra.mxu0 %v5732_v48  ;;  %4052 = vmatmul.mubr.f32.vlgmr.msra.gmra.mxu1 %v5732_v48  ;;  %3557 = vst [vmem:[%s3344_s5 + $0x8] sm:$0xff] %v5732_v48  ;;  %s3574_s5 = smul.u32 168, %s5045_s22 }
 0x27f   : > { %1003 = vmatpush1.msra.mxu0 %v5355_v50  ;;  %4055 = vmatpush3.msra.mxu1 %v5409_v0 }
 0x280   : > { %1004 = vmatprep.subr.mxu0 %v5358_v51  ;;  %4056 = vmatprep.subr.mxu1 %v7256_v38  ;;  %s3364_s7 = scalar_lea.vmem %s5345_s20, %s3574_s5 [#allocation3] }
 0x281   : > { %1005 = vmatpush1.msra.mxu0 %v5362_v52  ;;  %4057 = vmatpush3.msra.mxu1 %v5412_v1 }
 0x282   : > { %1006 = vmatprep.subr.mxu0 %v5367_v54  ;;  %4058 = vmatprep.subr.mxu1 %v7256_v38 }
 0x283   : > { %1007 = vmatpush1.msra.mxu0 %v5372_v55  ;;  %4059 = vmatpush3.msra.mxu1 %v5425_v4 }
 0x284   : > { %1008 = vmatprep.subr.mxu0 %v5378_v56  ;;  %4060 = vmatprep.subr.mxu1 %v7256_v38 }
 0x285   : > { %1009 = vmatpush1.msra.mxu0 %v5382_v57  ;;  %4061 = vmatpush3.msra.mxu1 %v5438_v7 }
 0x286   : > { %1010 = vmatprep.subr.mxu0 %v5386_v58  ;;  %4062 = vmatprep.subr.mxu1 %v7256_v38 }
 0x287   : > { %1011 = vmatpush1.msra.mxu0 %v5390_v59  ;;  %4063 = vmatpush3.msra.mxu1 %v5451_v10 }
 0x288   : > { %1012 = vmatprep.subr.mxu0 %v5394_v60  ;;  %4064 = vmatprep.subr.mxu1 %v7256_v38 }
 0x289   : > { %1013 = vmatpush1.msra.mxu0 %v5398_v61  ;;  %4065 = vmatpush3.msra.mxu1 %v5464_v13 }
 0x28a   : > { %1014 = vmatprep.subr.mxu0 %v5402_v62  ;;  %4066 = vmatprep.subr.mxu1 %v7256_v38 }
 0x28b   : > { %1015 = vmatpush1.msra.mxu0 %v5406_v63  ;;  %4067 = vmatpush3.msra.mxu1 %v5477_v16 }
 0x28c   : > { %1016 = vmatprep.subr.mxu0 %v5416_v2  ;;  %4068 = vmatprep.subr.mxu1 %v7256_v38 }
 0x28d   : > { %1017 = vmatpush1.msra.mxu0 %v5421_v3  ;;  %4069 = vmatpush3.msra.mxu1 %v5490_v19 }
 0x28e   : > { %1018 = vmatprep.subr.mxu0 %v5429_v5  ;;  %4070 = vmatprep.subr.mxu1 %v7256_v38 }
 0x28f   : > { %1019 = vmatpush1.msra.mxu0 %v5434_v6  ;;  %4071 = vmatpush3.msra.mxu1 %v5503_v22 }
 0x290   : > { %1020 = vmatprep.subr.mxu0 %v5442_v8  ;;  %4072 = vmatprep.subr.mxu1 %v7256_v38 }
 0x291   : > { %1021 = vmatpush1.msra.mxu0 %v5447_v9  ;;  %4073 = vmatpush3.msra.mxu1 %v5516_v25 }
 0x292   : > { %1022 = vmatprep.subr.mxu0 %v5455_v11  ;;  %4074 = vmatprep.subr.mxu1 %v7256_v38 }
 0x293   : > { %1023 = vmatpush1.msra.mxu0 %v5460_v12  ;;  %4075 = vmatpush3.msra.mxu1 %v5529_v28 }
 0x294   : > { %1024 = vmatprep.subr.mxu0 %v5468_v14  ;;  %4076 = vmatprep.subr.mxu1 %v7256_v38 }
 0x295   : > { %1025 = vmatpush1.msra.mxu0 %v5473_v15  ;;  %4077 = vmatpush3.msra.mxu1 %v5538_v30 }
 0x296   : > { %1026 = vmatprep.subr.mxu0 %v5481_v17  ;;  %4078 = vmatprep.subr.mxu1 %v7256_v38 }
 0x297   : > { %1027 = vmatpush1.msra.mxu0 %v5486_v18  ;;  %4079 = vmatpush3.msra.mxu1 %v5545_v31 }
 0x298   : > { %1028 = vmatprep.subr.mxu0 %v5494_v20  ;;  %4080 = vmatprep.subr.mxu1 %v7256_v38 }
 0x299   : > { %1029 = vmatpush1.msra.mxu0 %v5499_v21  ;;  %4081 = vmatpush3.msra.mxu1 %v5551_v32 }
 0x29a   : > { %1030 = vmatprep.subr.mxu0 %v5507_v23  ;;  %4082 = vmatprep.subr.mxu1 %v7256_v38 }
 0x29b   : > { %1031 = vmatpush1.msra.mxu0 %v5512_v24  ;;  %4083 = vmatpush3.msra.mxu1 %v7262_v33 }
 0x29c   : > { %1032 = vmatprep.subr.mxu0 %v7263_v36  ;;  %4084 = vmatprep.subr.mxu1 %v7256_v38 }
 0x29d   : > { %1033 = vmatpush1.msra.mxu0 %v7264_v29  ;;  %1066 = vmatprep.mubr.f32.mxu0 %v7256_v38 }
 0x29e   : > { %4085 = vmatpush3.msra.mxu1 %v7265_v46  ;;  %4086 = vmatprep.mubr.msk.f32.mxu1 %vm5061_vm0, %v7256_v38 }
 0x29f   : > { %1174 = vmatprep.subr.mxu0 %v7266_v35  ;;  %4089 = vmatprep.subr.mxu1 %v7256_v38 }
 0x33e   : > { %v896_v34 = vpop.f32.mrf.mxu0  ;;  %v967_v41 = vpop.f32.mrf.mxu1 }
 0x33f   : > { %v897_v44 = vadd.f32 %v896_v34, %v5638_v39  ;;  %v968_v33 = vadd.f32 %v967_v41, %v5644_v40  ;;  %v5930_v41 = vld [vmem:[%s5338_s10 + $0x148] sm:$0xff] }
 0x340   : > { %v4053_v37 = vpop.f32.mrf.mxu1  ;;  %v898_v47 = vpop.f32.mrf.mxu0 }
 0x341   : > { %v971_v43 = vadd.f32 %v3559_v42, %v897_v44  ;;  %v899_v49 = vadd.f32 %v898_v47, %v7261_v53  ;;  %v3561_v37 = vld [vmem:[%s3348_s9 + $0x40] sm:$0xff]  ;;  %s3580_s9 = smul.u32 56, %s5045_s22 }
 0x343   : > { %v3562_v45 = vmul.f32 -1.442695, %v971_v43  ;;  %v978_v26 = vadd.f32 %v3560_v27, %v899_v49  ;;  %s3368_s0 = scalar_lea.vmem %s5347_s19, %s3580_s9 [#allocation4] }
 0x345   : > { %4640 = vpow2.f32 %v3562_v45  ;;  %v3563_v35 = vmul.f32 -1.442695, %v978_v26  ;;  %v5934_v26 = vld [vmem:[%s5338_s10 + $0x128] sm:$0xff] }
 0x347   : > { %4642 = vpow2.f32 %v3563_v35  ;;  %v5926_v35 = vld [vmem:[%s5338_s10 + $0x138] sm:$0xff] }
 0x352   : > { %v4641_v46 = vpop.eup %4640 }
 0x353   : > { %v975_v29 = vadd.f32 1.0, %v4641_v46 }
 0x354   : > { %v4643_v36 = vpop.eup %4642 }
 0x355   : > { %4644 = vrcp.f32 %v975_v29  ;;  %v982_v43 = vadd.f32 1.0, %v4643_v36  ;;  %v5917_v36 = vld [vmem:[%s5338_s10 + $0x160] sm:$0xff] }
 0x356   : > { %v5921_v29 = vld [vmem:[%s5338_s10 + $0x140] sm:$0xff] }
 0x362   : > { %v4645_v34 = vpop.eup %4644 }
 0x363   : > { %v985_v42 = vmul.f32 %v4645_v34, %v968_v33  ;;  %v5913_v33 = vld [vmem:[%s5338_s10 + $0x150] sm:$0xff]  ;;  %v5939_v34 = vld [vmem:[%s5338_s10 + $0x120] sm:$0xff] }
 0x365   : > { %v986_v44 = vadd.f32 %v3561_v37, %v985_v42  ;;  %v5943_v37 = vld [vmem:[%s5338_s10 + $0x130] sm:$0xff] }
 0x366   : > { %v5947_v42 = vld [vmem:[%s5338_s10 + $0x110] sm:$0xff] }
 0x367   : > { %4646 = vtanh.f32 %v986_v44  ;;  %v5952_v44 = vld [vmem:[%s5338_s10 + $0x108] sm:$0xff] }
 0x368   : > { %4648 = vrcp.f32 %v982_v43  ;;  %v5957_v43 = vld [vmem:[%s5338_s10 + $0xf8] sm:$0xff] }
 0x374   : > { %v4647_v45 = vpop.eup %4646 }
 0x375   : > { %v988_v47 = vsub.f32 %v5732_v48, %v4647_v45  ;;  %v4649_v49 = vpop.eup %4648  ;;  %v5908_v48 = vld [vmem:[%s5338_s10 + $0x158] sm:$0xff] }
 0x377   : > { %v989_v27 = vmul.f32 %v4649_v49, %v988_v47  ;;  %v5967_v47 = vld [vmem:[%s5338_s10 + $0xe0] sm:$0xff]  ;;  %v5977_v49 = vld [vmem:[%s5338_s10 + $0xc8] sm:$0xff] }
 0x379   : > { %v5812_v46 = vadd.f32 %v4647_v45, %v989_v27  ;;  %v5962_v45 = vld [vmem:[%s5338_s10 + $0xf0] sm:$0xff] }
 0x37a   : > { %v5987_v27 = vld [vmem:[%s5338_s10 + $0xb0] sm:$0xff] }
 0x37b   : > { %1067 = vmatmul.mubr.f32.vlgmr.msra.gmra.mxu0 %v5812_v46  ;;  %4087 = vmatmul.mubr.f32.vlgmr.msra.gmra.mxu1 %v5812_v46  ;;  %3565 = vst [vmem:[%s3352_s24 + $0x10] sm:$0xff] %v5812_v46  ;;  %s3372_s24 = scalar_lea.vmem %s5345_s20, %s3549_s29 [#allocation3]  ;;  %s3588_s29 = smul.u32 40, %s5045_s22 }
 0x37c   : > { %1175 = vmatpush1.msra.mxu0 %v5355_v50  ;;  %4090 = vmatpush3.msra.mxu1 %v5409_v0  ;;  %v7267_v50 = vld [vmem:[#allocation20_spill] sm:$0xff] }
 0x37d   : > { %1176 = vmatprep.subr.mxu0 %v5358_v51  ;;  %4091 = vmatprep.subr.mxu1 %v7256_v38  ;;  %v7268_v51 = vld [vmem:[#allocation18_spill] sm:$0xff]  ;;  %s3376_s6 = scalar_lea.vmem %s5347_s19, %s3588_s29 [#allocation4] }
 0x37e   : > { %1177 = vmatpush1.msra.mxu0 %v5362_v52  ;;  %4092 = vmatpush3.msra.mxu1 %v5412_v1  ;;  %v7269_v52 = vld [vmem:[#allocation19_spill] sm:$0xff]  ;;  %v3568_v1 = vld [vmem:[%s3356_s11 + $0x50] sm:$0xff] }
 0x37f   : > { %1178 = vmatprep.subr.mxu0 %v5367_v54  ;;  %4093 = vmatprep.subr.mxu1 %v7256_v38  ;;  %v7270_v54 = vld [vmem:[#allocation21_spill] sm:$0xff] }
 0x380   : > { %1179 = vmatpush1.msra.mxu0 %v5372_v55  ;;  %4094 = vmatpush3.msra.mxu1 %v5425_v4  ;;  %v7271_v55 = vld [vmem:[#allocation17_spill] sm:$0xff] }
 0x381   : > { %1180 = vmatprep.subr.mxu0 %v5378_v56  ;;  %4095 = vmatprep.subr.mxu1 %v7256_v38  ;;  %v3567_v56 = vld [vmem:[%s3356_s11 + $0x48] sm:$0xff] }
 0x382   : > { %1181 = vmatpush1.msra.mxu0 %v5382_v57  ;;  %4096 = vmatpush3.msra.mxu1 %v5438_v7 }
 0x383   : > { %1182 = vmatprep.subr.mxu0 %v5386_v58  ;;  %4097 = vmatprep.subr.mxu1 %v7256_v38 }
 0x384   : > { %1183 = vmatpush1.msra.mxu0 %v5390_v59  ;;  %4098 = vmatpush3.msra.mxu1 %v5451_v10 }
 0x385   : > { %1184 = vmatprep.subr.mxu0 %v5394_v60  ;;  %4099 = vmatprep.subr.mxu1 %v7256_v38 }
 0x386   : > { %1185 = vmatpush1.msra.mxu0 %v5398_v61  ;;  %4100 = vmatpush3.msra.mxu1 %v5464_v13 }
 0x387   : > { %1186 = vmatprep.subr.mxu0 %v5402_v62  ;;  %4101 = vmatprep.subr.mxu1 %v7256_v38 }
 0x388   : > { %1187 = vmatpush1.msra.mxu0 %v5406_v63  ;;  %4102 = vmatpush3.msra.mxu1 %v5477_v16 }
 0x389   : > { %1188 = vmatprep.subr.mxu0 %v5416_v2  ;;  %4103 = vmatprep.subr.mxu1 %v7256_v38 }
 0x38a   : > { %1189 = vmatpush1.msra.mxu0 %v5421_v3  ;;  %4104 = vmatpush3.msra.mxu1 %v5490_v19 }
 0x38b   : > { %1190 = vmatprep.subr.mxu0 %v5429_v5  ;;  %4105 = vmatprep.subr.mxu1 %v7256_v38 }
 0x38c   : > { %1191 = vmatpush1.msra.mxu0 %v5434_v6  ;;  %4106 = vmatpush3.msra.mxu1 %v5503_v22 }
 0x38d   : > { %1192 = vmatprep.subr.mxu0 %v5442_v8  ;;  %4107 = vmatprep.subr.mxu1 %v7256_v38 }
 0x38e   : > { %1193 = vmatpush1.msra.mxu0 %v5447_v9  ;;  %4108 = vmatpush3.msra.mxu1 %v5516_v25  ;;  %v3569_v9 = vld [vmem:[%s3356_s11 + $0x58] sm:$0xff]  ;;  %s3380_s11 = scalar_lea.vmem %s5345_s20, %s3572_s13 [#allocation3]  ;;  %s3596_s13 = smul.u32 24, %s5045_s22 }
 0x38f   : > { %1194 = vmatprep.subr.mxu0 %v5455_v11  ;;  %4109 = vmatprep.subr.mxu1 %v7256_v38 }
 0x390   : > { %1195 = vmatpush1.msra.mxu0 %v5460_v12  ;;  %4110 = vmatpush3.msra.mxu1 %v5529_v28  ;;  %s3387_s5 = scalar_lea.vmem %s5345_s20, %s3596_s13 [#allocation3] }
 0x391   : > { %1196 = vmatprep.subr.mxu0 %v5468_v14  ;;  %4111 = vmatprep.subr.mxu1 %v7256_v38 }
 0x392   : > { %1197 = vmatpush1.msra.mxu0 %v5473_v15  ;;  %4112 = vmatpush3.msra.mxu1 %v5538_v30 }
 0x393   : > { %1198 = vmatprep.subr.mxu0 %v5481_v17  ;;  %4113 = vmatprep.subr.mxu1 %v7256_v38 }
 0x394   : > { %1199 = vmatpush1.msra.mxu0 %v5486_v18  ;;  %4114 = vmatpush3.msra.mxu1 %v5545_v31 }
 0x395   : > { %1200 = vmatprep.subr.mxu0 %v5494_v20  ;;  %4115 = vmatprep.subr.mxu1 %v7256_v38 }
 0x396   : > { %1201 = vmatpush1.msra.mxu0 %v5499_v21  ;;  %4116 = vmatpush3.msra.mxu1 %v5551_v32 }
 0x397   : > { %1202 = vmatprep.subr.mxu0 %v5507_v23  ;;  %4117 = vmatprep.subr.mxu1 %v7256_v38  ;;  %v5900_v23 = vld [vmem:[%s5338_s10 + $0x168] sm:$0xff] }
 0x398   : > { %1203 = vmatpush1.msra.mxu0 %v5512_v24  ;;  %4118 = vmatpush3.msra.mxu1 %v7267_v50  ;;  %v5904_v24 = vld [vmem:[%s5338_s10 + $0x178] sm:$0xff] }
 0x399   : > { %1204 = vmatprep.subr.mxu0 %v7268_v51  ;;  %4119 = vmatprep.subr.mxu1 %v7256_v38  ;;  %v6007_v51 = vld [vmem:[%s5338_s10 + $0x80] sm:$0xff] }
 0x39a   : > { %1205 = vmatpush1.msra.mxu0 %v7269_v52  ;;  %1238 = vmatprep.mubr.f32.mxu0 %v7256_v38  ;;  %v6017_v52 = vld [vmem:[%s5338_s10 + $0x68] sm:$0xff] }
 0x39b   : > { %4120 = vmatpush3.msra.mxu1 %v7270_v54  ;;  %4121 = vmatprep.mubr.msk.f32.mxu1 %vm5061_vm0, %v7256_v38 }
 0x39c   : > { %1346 = vmatprep.subr.mxu0 %v7271_v55  ;;  %4124 = vmatprep.subr.mxu1 %v7256_v38  ;;  %v6027_v55 = vld [vmem:[%s5338_s10 + $0x50] sm:$0xff] }
 0x43b   : > { %v1068_v57 = vpop.f32.mrf.mxu0  ;;  %v1139_v58 = vpop.f32.mrf.mxu1 }
 0x43c   : > { %v1069_v59 = vadd.f32 %v1068_v57, %v5638_v39  ;;  %v1140_v7 = vadd.f32 %v1139_v58, %v5644_v40  ;;  %v6047_v57 = vld [vmem:[%s5338_s10 + $0x20] sm:$0xff]  ;;  %v6057_v58 = vld [vmem:[%s5338_s10 + $0x8] sm:$0xff] }
 0x43d   : > { %v4088_v60 = vpop.f32.mrf.mxu1  ;;  %v1070_v63 = vpop.f32.mrf.mxu0  ;;  %7272 = vst [vmem:[#allocation22_spill] sm:$0xff] %v6057_v58 }
 0x43e   : > { %v1143_v61 = vadd.f32 %v3567_v56, %v1069_v59  ;;  %v1071_v0 = vadd.f32 %v1070_v63, %v7261_v53  ;;  %v6037_v56 = vld [vmem:[%s5338_s10 + $0x38] sm:$0xff]  ;;  %v6070_v59 = vld [vmem:[%s5338_s10 + $0x170] sm:$0xff] }
 0x43f   : > { %7274 = vst [vmem:[#allocation18_spill] sm:$0xff] %v6070_v59 }
 0x440   : > { %v3570_v62 = vmul.f32 -1.442695, %v1143_v61  ;;  %v1150_v2 = vadd.f32 %v3568_v1, %v1071_v0 }
 0x442   : > { %4650 = vpow2.f32 %v3570_v62  ;;  %v3571_v3 = vmul.f32 -1.442695, %v1150_v2 }
 0x444   : > { %4652 = vpow2.f32 %v3571_v3  ;;  %v3576_v3 = vld [vmem:[%s3364_s7 + $0x68] sm:$0xff] }
 0x44f   : > { %v4651_v4 = vpop.eup %4650 }
 0x450   : > { %v1147_v5 = vadd.f32 1.0, %v4651_v4 }
 0x451   : > { %v4653_v6 = vpop.eup %4652 }
 0x452   : > { %4654 = vrcp.f32 %v1147_v5  ;;  %v1154_v14 = vadd.f32 1.0, %v4653_v6 }
 0x45f   : > { %v4655_v8 = vpop.eup %4654 }
 0x460   : > { %v1157_v11 = vmul.f32 %v4655_v8, %v1140_v7 }
 0x462   : > { %v1158_v12 = vadd.f32 %v3569_v9, %v1157_v11 }
 0x464   : > { %4656 = vtanh.f32 %v1158_v12  ;;  %v3577_v12 = vld [vmem:[%s3364_s7 + $0x70] sm:$0xff] }
 0x465   : > { %4658 = vrcp.f32 %v1154_v14 }
 0x471   : > { %v4657_v15 = vpop.eup %4656 }
 0x472   : > { %v1160_v17 = vsub.f32 %v5812_v46, %v4657_v15  ;;  %v4659_v18 = vpop.eup %4658  ;;  %v5997_v46 = vld [vmem:[%s5338_s10 + $0x98] sm:$0xff] }
 0x474   : > { %v1161_v20 = vmul.f32 %v4659_v18, %v1160_v17 }
 0x476   : > { %v5894_v21 = vadd.f32 %v4657_v15, %v1161_v20 }
 0x478   : > { %1239 = vmatmul.mubr.f32.vlgmr.msra.gmra.mxu0 %v5894_v21  ;;  %4122 = vmatmul.mubr.f32.vlgmr.msra.gmra.mxu1 %v5894_v21  ;;  %3573 = vst [vmem:[%s3360_s26 + $0x18] sm:$0xff] %v5894_v21  ;;  %s3384_s26 = scalar_lea.vmem %s5347_s19, %s3596_s13 [#allocation4]  ;;  %s3609_s13 = smul.u32 4294967224, %s5045_s22 }
 0x479   : > { %1347 = vmatpush1.msra.mxu0 %v5900_v23  ;;  %4125 = vmatpush3.msra.mxu1 %v5904_v24 }
 0x47a   : > { %1348 = vmatprep.subr.mxu0 %v5908_v48  ;;  %4126 = vmatprep.subr.mxu1 %v7256_v38 }
 0x47b   : > { %1349 = vmatpush1.msra.mxu0 %v5913_v33  ;;  %4127 = vmatpush3.msra.mxu1 %v5917_v36 }
 0x47c   : > { %1350 = vmatprep.subr.mxu0 %v5921_v29  ;;  %4128 = vmatprep.subr.mxu1 %v7256_v38 }
 0x47d   : > { %1351 = vmatpush1.msra.mxu0 %v5926_v35  ;;  %4129 = vmatpush3.msra.mxu1 %v5930_v41 }
 0x47e   : > { %1352 = vmatprep.subr.mxu0 %v5934_v26  ;;  %4130 = vmatprep.subr.mxu1 %v7256_v38 }
 0x47f   : > { %1353 = vmatpush1.msra.mxu0 %v5939_v34  ;;  %4131 = vmatpush3.msra.mxu1 %v5943_v37 }
 0x480   : > { %1354 = vmatprep.subr.mxu0 %v5947_v42  ;;  %4132 = vmatprep.subr.mxu1 %v7256_v38 }
 0x481   : > { %1355 = vmatpush1.msra.mxu0 %v5952_v44  ;;  %4133 = vmatpush3.msra.mxu1 %v5451_v10  ;;  %v5972_v10 = vld [vmem:[%s5338_s10 + $0xd8] sm:$0xff] }
 0x482   : > { %1356 = vmatprep.subr.mxu0 %v5957_v43  ;;  %4134 = vmatprep.subr.mxu1 %v7256_v38 }
 0x483   : > { %1357 = vmatpush1.msra.mxu0 %v5962_v45  ;;  %4135 = vmatpush3.msra.mxu1 %v5464_v13  ;;  %v5982_v13 = vld [vmem:[%s5338_s10 + $0xc0] sm:$0xff] }
 0x484   : > { %1358 = vmatprep.subr.mxu0 %v5967_v47  ;;  %4136 = vmatprep.subr.mxu1 %v7256_v38 }
 0x485   : > { %1359 = vmatpush1.msra.mxu0 %v5972_v10  ;;  %4137 = vmatpush3.msra.mxu1 %v5477_v16  ;;  %v5992_v16 = vld [vmem:[%s5338_s10 + $0xa8] sm:$0xff] }
 0x486   : > { %1360 = vmatprep.subr.mxu0 %v5977_v49  ;;  %4138 = vmatprep.subr.mxu1 %v7256_v38 }
 0x487   : > { %1361 = vmatpush1.msra.mxu0 %v5982_v13  ;;  %4139 = vmatpush3.msra.mxu1 %v5490_v19  ;;  %v6002_v19 = vld [vmem:[%s5338_s10 + $0x90] sm:$0xff] }
 0x488   : > { %1362 = vmatprep.subr.mxu0 %v5987_v27  ;;  %4140 = vmatprep.subr.mxu1 %v7256_v38 }
 0x489   : > { %1363 = vmatpush1.msra.mxu0 %v5992_v16  ;;  %4141 = vmatpush3.msra.mxu1 %v5503_v22  ;;  %v6012_v22 = vld [vmem:[%s5338_s10 + $0x78] sm:$0xff] }
 0x48a   : > { %1364 = vmatprep.subr.mxu0 %v5997_v46  ;;  %4142 = vmatprep.subr.mxu1 %v7256_v38 }
 0x48b   : > { %1365 = vmatpush1.msra.mxu0 %v6002_v19  ;;  %4143 = vmatpush3.msra.mxu1 %v5516_v25  ;;  %v6022_v25 = vld [vmem:[%s5338_s10 + $0x60] sm:$0xff] }
 0x48c   : > { %1366 = vmatprep.subr.mxu0 %v6007_v51  ;;  %4144 = vmatprep.subr.mxu1 %v7256_v38 }
 0x48d   : > { %1367 = vmatpush1.msra.mxu0 %v6012_v22  ;;  %4145 = vmatpush3.msra.mxu1 %v5529_v28  ;;  %v6032_v28 = vld [vmem:[%s5338_s10 + $0x48] sm:$0xff] }
 0x48e   : > { %1368 = vmatprep.subr.mxu0 %v6017_v52  ;;  %4146 = vmatprep.subr.mxu1 %v7256_v38 }
 0x48f   : > { %1369 = vmatpush1.msra.mxu0 %v6022_v25  ;;  %4147 = vmatpush3.msra.mxu1 %v5538_v30  ;;  %v6042_v30 = vld [vmem:[%s5338_s10 + $0x30] sm:$0xff] }
 0x490   : > { %1370 = vmatprep.subr.mxu0 %v6027_v55  ;;  %4148 = vmatprep.subr.mxu1 %v7256_v38 }
 0x491   : > { %1371 = vmatpush1.msra.mxu0 %v6032_v28  ;;  %4149 = vmatpush3.msra.mxu1 %v5545_v31  ;;  %v6052_v31 = vld [vmem:[%s5338_s10 + $0x18] sm:$0xff] }
 0x492   : > { %1372 = vmatprep.subr.mxu0 %v6037_v56  ;;  %4150 = vmatprep.subr.mxu1 %v7256_v38 }
 0x493   : > { %1373 = vmatpush1.msra.mxu0 %v6042_v30  ;;  %4151 = vmatpush3.msra.mxu1 %v5551_v32  ;;  %v6062_v32 = vld [vmem:[%s5338_s10] sm:$0xff] }
 0x494   : > { %1374 = vmatprep.subr.mxu0 %v6047_v57  ;;  %4152 = vmatprep.subr.mxu1 %v7256_v38  ;;  %7273 = vst [vmem:[#allocation20_spill] sm:$0xff] %v6062_v32 }
 0x495   : > { %1375 = vmatpush1.msra.mxu0 %v6052_v31  ;;  %4153 = vmatpush3.msra.mxu1 %v7267_v50  ;;  %v3575_v50 = vld [vmem:[%s3364_s7 + $0x60] sm:$0xff]  ;;  %s3603_s7 = sshll.u32 %s5045_s22, 3 }
 0x496   : > { %1376 = vmatprep.subr.mxu0 %v6057_v58  ;;  %4154 = vmatprep.subr.mxu1 %v7256_v38  ;;  %s3390_s9 = scalar_lea.vmem %s5347_s19, %s3603_s7 [#allocation4] }
 0x497   : > { %1377 = vmatpush1.msra.mxu0 %v6062_v32  ;;  %1410 = vmatprep.mubr.f32.mxu0 %v7256_v38 }
 0x498   : > { %4155 = vmatpush3.msra.mxu1 %v7270_v54  ;;  %4156 = vmatprep.mubr.msk.f32.mxu1 %vm5061_vm0, %v7256_v38 }
 0x499   : > { %1518 = vmatprep.subr.mxu0 %v6070_v59  ;;  %4159 = vmatprep.subr.mxu1 %v7256_v38 }
 0x538   : > { %v1240_v60 = vpop.f32.mrf.mxu0  ;;  %v1311_v61 = vpop.f32.mrf.mxu1 }
 0x539   : > { %v1241_v62 = vadd.f32 %v1240_v60, %v5638_v39  ;;  %v1312_v9 = vadd.f32 %v1311_v61, %v5644_v40  ;;  %v6112_v61 = vld [vmem:[%s5338_s10 + $0x100] sm:$0xff] }
 0x53a   : > { %v4123_v63 = vpop.f32.mrf.mxu1  ;;  %v1242_v54 = vpop.f32.mrf.mxu0 }
 0x53b   : > { %v1315_v0 = vadd.f32 %v3575_v50, %v1241_v62  ;;  %v1243_v2 = vadd.f32 %v1242_v54, %v7261_v53  ;;  %v6119_v63 = vld [vmem:[%s5338_s10 + $0xe8] sm:$0xff]  ;;  %v6140_v54 = vld [vmem:[%s5338_s10 + $0xa0] sm:$0xff] }
 0x53d   : > { %v3578_v1 = vmul.f32 -1.442695, %v1315_v0  ;;  %v1322_v4 = vadd.f32 %v3576_v3, %v1243_v2  ;;  %v6126_v0 = vld [vmem:[%s5338_s10 + $0xd0] sm:$0xff]  ;;  %v6147_v2 = vld [vmem:[%s5338_s10 + $0x88] sm:$0xff] }
 0x53e   : > { %v6154_v3 = vld [vmem:[%s5338_s10 + $0x70] sm:$0xff] }
 0x53f   : > { %4660 = vpow2.f32 %v3578_v1  ;;  %v3579_v5 = vmul.f32 -1.442695, %v1322_v4  ;;  %v6133_v1 = vld [vmem:[%s5338_s10 + $0xb8] sm:$0xff] }
 0x540   : > { %v6161_v4 = vld [vmem:[%s5338_s10 + $0x58] sm:$0xff] }
 0x541   : > { %4662 = vpow2.f32 %v3579_v5  ;;  %v6168_v5 = vld [vmem:[%s5338_s10 + $0x40] sm:$0xff] }
 0x54c   : > { %v4661_v6 = vpop.eup %4660 }
 0x54d   : > { %v1319_v7 = vadd.f32 1.0, %v4661_v6  ;;  %v6175_v6 = vld [vmem:[%s5338_s10 + $0x28] sm:$0xff] }
 0x54e   : > { %v4663_v8 = vpop.eup %4662  ;;  %7275 = vst [vmem:[#allocation19_spill] sm:$0xff] %v6175_v6 }
 0x54f   : > { %4664 = vrcp.f32 %v1319_v7  ;;  %v1326_v17 = vadd.f32 1.0, %v4663_v8  ;;  %v6183_v7 = vld [vmem:[%s5338_s10 + $0x10] sm:$0xff]  ;;  %v3583_v8 = vld [vmem:[%s3372_s24 + $0x78] sm:$0xff] }
 0x550   : > { %7276 = vst [vmem:[#allocation21_spill] sm:$0xff] %v6183_v7 }
 0x55c   : > { %v4665_v11 = vpop.eup %4664 }
 0x55d   : > { %v1329_v14 = vmul.f32 %v4665_v11, %v1312_v9 }
 0x55f   : > { %v1330_v15 = vadd.f32 %v3577_v12, %v1329_v14 }
 0x561   : > { %4666 = vtanh.f32 %v1330_v15 }
 0x562   : > { %4668 = vrcp.f32 %v1326_v17 }
 0x56e   : > { %v4667_v18 = vpop.eup %4666 }
 0x56f   : > { %v1332_v20 = vsub.f32 %v5894_v21, %v4667_v18  ;;  %v4669_v50 = vpop.eup %4668  ;;  %v6105_v21 = vld [vmem:[%s5338_s10 + $0x118] sm:$0xff] }
 0x571   : > { %v1333_v60 = vmul.f32 %v4669_v50, %v1332_v20  ;;  %v3584_v50 = vld [vmem:[%s3372_s24 + $0x80] sm:$0xff] }
 0x573   : > { %v6082_v62 = vadd.f32 %v4667_v18, %v1333_v60 }
 0x575   : > { %1411 = vmatmul.mubr.f32.vlgmr.msra.gmra.mxu0 %v6082_v62  ;;  %4157 = vmatmul.mubr.f32.vlgmr.msra.gmra.mxu1 %v6082_v62  ;;  %3581 = vst [vmem:[%s3368_s0 + $0x20] sm:$0xff] %v6082_v62  ;;  %s1853_s0 = ssub.s32 8, %s5045_s22 }
 0x576   : > { %1519 = vmatpush1.msra.mxu0 %v5900_v23  ;;  %4160 = vmatpush3.msra.mxu1 %v5904_v24 }
 0x577   : > { %1520 = vmatprep.subr.mxu0 %v5908_v48  ;;  %4161 = vmatprep.subr.mxu1 %v7256_v38 }
 0x578   : > { %1521 = vmatpush1.msra.mxu0 %v5913_v33  ;;  %4162 = vmatpush3.msra.mxu1 %v5917_v36 }
 0x579   : > { %1522 = vmatprep.subr.mxu0 %v5921_v29  ;;  %4163 = vmatprep.subr.mxu1 %v7256_v38 }
 0x57a   : > { %1523 = vmatpush1.msra.mxu0 %v5926_v35  ;;  %4164 = vmatpush3.msra.mxu1 %v5930_v41 }
 0x57b   : > { %1524 = vmatprep.subr.mxu0 %v5934_v26  ;;  %4165 = vmatprep.subr.mxu1 %v7256_v38 }
 0x57c   : > { %1525 = vmatpush1.msra.mxu0 %v5939_v34  ;;  %4166 = vmatpush3.msra.mxu1 %v5943_v37 }
 0x57d   : > { %1526 = vmatprep.subr.mxu0 %v5947_v42  ;;  %4167 = vmatprep.subr.mxu1 %v7256_v38 }
 0x57e   : > { %1527 = vmatpush1.msra.mxu0 %v5952_v44  ;;  %4168 = vmatpush3.msra.mxu1 %v6105_v21 }
 0x57f   : > { %1528 = vmatprep.subr.mxu0 %v5957_v43  ;;  %4169 = vmatprep.subr.mxu1 %v7256_v38 }
 0x580   : > { %1529 = vmatpush1.msra.mxu0 %v5962_v45  ;;  %4170 = vmatpush3.msra.mxu1 %v6112_v61 }
 0x581   : > { %1530 = vmatprep.subr.mxu0 %v5967_v47  ;;  %4171 = vmatprep.subr.mxu1 %v7256_v38 }
 0x582   : > { %1531 = vmatpush1.msra.mxu0 %v5972_v10  ;;  %4172 = vmatpush3.msra.mxu1 %v6119_v63 }
 0x583   : > { %1532 = vmatprep.subr.mxu0 %v5977_v49  ;;  %4173 = vmatprep.subr.mxu1 %v7256_v38 }
 0x584   : > { %1533 = vmatpush1.msra.mxu0 %v5982_v13  ;;  %4174 = vmatpush3.msra.mxu1 %v6126_v0 }
 0x585   : > { %1534 = vmatprep.subr.mxu0 %v5987_v27  ;;  %4175 = vmatprep.subr.mxu1 %v7256_v38 }
 0x586   : > { %1535 = vmatpush1.msra.mxu0 %v5992_v16  ;;  %4176 = vmatpush3.msra.mxu1 %v6133_v1 }
 0x587   : > { %1536 = vmatprep.subr.mxu0 %v5997_v46  ;;  %4177 = vmatprep.subr.mxu1 %v7256_v38 }
 0x588   : > { %1537 = vmatpush1.msra.mxu0 %v6002_v19  ;;  %4178 = vmatpush3.msra.mxu1 %v6140_v54 }
 0x589   : > { %1538 = vmatprep.subr.mxu0 %v6007_v51  ;;  %4179 = vmatprep.subr.mxu1 %v7256_v38 }
 0x58a   : > { %1539 = vmatpush1.msra.mxu0 %v6012_v22  ;;  %4180 = vmatpush3.msra.mxu1 %v6147_v2 }
 0x58b   : > { %1540 = vmatprep.subr.mxu0 %v6017_v52  ;;  %4181 = vmatprep.subr.mxu1 %v7256_v38 }
 0x58c   : > { %1541 = vmatpush1.msra.mxu0 %v6022_v25  ;;  %4182 = vmatpush3.msra.mxu1 %v6154_v3 }
 0x58d   : > { %1542 = vmatprep.subr.mxu0 %v6027_v55  ;;  %4183 = vmatprep.subr.mxu1 %v7256_v38 }
 0x58e   : > { %1543 = vmatpush1.msra.mxu0 %v6032_v28  ;;  %4184 = vmatpush3.msra.mxu1 %v6161_v4 }
 0x58f   : > { %1544 = vmatprep.subr.mxu0 %v6037_v56  ;;  %4185 = vmatprep.subr.mxu1 %v7256_v38 }
 0x590   : > { %1545 = vmatpush1.msra.mxu0 %v6042_v30  ;;  %4186 = vmatpush3.msra.mxu1 %v6168_v5 }
 0x591   : > { %1546 = vmatprep.subr.mxu0 %v6047_v57  ;;  %4187 = vmatprep.subr.mxu1 %v7256_v38 }
 0x592   : > { %1547 = vmatpush1.msra.mxu0 %v6052_v31  ;;  %4188 = vmatpush3.msra.mxu1 %v6175_v6 }
 0x593   : > { %1548 = vmatprep.subr.mxu0 %v6057_v58  ;;  %4189 = vmatprep.subr.mxu1 %v7256_v38 }
 0x594   : > { %1549 = vmatpush1.msra.mxu0 %v6062_v32  ;;  %1582 = vmatprep.mubr.f32.mxu0 %v7256_v38 }
 0x595   : > { %4190 = vmatpush3.msra.mxu1 %v6183_v7  ;;  %4191 = vmatprep.mubr.msk.f32.mxu1 %vm5061_vm0, %v7256_v38 }
 0x596   : > { %1689 = vmatprep.subr.mxu0 %v6070_v59  ;;  %4194 = vmatprep.subr.mxu1 %v7256_v38 }
 0x635   : > { %v1412_v9 = vpop.f32.mrf.mxu0  ;;  %v1483_v11 = vpop.f32.mrf.mxu1 }
 0x636   : > { %v1413_v12 = vadd.f32 %v1412_v9, %v5638_v39  ;;  %v1484_v6 = vadd.f32 %v1483_v11, %v5644_v40  ;;  %v3591_v11 = vld [vmem:[%s3380_s11 + $0x90] sm:$0xff] }
 0x637   : > { %v4158_v14 = vpop.f32.mrf.mxu1  ;;  %v1414_v18 = vpop.f32.mrf.mxu0 }
 0x638   : > { %v1487_v15 = vadd.f32 %v3583_v8, %v1413_v12  ;;  %v1415_v20 = vadd.f32 %v1414_v18, %v7261_v53  ;;  %v3585_v14 = vld [vmem:[%s3372_s24 + $0x88] sm:$0xff]  ;;  %s3675_s24 = smul.u32 24, %s1853_s0 }
 0x63a   : > { %v3586_v17 = vmul.f32 -1.442695, %v1487_v15  ;;  %v1494_v60 = vadd.f32 %v3584_v50, %v1415_v20  ;;  %s1856_s29 = scalar_lea.vmem %s5345_s20, %s3675_s24 [#allocation3]  ;;  %s3623_s24 = smul.u32 4294967256, %s5045_s22 }
 0x63c   : > { %4670 = vpow2.f32 %v3586_v17  ;;  %v3587_v59 = vmul.f32 -1.442695, %v1494_v60 }
 0x63e   : > { %4672 = vpow2.f32 %v3587_v59 }
 0x649   : > { %v4671_v7 = vpop.eup %4670 }
 0x64a   : > { %v1491_v32 = vadd.f32 1.0, %v4671_v7  ;;  %v7281_v7 = vld [vmem:[#allocation18_spill] sm:$0xff] }
 0x64b   : > { %v4673_v58 = vpop.eup %4672 }
 0x64c   : > { %4674 = vrcp.f32 %v1491_v32  ;;  %v1498_v15 = vadd.f32 1.0, %v4673_v58  ;;  %v7277_v58 = vld [vmem:[#allocation19_spill] sm:$0xff]  ;;  %v7278_v32 = vld [vmem:[#allocation22_spill] sm:$0xff] }
 0x659   : > { %v4675_v9 = vpop.eup %4674 }
 0x65a   : > { %v1501_v8 = vmul.f32 %v4675_v9, %v1484_v6  ;;  %v7280_v6 = vld [vmem:[#allocation21_spill] sm:$0xff] }
 0x65c   : > { %v1502_v12 = vadd.f32 %v3585_v14, %v1501_v8 }
 0x65e   : > { %4676 = vtanh.f32 %v1502_v12 }
 0x65f   : > { %4678 = vrcp.f32 %v1498_v15 }
 0x66b   : > { %v4677_v17 = vpop.eup %4676 }
 0x66c   : > { %v1504_v18 = vsub.f32 %v6082_v62, %v4677_v17  ;;  %v4679_v20 = vpop.eup %4678  ;;  %v7279_v62 = vld [vmem:[#allocation20_spill] sm:$0xff] }
 0x66e   : > { %v1505_v50 = vmul.f32 %v4679_v20, %v1504_v18  ;;  %v3592_v20 = vld [vmem:[%s3380_s11 + $0x98] sm:$0xff] }
 0x670   : > { %v6199_v59 = vadd.f32 %v4677_v17, %v1505_v50 }
 0x672   : > { %1583 = vmatmul.mubr.f32.vlgmr.msra.gmra.mxu0 %v6199_v59  ;;  %4192 = vmatmul.mubr.f32.vlgmr.msra.gmra.mxu1 %v6199_v59  ;;  %3589 = vst [vmem:[%s3376_s6 + $0x28] sm:$0xff] %v6199_v59  ;;  %s3608_s6 = sshll.u32 %s1853_s0, 3 }
 0x673   : > { %1690 = vmatpush1.msra.mxu0 %v5900_v23  ;;  %4195 = vmatpush3.msra.mxu1 %v5904_v24 }
 0x674   : > { %1691 = vmatprep.subr.mxu0 %v5908_v48  ;;  %4196 = vmatprep.subr.mxu1 %v7256_v38 }
 0x675   : > { %1692 = vmatpush1.msra.mxu0 %v5913_v33  ;;  %4197 = vmatpush3.msra.mxu1 %v5917_v36 }
 0x676   : > { %1693 = vmatprep.subr.mxu0 %v5921_v29  ;;  %4198 = vmatprep.subr.mxu1 %v7256_v38 }
 0x677   : > { %1694 = vmatpush1.msra.mxu0 %v5926_v35  ;;  %4199 = vmatpush3.msra.mxu1 %v5930_v41 }
 0x678   : > { %1695 = vmatprep.subr.mxu0 %v5934_v26  ;;  %4200 = vmatprep.subr.mxu1 %v7256_v38 }
 0x679   : > { %1696 = vmatpush1.msra.mxu0 %v5939_v34  ;;  %4201 = vmatpush3.msra.mxu1 %v5943_v37 }
 0x67a   : > { %1697 = vmatprep.subr.mxu0 %v5947_v42  ;;  %4202 = vmatprep.subr.mxu1 %v7256_v38 }
 0x67b   : > { %1698 = vmatpush1.msra.mxu0 %v5952_v44  ;;  %4203 = vmatpush3.msra.mxu1 %v6105_v21 }
 0x67c   : > { %1699 = vmatprep.subr.mxu0 %v5957_v43  ;;  %4204 = vmatprep.subr.mxu1 %v7256_v38 }
 0x67d   : > { %1700 = vmatpush1.msra.mxu0 %v5962_v45  ;;  %4205 = vmatpush3.msra.mxu1 %v6112_v61 }
 0x67e   : > { %1701 = vmatprep.subr.mxu0 %v5967_v47  ;;  %4206 = vmatprep.subr.mxu1 %v7256_v38 }
 0x67f   : > { %1702 = vmatpush1.msra.mxu0 %v5972_v10  ;;  %4207 = vmatpush3.msra.mxu1 %v6119_v63 }
 0x680   : > { %1703 = vmatprep.subr.mxu0 %v5977_v49  ;;  %4208 = vmatprep.subr.mxu1 %v7256_v38 }
 0x681   : > { %1704 = vmatpush1.msra.mxu0 %v5982_v13  ;;  %4209 = vmatpush3.msra.mxu1 %v6126_v0 }
 0x682   : > { %1705 = vmatprep.subr.mxu0 %v5987_v27  ;;  %4210 = vmatprep.subr.mxu1 %v7256_v38 }
 0x683   : > { %1706 = vmatpush1.msra.mxu0 %v5992_v16  ;;  %4211 = vmatpush3.msra.mxu1 %v6133_v1 }
 0x684   : > { %1707 = vmatprep.subr.mxu0 %v5997_v46  ;;  %4212 = vmatprep.subr.mxu1 %v7256_v38 }
 0x685   : > { %1708 = vmatpush1.msra.mxu0 %v6002_v19  ;;  %4213 = vmatpush3.msra.mxu1 %v6140_v54 }
 0x686   : > { %1709 = vmatprep.subr.mxu0 %v6007_v51  ;;  %4214 = vmatprep.subr.mxu1 %v7256_v38 }
 0x687   : > { %1710 = vmatpush1.msra.mxu0 %v6012_v22  ;;  %4215 = vmatpush3.msra.mxu1 %v6147_v2 }
 0x688   : > { %1711 = vmatprep.subr.mxu0 %v6017_v52  ;;  %4216 = vmatprep.subr.mxu1 %v7256_v38 }
 0x689   : > { %1712 = vmatpush1.msra.mxu0 %v6022_v25  ;;  %4217 = vmatpush3.msra.mxu1 %v6154_v3 }
 0x68a   : > { %1713 = vmatprep.subr.mxu0 %v6027_v55  ;;  %4218 = vmatprep.subr.mxu1 %v7256_v38 }
 0x68b   : > { %1714 = vmatpush1.msra.mxu0 %v6032_v28  ;;  %4219 = vmatpush3.msra.mxu1 %v6161_v4 }
 0x68c   : > { %1715 = vmatprep.subr.mxu0 %v6037_v56  ;;  %4220 = vmatprep.subr.mxu1 %v7256_v38 }
 0x68d   : > { %1716 = vmatpush1.msra.mxu0 %v6042_v30  ;;  %4221 = vmatpush3.msra.mxu1 %v6168_v5 }
 0x68e   : > { %1717 = vmatprep.subr.mxu0 %v6047_v57  ;;  %4222 = vmatprep.subr.mxu1 %v7256_v38 }
 0x68f   : > { %1718 = vmatpush1.msra.mxu0 %v6052_v31  ;;  %4223 = vmatpush3.msra.mxu1 %v7277_v58 }
 0x690   : > { %1719 = vmatprep.subr.mxu0 %v7278_v32  ;;  %4224 = vmatprep.subr.mxu1 %v7256_v38 }
 0x691   : > { %1720 = vmatpush1.msra.mxu0 %v7279_v62  ;;  %1753 = vmatprep.mubr.f32.mxu0 %v7256_v38 }
 0x692   : > { %4225 = vmatpush3.msra.mxu1 %v7280_v6  ;;  %4226 = vmatprep.mubr.msk.f32.mxu1 %vm5061_vm0, %v7256_v38 }
 0x693   : > { %1860 = vmatprep.subr.mxu0 %v7281_v7  ;;  %4229 = vmatprep.subr.mxu1 %v7256_v38 }
 0x732   : > { %v1584_v60 = vpop.f32.mrf.mxu0  ;;  %v1655_v9 = vpop.f32.mrf.mxu1 }
 0x733   : > { %v1585_v14 = vadd.f32 %v1584_v60, %v5638_v39  ;;  %v1656_v60 = vadd.f32 %v1655_v9, %v5644_v40  ;;  %v7285_v9 = vld [vmem:[#allocation18_spill] sm:$0xff] }
 0x734   : > { %v4193_v8 = vpop.f32.mrf.mxu1  ;;  %v1586_v17 = vpop.f32.mrf.mxu0 }
 0x735   : > { %v1659_v12 = vadd.f32 %v3591_v11, %v1585_v14  ;;  %v1587_v18 = vadd.f32 %v1586_v17, %v7261_v53  ;;  %v3593_v11 = vld [vmem:[%s3380_s11 + $0xa0] sm:$0xff]  ;;  %s2022_s11 = scalar_lea.vmem %s5347_s19, %s3608_s6 [#allocation4]  ;;  %s3625_s6 = smul.u32 4294967128, %s5045_s22 }
 0x737   : > { %v3594_v15 = vmul.f32 -1.442695, %v1659_v12  ;;  %v1666_v50 = vadd.f32 %v3592_v20, %v1587_v18 }
 0x739   : > { %4680 = vpow2.f32 %v3594_v15  ;;  %v3595_v7 = vmul.f32 -1.442695, %v1666_v50  ;;  %v3598_v50 = vld [vmem:[%s3387_s5 + $0xa8] sm:$0xff] }
 0x73b   : > { %4682 = vpow2.f32 %v3595_v7 }
 0x746   : > { %v4681_v6 = vpop.eup %4680 }
 0x747   : > { %v1663_v62 = vadd.f32 1.0, %v4681_v6 }
 0x748   : > { %v4683_v32 = vpop.eup %4682 }
 0x749   : > { %4684 = vrcp.f32 %v1663_v62  ;;  %v1670_v15 = vadd.f32 1.0, %v4683_v32  ;;  %v7283_v32 = vld [vmem:[#allocation20_spill] sm:$0xff]  ;;  %v7284_v62 = vld [vmem:[#allocation21_spill] sm:$0xff] }
 0x756   : > { %v4685_v8 = vpop.eup %4684 }
 0x757   : > { %v1673_v14 = vmul.f32 %v4685_v8, %v1656_v60 }
 0x759   : > { %v1674_v12 = vadd.f32 %v3593_v11, %v1673_v14 }
 0x75b   : > { %4686 = vtanh.f32 %v1674_v12 }
 0x75c   : > { %4688 = vrcp.f32 %v1670_v15 }
 0x768   : > { %v4687_v17 = vpop.eup %4686 }
 0x769   : > { %v1676_v18 = vsub.f32 %v6199_v59, %v4687_v17  ;;  %v4689_v20 = vpop.eup %4688  ;;  %v7282_v59 = vld [vmem:[#allocation22_spill] sm:$0xff] }
 0x76b   : > { %v1677_v6 = vmul.f32 %v4689_v20, %v1676_v18  ;;  %v3599_v20 = vld [vmem:[%s3387_s5 + $0xb0] sm:$0xff] }
 0x76d   : > { %v6282_v7 = vadd.f32 %v4687_v17, %v1677_v6 }
 0x76f   : > { %1754 = vmatmul.mubr.f32.vlgmr.msra.gmra.mxu0 %v6282_v7  ;;  %4227 = vmatmul.mubr.f32.vlgmr.msra.gmra.mxu1 %v6282_v7  ;;  %3597 = vst [vmem:[%s3384_s26 + $0x30] sm:$0xff] %v6282_v7  ;;  %s3398_s26 = scalar_lea.vmem %s5345_s20, %s3609_s13 [#allocation3] }
 0x770   : > { %1861 = vmatpush1.msra.mxu0 %v5900_v23  ;;  %4230 = vmatpush3.msra.mxu1 %v5904_v24 }
 0x771   : > { %1862 = vmatprep.subr.mxu0 %v5908_v48  ;;  %4231 = vmatprep.subr.mxu1 %v7256_v38 }
 0x772   : > { %1863 = vmatpush1.msra.mxu0 %v5913_v33  ;;  %4232 = vmatpush3.msra.mxu1 %v5917_v36 }
 0x773   : > { %1864 = vmatprep.subr.mxu0 %v5921_v29  ;;  %4233 = vmatprep.subr.mxu1 %v7256_v38 }
 0x774   : > { %1865 = vmatpush1.msra.mxu0 %v5926_v35  ;;  %4234 = vmatpush3.msra.mxu1 %v5930_v41 }
 0x775   : > { %1866 = vmatprep.subr.mxu0 %v5934_v26  ;;  %4235 = vmatprep.subr.mxu1 %v7256_v38 }
 0x776   : > { %1867 = vmatpush1.msra.mxu0 %v5939_v34  ;;  %4236 = vmatpush3.msra.mxu1 %v5943_v37 }
 0x777   : > { %1868 = vmatprep.subr.mxu0 %v5947_v42  ;;  %4237 = vmatprep.subr.mxu1 %v7256_v38 }
 0x778   : > { %1869 = vmatpush1.msra.mxu0 %v5952_v44  ;;  %4238 = vmatpush3.msra.mxu1 %v6105_v21 }
 0x779   : > { %1870 = vmatprep.subr.mxu0 %v5957_v43  ;;  %4239 = vmatprep.subr.mxu1 %v7256_v38 }
 0x77a   : > { %1871 = vmatpush1.msra.mxu0 %v5962_v45  ;;  %4240 = vmatpush3.msra.mxu1 %v6112_v61 }
 0x77b   : > { %1872 = vmatprep.subr.mxu0 %v5967_v47  ;;  %4241 = vmatprep.subr.mxu1 %v7256_v38 }
 0x77c   : > { %1873 = vmatpush1.msra.mxu0 %v5972_v10  ;;  %4242 = vmatpush3.msra.mxu1 %v6119_v63 }
 0x77d   : > { %1874 = vmatprep.subr.mxu0 %v5977_v49  ;;  %4243 = vmatprep.subr.mxu1 %v7256_v38 }
 0x77e   : > { %1875 = vmatpush1.msra.mxu0 %v5982_v13  ;;  %4244 = vmatpush3.msra.mxu1 %v6126_v0 }
 0x77f   : > { %1876 = vmatprep.subr.mxu0 %v5987_v27  ;;  %4245 = vmatprep.subr.mxu1 %v7256_v38 }
 0x780   : > { %1877 = vmatpush1.msra.mxu0 %v5992_v16  ;;  %4246 = vmatpush3.msra.mxu1 %v6133_v1 }
 0x781   : > { %1878 = vmatprep.subr.mxu0 %v5997_v46  ;;  %4247 = vmatprep.subr.mxu1 %v7256_v38 }
 0x782   : > { %1879 = vmatpush1.msra.mxu0 %v6002_v19  ;;  %4248 = vmatpush3.msra.mxu1 %v6140_v54 }
 0x783   : > { %1880 = vmatprep.subr.mxu0 %v6007_v51  ;;  %4249 = vmatprep.subr.mxu1 %v7256_v38 }
 0x784   : > { %1881 = vmatpush1.msra.mxu0 %v6012_v22  ;;  %4250 = vmatpush3.msra.mxu1 %v6147_v2 }
 0x785   : > { %1882 = vmatprep.subr.mxu0 %v6017_v52  ;;  %4251 = vmatprep.subr.mxu1 %v7256_v38 }
 0x786   : > { %1883 = vmatpush1.msra.mxu0 %v6022_v25  ;;  %4252 = vmatpush3.msra.mxu1 %v6154_v3 }
 0x787   : > { %1884 = vmatprep.subr.mxu0 %v6027_v55  ;;  %4253 = vmatprep.subr.mxu1 %v7256_v38 }
 0x788   : > { %1885 = vmatpush1.msra.mxu0 %v6032_v28  ;;  %4254 = vmatpush3.msra.mxu1 %v6161_v4 }
 0x789   : > { %1886 = vmatprep.subr.mxu0 %v6037_v56  ;;  %4255 = vmatprep.subr.mxu1 %v7256_v38 }
 0x78a   : > { %1887 = vmatpush1.msra.mxu0 %v6042_v30  ;;  %4256 = vmatpush3.msra.mxu1 %v6168_v5 }
 0x78b   : > { %1888 = vmatprep.subr.mxu0 %v6047_v57  ;;  %4257 = vmatprep.subr.mxu1 %v7256_v38 }
 0x78c   : > { %1889 = vmatpush1.msra.mxu0 %v6052_v31  ;;  %4258 = vmatpush3.msra.mxu1 %v7277_v58 }
 0x78d   : > { %1890 = vmatprep.subr.mxu0 %v7282_v59  ;;  %4259 = vmatprep.subr.mxu1 %v7256_v38 }
 0x78e   : > { %1891 = vmatpush1.msra.mxu0 %v7283_v32  ;;  %1924 = vmatprep.mubr.f32.mxu0 %v7256_v38 }
 0x78f   : > { %4260 = vmatpush3.msra.mxu1 %v7284_v62  ;;  %4261 = vmatprep.mubr.msk.f32.mxu1 %vm5061_vm0, %v7256_v38 }
 0x790   : > { %2032 = vmatprep.subr.mxu0 %v7285_v9  ;;  %4264 = vmatprep.subr.mxu1 %v7256_v38 }
 0x82f   : > { %v1755_v60 = vpop.f32.mrf.mxu0  ;;  %v1826_v8 = vpop.f32.mrf.mxu1 }
 0x830   : > { %v1756_v11 = vadd.f32 %v1755_v60, %v5638_v39  ;;  %v1827_v58 = vadd.f32 %v1826_v8, %v5644_v40  ;;  %v6478_v8 = vld [vmem:[%s5338_s10 + $0x148] sm:$0xff] }
 0x831   : > { %v4228_v14 = vpop.f32.mrf.mxu1  ;;  %v1757_v17 = vpop.f32.mrf.mxu0 }
 0x832   : > { %v1830_v12 = vadd.f32 %v3598_v50, %v1756_v11  ;;  %v1758_v18 = vadd.f32 %v1757_v17, %v7261_v53  ;;  %v3600_v14 = vld [vmem:[%s3387_s5 + $0xb8] sm:$0xff]  ;;  %s3615_s5 = smul.u32 4294967272, %s5045_s22 }
 0x834   : > { %v3601_v15 = vmul.f32 -1.442695, %v1830_v12  ;;  %v1837_v6 = vadd.f32 %v3599_v20, %v1758_v18  ;;  %s3402_s7 = scalar_lea.vmem %s5347_s19, %s3615_s5 [#allocation4] }
 0x836   : > { %4690 = vpow2.f32 %v3601_v15  ;;  %v3602_v62 = vmul.f32 -1.442695, %v1837_v6  ;;  %v6482_v6 = vld [vmem:[%s5338_s10 + $0x128] sm:$0xff] }
 0x838   : > { %4692 = vpow2.f32 %v3602_v62 }
 0x843   : > { %v4691_v9 = vpop.eup %4690 }
 0x844   : > { %v1834_v32 = vadd.f32 1.0, %v4691_v9  ;;  %v6474_v9 = vld [vmem:[%s5338_s10 + $0x138] sm:$0xff] }
 0x845   : > { %v4693_v59 = vpop.eup %4692 }
 0x846   : > { %4694 = vrcp.f32 %v1834_v32  ;;  %v1841_v12 = vadd.f32 1.0, %v4693_v59  ;;  %v6465_v59 = vld [vmem:[%s5338_s10 + $0x160] sm:$0xff] }
 0x847   : > { %v6469_v32 = vld [vmem:[%s5338_s10 + $0x140] sm:$0xff] }
 0x853   : > { %v4695_v60 = vpop.eup %4694 }
 0x854   : > { %v1844_v50 = vmul.f32 %v4695_v60, %v1827_v58  ;;  %v6456_v58 = vld [vmem:[%s5338_s10 + $0x158] sm:$0xff]  ;;  %v6487_v60 = vld [vmem:[%s5338_s10 + $0x120] sm:$0xff] }
 0x856   : > { %v1845_v11 = vadd.f32 %v3600_v14, %v1844_v50  ;;  %v6491_v14 = vld [vmem:[%s5338_s10 + $0x130] sm:$0xff] }
 0x857   : > { %v6495_v50 = vld [vmem:[%s5338_s10 + $0x110] sm:$0xff] }
 0x858   : > { %4696 = vtanh.f32 %v1845_v11  ;;  %v6500_v11 = vld [vmem:[%s5338_s10 + $0x108] sm:$0xff] }
 0x859   : > { %4698 = vrcp.f32 %v1841_v12  ;;  %v6505_v12 = vld [vmem:[%s5338_s10 + $0xf8] sm:$0xff] }
 0x865   : > { %v4697_v15 = vpop.eup %4696 }
 0x866   : > { %v1847_v17 = vsub.f32 %v6282_v7, %v4697_v15  ;;  %v4699_v18 = vpop.eup %4698  ;;  %v6461_v7 = vld [vmem:[%s5338_s10 + $0x150] sm:$0xff] }
 0x868   : > { %v1848_v20 = vmul.f32 %v4699_v18, %v1847_v17  ;;  %v6515_v17 = vld [vmem:[%s5338_s10 + $0xe0] sm:$0xff]  ;;  %v6525_v18 = vld [vmem:[%s5338_s10 + $0xc8] sm:$0xff] }
 0x86a   : > { %v6363_v62 = vadd.f32 %v4697_v15, %v1848_v20  ;;  %v6510_v15 = vld [vmem:[%s5338_s10 + $0xf0] sm:$0xff] }
 0x86b   : > { %v6535_v20 = vld [vmem:[%s5338_s10 + $0xb0] sm:$0xff] }
 0x86c   : > { %3604 = vst [vmem:[%s3390_s9 + $0x38] sm:$0xff] %v6363_v62  ;;  %1925 = vmatmul.mubr.f32.vlgmr.msra.gmra.mxu0 %v6363_v62  ;;  %4262 = vmatmul.mubr.f32.vlgmr.msra.gmra.mxu1 %v6363_v62  ;;  %s3617_s9 = smul.u32 4294967176, %s5045_s22 }
 0x86d   : > { %2033 = vmatpush1.msra.mxu0 %v5900_v23  ;;  %4265 = vmatpush3.msra.mxu1 %v5904_v24  ;;  %v7286_v23 = vld [vmem:[#allocation19_spill] sm:$0xff]  ;;  %v7287_v24 = vld [vmem:[#allocation22_spill] sm:$0xff] }
 0x86e   : > { %2034 = vmatprep.subr.mxu0 %v5908_v48  ;;  %4266 = vmatprep.subr.mxu1 %v7256_v38  ;;  %v7288_v48 = vld [vmem:[#allocation20_spill] sm:$0xff]  ;;  %s3406_s0 = scalar_lea.vmem %s5345_s20, %s3617_s9 [#allocation3] }
 0x86f   : > { %2035 = vmatpush1.msra.mxu0 %v5913_v33  ;;  %4267 = vmatpush3.msra.mxu1 %v5917_v36  ;;  %v7289_v33 = vld [vmem:[#allocation21_spill] sm:$0xff]  ;;  %v7290_v36 = vld [vmem:[#allocation18_spill] sm:$0xff] }
 0x870   : > { %2036 = vmatprep.subr.mxu0 %v5921_v29  ;;  %4268 = vmatprep.subr.mxu1 %v7256_v38  ;;  %v1857_v29 = vld [vmem:[%s1856_s29] sm:$0xff] }
 0x871   : > { %2037 = vmatpush1.msra.mxu0 %v5926_v35  ;;  %4269 = vmatpush3.msra.mxu1 %v5930_v41 }
 0x872   : > { %2038 = vmatprep.subr.mxu0 %v5934_v26  ;;  %4270 = vmatprep.subr.mxu1 %v7256_v38 }
 0x873   : > { %2039 = vmatpush1.msra.mxu0 %v5939_v34  ;;  %4271 = vmatpush3.msra.mxu1 %v5943_v37 }
 0x874   : > { %2040 = vmatprep.subr.mxu0 %v5947_v42  ;;  %4272 = vmatprep.subr.mxu1 %v7256_v38 }
 0x875   : > { %2041 = vmatpush1.msra.mxu0 %v5952_v44  ;;  %4273 = vmatpush3.msra.mxu1 %v6105_v21 }
 0x876   : > { %2042 = vmatprep.subr.mxu0 %v5957_v43  ;;  %4274 = vmatprep.subr.mxu1 %v7256_v38 }
 0x877   : > { %2043 = vmatpush1.msra.mxu0 %v5962_v45  ;;  %4275 = vmatpush3.msra.mxu1 %v6112_v61  ;;  %v1858_v45 = vld [vmem:[%s1856_s29 + $0x8] sm:$0xff] }
 0x878   : > { %2044 = vmatprep.subr.mxu0 %v5967_v47  ;;  %4276 = vmatprep.subr.mxu1 %v7256_v38 }
 0x879   : > { %2045 = vmatpush1.msra.mxu0 %v5972_v10  ;;  %4277 = vmatpush3.msra.mxu1 %v6119_v63 }
 0x87a   : > { %2046 = vmatprep.subr.mxu0 %v5977_v49  ;;  %4278 = vmatprep.subr.mxu1 %v7256_v38 }
 0x87b   : > { %2047 = vmatpush1.msra.mxu0 %v5982_v13  ;;  %4279 = vmatpush3.msra.mxu1 %v6126_v0 }
 0x87c   : > { %2048 = vmatprep.subr.mxu0 %v5987_v27  ;;  %4280 = vmatprep.subr.mxu1 %v7256_v38 }
 0x87d   : > { %2049 = vmatpush1.msra.mxu0 %v5992_v16  ;;  %4281 = vmatpush3.msra.mxu1 %v6133_v1 }
 0x87e   : > { %2050 = vmatprep.subr.mxu0 %v5997_v46  ;;  %4282 = vmatprep.subr.mxu1 %v7256_v38 }
 0x87f   : > { %2051 = vmatpush1.msra.mxu0 %v6002_v19  ;;  %4283 = vmatpush3.msra.mxu1 %v6140_v54  ;;  %v1859_v19 = vld [vmem:[%s1856_s29 + $0x10] sm:$0xff]  ;;  %s3410_s29 = scalar_lea.vmem %s5347_s19, %s3623_s24 [#allocation4]  ;;  %s3426_s24 = scalar_lea.vmem %s5347_s19, %s3609_s13 [#allocation4] }
 0x880   : > { %2052 = vmatprep.subr.mxu0 %v6007_v51  ;;  %4284 = vmatprep.subr.mxu1 %v7256_v38  ;;  %s3641_s13 = smul.u32 4294967032, %s5045_s22 }
 0x881   : > { %2053 = vmatpush1.msra.mxu0 %v6012_v22  ;;  %4285 = vmatpush3.msra.mxu1 %v6147_v2 }
 0x882   : > { %2054 = vmatprep.subr.mxu0 %v6017_v52  ;;  %4286 = vmatprep.subr.mxu1 %v7256_v38 }
 0x883   : > { %2055 = vmatpush1.msra.mxu0 %v6022_v25  ;;  %4287 = vmatpush3.msra.mxu1 %v6154_v3 }
 0x884   : > { %2056 = vmatprep.subr.mxu0 %v6027_v55  ;;  %4288 = vmatprep.subr.mxu1 %v7256_v38 }
 0x885   : > { %2057 = vmatpush1.msra.mxu0 %v6032_v28  ;;  %4289 = vmatpush3.msra.mxu1 %v6161_v4 }
 0x886   : > { %2058 = vmatprep.subr.mxu0 %v6037_v56  ;;  %4290 = vmatprep.subr.mxu1 %v7256_v38 }
 0x887   : > { %2059 = vmatpush1.msra.mxu0 %v6042_v30  ;;  %4291 = vmatpush3.msra.mxu1 %v6168_v5 }
 0x888   : > { %2060 = vmatprep.subr.mxu0 %v6047_v57  ;;  %4292 = vmatprep.subr.mxu1 %v7256_v38  ;;  %v6448_v57 = vld [vmem:[%s5338_s10 + $0x168] sm:$0xff] }
 0x889   : > { %2061 = vmatpush1.msra.mxu0 %v6052_v31  ;;  %4293 = vmatpush3.msra.mxu1 %v7286_v23  ;;  %v6452_v31 = vld [vmem:[%s5338_s10 + $0x178] sm:$0xff] }
 0x88a   : > { %2062 = vmatprep.subr.mxu0 %v7287_v24  ;;  %4294 = vmatprep.subr.mxu1 %v7256_v38  ;;  %v6555_v24 = vld [vmem:[%s5338_s10 + $0x80] sm:$0xff] }
 0x88b   : > { %2063 = vmatpush1.msra.mxu0 %v7288_v48  ;;  %2096 = vmatprep.mubr.f32.mxu0 %v7256_v38  ;;  %v6565_v48 = vld [vmem:[%s5338_s10 + $0x68] sm:$0xff] }
 0x88c   : > { %4295 = vmatpush3.msra.mxu1 %v7289_v33  ;;  %4296 = vmatprep.mubr.msk.f32.mxu1 %vm5061_vm0, %v7256_v38 }
 0x88d   : > { %2204 = vmatprep.subr.mxu0 %v7290_v36  ;;  %4299 = vmatprep.subr.mxu1 %v7256_v38  ;;  %v6575_v36 = vld [vmem:[%s5338_s10 + $0x50] sm:$0xff] }
 0x92c   : > { %v1926_v35 = vpop.f32.mrf.mxu0  ;;  %v1997_v41 = vpop.f32.mrf.mxu1 }
 0x92d   : > { %v1927_v26 = vadd.f32 %v1926_v35, %v5638_v39  ;;  %v1998_v16 = vadd.f32 %v1997_v41, %v5644_v40  ;;  %v6595_v35 = vld [vmem:[%s5338_s10 + $0x20] sm:$0xff]  ;;  %v6605_v41 = vld [vmem:[%s5338_s10 + $0x8] sm:$0xff] }
 0x92e   : > { %v4263_v34 = vpop.f32.mrf.mxu1  ;;  %v1928_v44 = vpop.f32.mrf.mxu0  ;;  %7291 = vst [vmem:[#allocation17_spill] sm:$0xff] %v6605_v41 }
 0x92f   : > { %v2001_v37 = vadd.f32 %v1927_v26, %v1857_v29  ;;  %v1929_v43 = vadd.f32 %v1928_v44, %v7261_v53  ;;  %v6585_v29 = vld [vmem:[%s5338_s10 + $0x38] sm:$0xff]  ;;  %v6618_v26 = vld [vmem:[%s5338_s10 + $0x170] sm:$0xff] }
 0x930   : > { %7293 = vst [vmem:[#allocation22_spill] sm:$0xff] %v6618_v26 }
 0x931   : > { %v3606_v42 = vmul.f32 -1.442695, %v2001_v37  ;;  %v2008_v47 = vadd.f32 %v1929_v43, %v1858_v45 }
 0x933   : > { %4700 = vpow2.f32 %v3606_v42  ;;  %v3607_v10 = vmul.f32 -1.442695, %v2008_v47 }
 0x935   : > { %4702 = vpow2.f32 %v3607_v10  ;;  %v3611_v10 = vld [vmem:[%s3398_s26 + $0xe0] sm:$0xff] }
 0x940   : > { %v4701_v49 = vpop.eup %4700 }
 0x941   : > { %v2005_v13 = vadd.f32 1.0, %v4701_v49 }
 0x942   : > { %v4703_v27 = vpop.eup %4702 }
 0x943   : > { %4704 = vrcp.f32 %v2005_v13  ;;  %v2012_v52 = vadd.f32 1.0, %v4703_v27 }
 0x950   : > { %v4705_v46 = vpop.eup %4704 }
 0x951   : > { %v2015_v51 = vmul.f32 %v4705_v46, %v1998_v16 }
 0x953   : > { %v2016_v22 = vadd.f32 %v2015_v51, %v1859_v19 }
 0x955   : > { %4706 = vtanh.f32 %v2016_v22  ;;  %v3612_v22 = vld [vmem:[%s3398_s26 + $0xe8] sm:$0xff] }
 0x956   : > { %4708 = vrcp.f32 %v2012_v52 }
 0x962   : > { %v4707_v25 = vpop.eup %4706 }
 0x963   : > { %v2018_v55 = vsub.f32 %v6363_v62, %v4707_v25  ;;  %v4709_v28 = vpop.eup %4708  ;;  %v6545_v62 = vld [vmem:[%s5338_s10 + $0x98] sm:$0xff] }
 0x965   : > { %v2019_v56 = vmul.f32 %v4709_v28, %v2018_v55 }
 0x967   : > { %v6442_v30 = vadd.f32 %v4707_v25, %v2019_v56 }
 0x969   : > { %2023 = vst [vmem:[%s2022_s11] sm:$0xff] %v6442_v30  ;;  %2097 = vmatmul.mubr.f32.vlgmr.msra.gmra.mxu0 %v6442_v30  ;;  %4297 = vmatmul.mubr.f32.vlgmr.msra.gmra.mxu1 %v6442_v30  ;;  %s3414_s11 = scalar_lea.vmem %s5345_s20, %s3625_s6 [#allocation3]  ;;  %s3647_s6 = smul.u32 4294967208, %s5045_s22 }
 0x96a   : > { %2205 = vmatpush1.msra.mxu0 %v6448_v57  ;;  %4300 = vmatpush3.msra.mxu1 %v6452_v31 }
 0x96b   : > { %2206 = vmatprep.subr.mxu0 %v6456_v58  ;;  %4301 = vmatprep.subr.mxu1 %v7256_v38 }
 0x96c   : > { %2207 = vmatpush1.msra.mxu0 %v6461_v7  ;;  %4302 = vmatpush3.msra.mxu1 %v6465_v59 }
 0x96d   : > { %2208 = vmatprep.subr.mxu0 %v6469_v32  ;;  %4303 = vmatprep.subr.mxu1 %v7256_v38 }
 0x96e   : > { %2209 = vmatpush1.msra.mxu0 %v6474_v9  ;;  %4304 = vmatpush3.msra.mxu1 %v6478_v8 }
 0x96f   : > { %2210 = vmatprep.subr.mxu0 %v6482_v6  ;;  %4305 = vmatprep.subr.mxu1 %v7256_v38 }
 0x970   : > { %2211 = vmatpush1.msra.mxu0 %v6487_v60  ;;  %4306 = vmatpush3.msra.mxu1 %v6491_v14 }
 0x971   : > { %2212 = vmatprep.subr.mxu0 %v6495_v50  ;;  %4307 = vmatprep.subr.mxu1 %v7256_v38 }
 0x972   : > { %2213 = vmatpush1.msra.mxu0 %v6500_v11  ;;  %4308 = vmatpush3.msra.mxu1 %v6105_v21  ;;  %v6520_v21 = vld [vmem:[%s5338_s10 + $0xd8] sm:$0xff] }
 0x973   : > { %2214 = vmatprep.subr.mxu0 %v6505_v12  ;;  %4309 = vmatprep.subr.mxu1 %v7256_v38 }
 0x974   : > { %2215 = vmatpush1.msra.mxu0 %v6510_v15  ;;  %4310 = vmatpush3.msra.mxu1 %v6112_v61  ;;  %v6530_v61 = vld [vmem:[%s5338_s10 + $0xc0] sm:$0xff] }
 0x975   : > { %2216 = vmatprep.subr.mxu0 %v6515_v17  ;;  %4311 = vmatprep.subr.mxu1 %v7256_v38 }
 0x976   : > { %2217 = vmatpush1.msra.mxu0 %v6520_v21  ;;  %4312 = vmatpush3.msra.mxu1 %v6119_v63  ;;  %v6540_v63 = vld [vmem:[%s5338_s10 + $0xa8] sm:$0xff] }
 0x977   : > { %2218 = vmatprep.subr.mxu0 %v6525_v18  ;;  %4313 = vmatprep.subr.mxu1 %v7256_v38 }
 0x978   : > { %2219 = vmatpush1.msra.mxu0 %v6530_v61  ;;  %4314 = vmatpush3.msra.mxu1 %v6126_v0  ;;  %v6550_v0 = vld [vmem:[%s5338_s10 + $0x90] sm:$0xff] }
 0x979   : > { %2220 = vmatprep.subr.mxu0 %v6535_v20  ;;  %4315 = vmatprep.subr.mxu1 %v7256_v38 }
 0x97a   : > { %2221 = vmatpush1.msra.mxu0 %v6540_v63  ;;  %4316 = vmatpush3.msra.mxu1 %v6133_v1  ;;  %v6560_v1 = vld [vmem:[%s5338_s10 + $0x78] sm:$0xff] }
 0x97b   : > { %2222 = vmatprep.subr.mxu0 %v6545_v62  ;;  %4317 = vmatprep.subr.mxu1 %v7256_v38 }
 0x97c   : > { %2223 = vmatpush1.msra.mxu0 %v6550_v0  ;;  %4318 = vmatpush3.msra.mxu1 %v6140_v54  ;;  %v6570_v54 = vld [vmem:[%s5338_s10 + $0x60] sm:$0xff] }
 0x97d   : > { %2224 = vmatprep.subr.mxu0 %v6555_v24  ;;  %4319 = vmatprep.subr.mxu1 %v7256_v38 }
 0x97e   : > { %2225 = vmatpush1.msra.mxu0 %v6560_v1  ;;  %4320 = vmatpush3.msra.mxu1 %v6147_v2  ;;  %v6580_v2 = vld [vmem:[%s5338_s10 + $0x48] sm:$0xff] }
 0x97f   : > { %2226 = vmatprep.subr.mxu0 %v6565_v48  ;;  %4321 = vmatprep.subr.mxu1 %v7256_v38 }
 0x980   : > { %2227 = vmatpush1.msra.mxu0 %v6570_v54  ;;  %4322 = vmatpush3.msra.mxu1 %v6154_v3  ;;  %v6590_v3 = vld [vmem:[%s5338_s10 + $0x30] sm:$0xff] }
 0x981   : > { %2228 = vmatprep.subr.mxu0 %v6575_v36  ;;  %4323 = vmatprep.subr.mxu1 %v7256_v38 }
 0x982   : > { %2229 = vmatpush1.msra.mxu0 %v6580_v2  ;;  %4324 = vmatpush3.msra.mxu1 %v6161_v4  ;;  %v6600_v4 = vld [vmem:[%s5338_s10 + $0x18] sm:$0xff] }
 0x983   : > { %2230 = vmatprep.subr.mxu0 %v6585_v29  ;;  %4325 = vmatprep.subr.mxu1 %v7256_v38 }
 0x984   : > { %2231 = vmatpush1.msra.mxu0 %v6590_v3  ;;  %4326 = vmatpush3.msra.mxu1 %v6168_v5  ;;  %v6610_v5 = vld [vmem:[%s5338_s10] sm:$0xff] }
 0x985   : > { %2232 = vmatprep.subr.mxu0 %v6595_v35  ;;  %4327 = vmatprep.subr.mxu1 %v7256_v38  ;;  %7292 = vst [vmem:[#allocation19_spill] sm:$0xff] %v6610_v5 }
 0x986   : > { %2233 = vmatpush1.msra.mxu0 %v6600_v4  ;;  %4328 = vmatpush3.msra.mxu1 %v7286_v23  ;;  %v3610_v23 = vld [vmem:[%s3398_s26 + $0xd8] sm:$0xff]  ;;  %s3631_s26 = smul.u32 4294967240, %s5045_s22 }
 0x987   : > { %2234 = vmatprep.subr.mxu0 %v6605_v41  ;;  %4329 = vmatprep.subr.mxu1 %v7256_v38 }
 0x988   : > { %2235 = vmatpush1.msra.mxu0 %v6610_v5  ;;  %2268 = vmatprep.mubr.f32.mxu0 %v7256_v38  ;;  %s3418_s5 = scalar_lea.vmem %s5347_s19, %s3631_s26 [#allocation4]  ;;  %s3649_s26 = smul.u32 4294966984, %s5045_s22 }
 0x989   : > { %4330 = vmatpush3.msra.mxu1 %v7289_v33  ;;  %4331 = vmatprep.mubr.msk.f32.mxu1 %vm5061_vm0, %v7256_v38 }
 0x98a   : > { %2376 = vmatprep.subr.mxu0 %v6618_v26  ;;  %4334 = vmatprep.subr.mxu1 %v7256_v38 }
 0xa29   : > { %v2098_v34 = vpop.f32.mrf.mxu0  ;;  %v2169_v37 = vpop.f32.mrf.mxu1 }
 0xa2a   : > { %v2099_v42 = vadd.f32 %v2098_v34, %v5638_v39  ;;  %v2170_v19 = vadd.f32 %v2169_v37, %v5644_v40  ;;  %v6662_v37 = vld [vmem:[%s5338_s10 + $0x100] sm:$0xff] }
 0xa2b   : > { %v4298_v44 = vpop.f32.mrf.mxu1  ;;  %v2100_v45 = vpop.f32.mrf.mxu0 }
 0xa2c   : > { %v2173_v43 = vadd.f32 %v3610_v23, %v2099_v42  ;;  %v2101_v47 = vadd.f32 %v2100_v45, %v7261_v53  ;;  %v6669_v44 = vld [vmem:[%s5338_s10 + $0xe8] sm:$0xff]  ;;  %v6690_v45 = vld [vmem:[%s5338_s10 + $0xa0] sm:$0xff] }
 0xa2e   : > { %v3613_v33 = vmul.f32 -1.442695, %v2173_v43  ;;  %v2180_v49 = vadd.f32 %v3611_v10, %v2101_v47  ;;  %v6676_v43 = vld [vmem:[%s5338_s10 + $0xd0] sm:$0xff]  ;;  %v6697_v47 = vld [vmem:[%s5338_s10 + $0x88] sm:$0xff] }
 0xa2f   : > { %v6704_v10 = vld [vmem:[%s5338_s10 + $0x70] sm:$0xff] }
 0xa30   : > { %4710 = vpow2.f32 %v3613_v33  ;;  %v3614_v13 = vmul.f32 -1.442695, %v2180_v49  ;;  %v6683_v33 = vld [vmem:[%s5338_s10 + $0xb8] sm:$0xff] }
 0xa31   : > { %v6711_v49 = vld [vmem:[%s5338_s10 + $0x58] sm:$0xff] }
 0xa32   : > { %4712 = vpow2.f32 %v3614_v13  ;;  %v6718_v13 = vld [vmem:[%s5338_s10 + $0x40] sm:$0xff] }
 0xa3d   : > { %v4711_v27 = vpop.eup %4710 }
 0xa3e   : > { %v2177_v16 = vadd.f32 1.0, %v4711_v27  ;;  %v6725_v27 = vld [vmem:[%s5338_s10 + $0x28] sm:$0xff] }
 0xa3f   : > { %v4713_v46 = vpop.eup %4712  ;;  %7294 = vst [vmem:[#allocation20_spill] sm:$0xff] %v6725_v27 }
 0xa40   : > { %4714 = vrcp.f32 %v2177_v16  ;;  %v2184_v55 = vadd.f32 1.0, %v4713_v46  ;;  %v6733_v16 = vld [vmem:[%s5338_s10 + $0x10] sm:$0xff] }
 0xa41   : > { %7295 = vst [vmem:[#allocation21_spill] sm:$0xff] %v6733_v16  ;;  %v3618_v46 = vld [vmem:[%s3406_s0 + $0xf0] sm:$0xff] }
 0xa4d   : > { %v4715_v51 = vpop.eup %4714 }
 0xa4e   : > { %v2187_v52 = vmul.f32 %v4715_v51, %v2170_v19 }
 0xa50   : > { %v2188_v25 = vadd.f32 %v3612_v22, %v2187_v52 }
 0xa52   : > { %4716 = vtanh.f32 %v2188_v25 }
 0xa53   : > { %4718 = vrcp.f32 %v2184_v55 }
 0xa5f   : > { %v4717_v28 = vpop.eup %4716 }
 0xa60   : > { %v2190_v56 = vsub.f32 %v6442_v30, %v4717_v28  ;;  %v4719_v23 = vpop.eup %4718  ;;  %v6655_v30 = vld [vmem:[%s5338_s10 + $0x118] sm:$0xff] }
 0xa62   : > { %v2191_v34 = vmul.f32 %v4719_v23, %v2190_v56  ;;  %v3619_v23 = vld [vmem:[%s3406_s0 + $0xf8] sm:$0xff] }
 0xa64   : > { %v6632_v42 = vadd.f32 %v4717_v28, %v2191_v34 }
 0xa66   : > { %3616 = vst [vmem:[%s3402_s7 + $0x48] sm:$0xff] %v6632_v42  ;;  %2269 = vmatmul.mubr.f32.vlgmr.msra.gmra.mxu0 %v6632_v42  ;;  %4332 = vmatmul.mubr.f32.vlgmr.msra.gmra.mxu1 %v6632_v42  ;;  %s3633_s7 = smul.u32 4294967080, %s5045_s22 }
 0xa67   : > { %2377 = vmatpush1.msra.mxu0 %v6448_v57  ;;  %4335 = vmatpush3.msra.mxu1 %v6452_v31 }
 0xa68   : > { %2378 = vmatprep.subr.mxu0 %v6456_v58  ;;  %4336 = vmatprep.subr.mxu1 %v7256_v38 }
 0xa69   : > { %2379 = vmatpush1.msra.mxu0 %v6461_v7  ;;  %4337 = vmatpush3.msra.mxu1 %v6465_v59 }
 0xa6a   : > { %2380 = vmatprep.subr.mxu0 %v6469_v32  ;;  %4338 = vmatprep.subr.mxu1 %v7256_v38 }
 0xa6b   : > { %2381 = vmatpush1.msra.mxu0 %v6474_v9  ;;  %4339 = vmatpush3.msra.mxu1 %v6478_v8 }
 0xa6c   : > { %2382 = vmatprep.subr.mxu0 %v6482_v6  ;;  %4340 = vmatprep.subr.mxu1 %v7256_v38 }
 0xa6d   : > { %2383 = vmatpush1.msra.mxu0 %v6487_v60  ;;  %4341 = vmatpush3.msra.mxu1 %v6491_v14 }
 0xa6e   : > { %2384 = vmatprep.subr.mxu0 %v6495_v50  ;;  %4342 = vmatprep.subr.mxu1 %v7256_v38 }
 0xa6f   : > { %2385 = vmatpush1.msra.mxu0 %v6500_v11  ;;  %4343 = vmatpush3.msra.mxu1 %v6655_v30 }
 0xa70   : > { %2386 = vmatprep.subr.mxu0 %v6505_v12  ;;  %4344 = vmatprep.subr.mxu1 %v7256_v38 }
 0xa71   : > { %2387 = vmatpush1.msra.mxu0 %v6510_v15  ;;  %4345 = vmatpush3.msra.mxu1 %v6662_v37 }
 0xa72   : > { %2388 = vmatprep.subr.mxu0 %v6515_v17  ;;  %4346 = vmatprep.subr.mxu1 %v7256_v38 }
 0xa73   : > { %2389 = vmatpush1.msra.mxu0 %v6520_v21  ;;  %4347 = vmatpush3.msra.mxu1 %v6669_v44 }
 0xa74   : > { %2390 = vmatprep.subr.mxu0 %v6525_v18  ;;  %4348 = vmatprep.subr.mxu1 %v7256_v38 }
 0xa75   : > { %2391 = vmatpush1.msra.mxu0 %v6530_v61  ;;  %4349 = vmatpush3.msra.mxu1 %v6676_v43 }
 0xa76   : > { %2392 = vmatprep.subr.mxu0 %v6535_v20  ;;  %4350 = vmatprep.subr.mxu1 %v7256_v38 }
 0xa77   : > { %2393 = vmatpush1.msra.mxu0 %v6540_v63  ;;  %4351 = vmatpush3.msra.mxu1 %v6683_v33 }
 0xa78   : > { %2394 = vmatprep.subr.mxu0 %v6545_v62  ;;  %4352 = vmatprep.subr.mxu1 %v7256_v38 }
 0xa79   : > { %2395 = vmatpush1.msra.mxu0 %v6550_v0  ;;  %4353 = vmatpush3.msra.mxu1 %v6690_v45 }
 0xa7a   : > { %2396 = vmatprep.subr.mxu0 %v6555_v24  ;;  %4354 = vmatprep.subr.mxu1 %v7256_v38 }
 0xa7b   : > { %2397 = vmatpush1.msra.mxu0 %v6560_v1  ;;  %4355 = vmatpush3.msra.mxu1 %v6697_v47 }
 0xa7c   : > { %2398 = vmatprep.subr.mxu0 %v6565_v48  ;;  %4356 = vmatprep.subr.mxu1 %v7256_v38 }
 0xa7d   : > { %2399 = vmatpush1.msra.mxu0 %v6570_v54  ;;  %4357 = vmatpush3.msra.mxu1 %v6704_v10 }
 0xa7e   : > { %2400 = vmatprep.subr.mxu0 %v6575_v36  ;;  %4358 = vmatprep.subr.mxu1 %v7256_v38 }
 0xa7f   : > { %2401 = vmatpush1.msra.mxu0 %v6580_v2  ;;  %4359 = vmatpush3.msra.mxu1 %v6711_v49 }
 0xa80   : > { %2402 = vmatprep.subr.mxu0 %v6585_v29  ;;  %4360 = vmatprep.subr.mxu1 %v7256_v38 }
 0xa81   : > { %2403 = vmatpush1.msra.mxu0 %v6590_v3  ;;  %4361 = vmatpush3.msra.mxu1 %v6718_v13 }
 0xa82   : > { %2404 = vmatprep.subr.mxu0 %v6595_v35  ;;  %4362 = vmatprep.subr.mxu1 %v7256_v38 }
 0xa83   : > { %2405 = vmatpush1.msra.mxu0 %v6600_v4  ;;  %4363 = vmatpush3.msra.mxu1 %v6725_v27 }
 0xa84   : > { %2406 = vmatprep.subr.mxu0 %v6605_v41  ;;  %4364 = vmatprep.subr.mxu1 %v7256_v38 }
 0xa85   : > { %2407 = vmatpush1.msra.mxu0 %v6610_v5  ;;  %2440 = vmatprep.mubr.f32.mxu0 %v7256_v38 }
 0xa86   : > { %4365 = vmatpush3.msra.mxu1 %v6733_v16  ;;  %4366 = vmatprep.mubr.msk.f32.mxu1 %vm5061_vm0, %v7256_v38 }
 0xa87   : > { %2548 = vmatprep.subr.mxu0 %v6618_v26  ;;  %4369 = vmatprep.subr.mxu1 %v7256_v38 }
 0xb26   : > { %v2270_v19 = vpop.f32.mrf.mxu0  ;;  %v2341_v51 = vpop.f32.mrf.mxu1 }
 0xb27   : > { %v2271_v22 = vadd.f32 %v2270_v19, %v5638_v39  ;;  %v2342_v27 = vadd.f32 %v2341_v51, %v5644_v40  ;;  %v3626_v51 = vld [vmem:[%s3414_s11 + $0x108] sm:$0xff] }
 0xb28   : > { %v4333_v52 = vpop.f32.mrf.mxu1  ;;  %v2272_v28 = vpop.f32.mrf.mxu0 }
 0xb29   : > { %v2345_v25 = vadd.f32 %v3618_v46, %v2271_v22  ;;  %v2273_v56 = vadd.f32 %v2272_v28, %v7261_v53  ;;  %v3620_v52 = vld [vmem:[%s3406_s0 + $0x100] sm:$0xff]  ;;  %s3422_s0 = scalar_lea.vmem %s5345_s20, %s3633_s7 [#allocation3] }
 0xb2b   : > { %v3621_v55 = vmul.f32 -1.442695, %v2345_v25  ;;  %v2352_v34 = vadd.f32 %v3619_v23, %v2273_v56 }
 0xb2d   : > { %4720 = vpow2.f32 %v3621_v55  ;;  %v3622_v26 = vmul.f32 -1.442695, %v2352_v34 }
 0xb2f   : > { %4722 = vpow2.f32 %v3622_v26 }
 0xb3a   : > { %v4721_v16 = vpop.eup %4720 }
 0xb3b   : > { %v2349_v5 = vadd.f32 1.0, %v4721_v16  ;;  %v7300_v16 = vld [vmem:[#allocation22_spill] sm:$0xff] }
 0xb3c   : > { %v4723_v41 = vpop.eup %4722 }
 0xb3d   : > { %4724 = vrcp.f32 %v2349_v5  ;;  %v2356_v25 = vadd.f32 1.0, %v4723_v41  ;;  %v7296_v41 = vld [vmem:[#allocation20_spill] sm:$0xff]  ;;  %v7297_v5 = vld [vmem:[#allocation17_spill] sm:$0xff] }
 0xb4a   : > { %v4725_v19 = vpop.eup %4724 }
 0xb4b   : > { %v2359_v46 = vmul.f32 %v4725_v19, %v2342_v27  ;;  %v7299_v27 = vld [vmem:[#allocation21_spill] sm:$0xff] }
 0xb4d   : > { %v2360_v22 = vadd.f32 %v3620_v52, %v2359_v46 }
 0xb4f   : > { %4726 = vtanh.f32 %v2360_v22 }
 0xb50   : > { %4728 = vrcp.f32 %v2356_v25 }
 0xb5c   : > { %v4727_v55 = vpop.eup %4726 }
 0xb5d   : > { %v2362_v28 = vsub.f32 %v6632_v42, %v4727_v55  ;;  %v4729_v56 = vpop.eup %4728  ;;  %v7298_v42 = vld [vmem:[#allocation19_spill] sm:$0xff] }
 0xb5f   : > { %v2363_v23 = vmul.f32 %v4729_v56, %v2362_v28  ;;  %v3627_v56 = vld [vmem:[%s3414_s11 + $0x110] sm:$0xff] }
 0xb61   : > { %v6750_v26 = vadd.f32 %v4727_v55, %v2363_v23 }
 0xb63   : > { %3624 = vst [vmem:[%s3410_s29 + $0x50] sm:$0xff] %v6750_v26  ;;  %2441 = vmatmul.mubr.f32.vlgmr.msra.gmra.mxu0 %v6750_v26  ;;  %4367 = vmatmul.mubr.f32.vlgmr.msra.gmra.mxu1 %v6750_v26  ;;  %s3430_s29 = scalar_lea.vmem %s5345_s20, %s3641_s13 [#allocation3] }
 0xb64   : > { %2549 = vmatpush1.msra.mxu0 %v6448_v57  ;;  %4370 = vmatpush3.msra.mxu1 %v6452_v31 }
 0xb65   : > { %2550 = vmatprep.subr.mxu0 %v6456_v58  ;;  %4371 = vmatprep.subr.mxu1 %v7256_v38 }
 0xb66   : > { %2551 = vmatpush1.msra.mxu0 %v6461_v7  ;;  %4372 = vmatpush3.msra.mxu1 %v6465_v59 }
 0xb67   : > { %2552 = vmatprep.subr.mxu0 %v6469_v32  ;;  %4373 = vmatprep.subr.mxu1 %v7256_v38 }
 0xb68   : > { %2553 = vmatpush1.msra.mxu0 %v6474_v9  ;;  %4374 = vmatpush3.msra.mxu1 %v6478_v8 }
 0xb69   : > { %2554 = vmatprep.subr.mxu0 %v6482_v6  ;;  %4375 = vmatprep.subr.mxu1 %v7256_v38 }
 0xb6a   : > { %2555 = vmatpush1.msra.mxu0 %v6487_v60  ;;  %4376 = vmatpush3.msra.mxu1 %v6491_v14 }
 0xb6b   : > { %2556 = vmatprep.subr.mxu0 %v6495_v50  ;;  %4377 = vmatprep.subr.mxu1 %v7256_v38 }
 0xb6c   : > { %2557 = vmatpush1.msra.mxu0 %v6500_v11  ;;  %4378 = vmatpush3.msra.mxu1 %v6655_v30 }
 0xb6d   : > { %2558 = vmatprep.subr.mxu0 %v6505_v12  ;;  %4379 = vmatprep.subr.mxu1 %v7256_v38 }
 0xb6e   : > { %2559 = vmatpush1.msra.mxu0 %v6510_v15  ;;  %4380 = vmatpush3.msra.mxu1 %v6662_v37 }
 0xb6f   : > { %2560 = vmatprep.subr.mxu0 %v6515_v17  ;;  %4381 = vmatprep.subr.mxu1 %v7256_v38 }
 0xb70   : > { %2561 = vmatpush1.msra.mxu0 %v6520_v21  ;;  %4382 = vmatpush3.msra.mxu1 %v6669_v44 }
 0xb71   : > { %2562 = vmatprep.subr.mxu0 %v6525_v18  ;;  %4383 = vmatprep.subr.mxu1 %v7256_v38 }
 0xb72   : > { %2563 = vmatpush1.msra.mxu0 %v6530_v61  ;;  %4384 = vmatpush3.msra.mxu1 %v6676_v43 }
 0xb73   : > { %2564 = vmatprep.subr.mxu0 %v6535_v20  ;;  %4385 = vmatprep.subr.mxu1 %v7256_v38 }
 0xb74   : > { %2565 = vmatpush1.msra.mxu0 %v6540_v63  ;;  %4386 = vmatpush3.msra.mxu1 %v6683_v33 }
 0xb75   : > { %2566 = vmatprep.subr.mxu0 %v6545_v62  ;;  %4387 = vmatprep.subr.mxu1 %v7256_v38 }
 0xb76   : > { %2567 = vmatpush1.msra.mxu0 %v6550_v0  ;;  %4388 = vmatpush3.msra.mxu1 %v6690_v45 }
 0xb77   : > { %2568 = vmatprep.subr.mxu0 %v6555_v24  ;;  %4389 = vmatprep.subr.mxu1 %v7256_v38 }
 0xb78   : > { %2569 = vmatpush1.msra.mxu0 %v6560_v1  ;;  %4390 = vmatpush3.msra.mxu1 %v6697_v47 }
 0xb79   : > { %2570 = vmatprep.subr.mxu0 %v6565_v48  ;;  %4391 = vmatprep.subr.mxu1 %v7256_v38 }
 0xb7a   : > { %2571 = vmatpush1.msra.mxu0 %v6570_v54  ;;  %4392 = vmatpush3.msra.mxu1 %v6704_v10 }
 0xb7b   : > { %2572 = vmatprep.subr.mxu0 %v6575_v36  ;;  %4393 = vmatprep.subr.mxu1 %v7256_v38 }
 0xb7c   : > { %2573 = vmatpush1.msra.mxu0 %v6580_v2  ;;  %4394 = vmatpush3.msra.mxu1 %v6711_v49 }
 0xb7d   : > { %2574 = vmatprep.subr.mxu0 %v6585_v29  ;;  %4395 = vmatprep.subr.mxu1 %v7256_v38 }
 0xb7e   : > { %2575 = vmatpush1.msra.mxu0 %v6590_v3  ;;  %4396 = vmatpush3.msra.mxu1 %v6718_v13 }
 0xb7f   : > { %2576 = vmatprep.subr.mxu0 %v6595_v35  ;;  %4397 = vmatprep.subr.mxu1 %v7256_v38 }
 0xb80   : > { %2577 = vmatpush1.msra.mxu0 %v6600_v4  ;;  %4398 = vmatpush3.msra.mxu1 %v7296_v41 }
 0xb81   : > { %2578 = vmatprep.subr.mxu0 %v7297_v5  ;;  %4399 = vmatprep.subr.mxu1 %v7256_v38 }
 0xb82   : > { %2579 = vmatpush1.msra.mxu0 %v7298_v42  ;;  %2612 = vmatprep.mubr.f32.mxu0 %v7256_v38 }
 0xb83   : > { %4400 = vmatpush3.msra.mxu1 %v7299_v27  ;;  %4401 = vmatprep.mubr.msk.f32.mxu1 %vm5061_vm0, %v7256_v38 }
 0xb84   : > { %2720 = vmatprep.subr.mxu0 %v7300_v16  ;;  %4404 = vmatprep.subr.mxu1 %v7256_v38 }
 0xc23   : > { %v2442_v34 = vpop.f32.mrf.mxu0  ;;  %v2513_v19 = vpop.f32.mrf.mxu1 }
 0xc24   : > { %v2443_v52 = vadd.f32 %v2442_v34, %v5638_v39  ;;  %v2514_v41 = vadd.f32 %v2513_v19, %v5644_v40  ;;  %v3634_v19 = vld [vmem:[%s3422_s0 + $0x120] sm:$0xff] }
 0xc25   : > { %v4368_v46 = vpop.f32.mrf.mxu1  ;;  %v2444_v55 = vpop.f32.mrf.mxu0 }
 0xc26   : > { %v2517_v22 = vadd.f32 %v3626_v51, %v2443_v52  ;;  %v2445_v28 = vadd.f32 %v2444_v55, %v7261_v53  ;;  %v3628_v46 = vld [vmem:[%s3414_s11 + $0x118] sm:$0xff]  ;;  %s3434_s11 = scalar_lea.vmem %s5347_s19, %s3647_s6 [#allocation4] }
 0xc28   : > { %v3629_v25 = vmul.f32 -1.442695, %v2517_v22  ;;  %v2524_v23 = vadd.f32 %v3627_v56, %v2445_v28 }
 0xc2a   : > { %4730 = vpow2.f32 %v3629_v25  ;;  %v3630_v16 = vmul.f32 -1.442695, %v2524_v23 }
 0xc2c   : > { %4732 = vpow2.f32 %v3630_v16  ;;  %v7305_v16 = vld [vmem:[#allocation22_spill] sm:$0xff] }
 0xc37   : > { %v4731_v27 = vpop.eup %4730 }
 0xc38   : > { %v2521_v42 = vadd.f32 1.0, %v4731_v27 }
 0xc39   : > { %v4733_v5 = vpop.eup %4732 }
 0xc3a   : > { %4734 = vrcp.f32 %v2521_v42  ;;  %v2528_v22 = vadd.f32 1.0, %v4733_v5  ;;  %v7303_v5 = vld [vmem:[#allocation19_spill] sm:$0xff]  ;;  %v7304_v42 = vld [vmem:[#allocation21_spill] sm:$0xff] }
 0xc47   : > { %v4735_v34 = vpop.eup %4734 }
 0xc48   : > { %v2531_v51 = vmul.f32 %v4735_v34, %v2514_v41  ;;  %v7302_v41 = vld [vmem:[#allocation17_spill] sm:$0xff] }
 0xc4a   : > { %v2532_v52 = vadd.f32 %v3628_v46, %v2531_v51 }
 0xc4c   : > { %4736 = vtanh.f32 %v2532_v52 }
 0xc4d   : > { %4738 = vrcp.f32 %v2528_v22 }
 0xc59   : > { %v4737_v25 = vpop.eup %4736 }
 0xc5a   : > { %v2534_v55 = vsub.f32 %v6750_v26, %v4737_v25  ;;  %v4739_v28 = vpop.eup %4738  ;;  %v7301_v26 = vld [vmem:[#allocation20_spill] sm:$0xff] }
 0xc5c   : > { %v2535_v56 = vmul.f32 %v4739_v28, %v2534_v55  ;;  %v3635_v28 = vld [vmem:[%s3422_s0 + $0x128] sm:$0xff] }
 0xc5e   : > { %v6830_v27 = vadd.f32 %v4737_v25, %v2535_v56 }
 0xc60   : > { %3632 = vst [vmem:[%s3418_s5 + $0x58] sm:$0xff] %v6830_v27  ;;  %2613 = vmatmul.mubr.f32.vlgmr.msra.gmra.mxu0 %v6830_v27  ;;  %4402 = vmatmul.mubr.f32.vlgmr.msra.gmra.mxu1 %v6830_v27  ;;  %s3438_s5 = scalar_lea.vmem %s5345_s20, %s3649_s26 [#allocation3] }
 0xc61   : > { %2721 = vmatpush1.msra.mxu0 %v6448_v57  ;;  %4405 = vmatpush3.msra.mxu1 %v6452_v31 }
 0xc62   : > { %2722 = vmatprep.subr.mxu0 %v6456_v58  ;;  %4406 = vmatprep.subr.mxu1 %v7256_v38 }
 0xc63   : > { %2723 = vmatpush1.msra.mxu0 %v6461_v7  ;;  %4407 = vmatpush3.msra.mxu1 %v6465_v59 }
 0xc64   : > { %2724 = vmatprep.subr.mxu0 %v6469_v32  ;;  %4408 = vmatprep.subr.mxu1 %v7256_v38 }
 0xc65   : > { %2725 = vmatpush1.msra.mxu0 %v6474_v9  ;;  %4409 = vmatpush3.msra.mxu1 %v6478_v8 }
 0xc66   : > { %2726 = vmatprep.subr.mxu0 %v6482_v6  ;;  %4410 = vmatprep.subr.mxu1 %v7256_v38 }
 0xc67   : > { %2727 = vmatpush1.msra.mxu0 %v6487_v60  ;;  %4411 = vmatpush3.msra.mxu1 %v6491_v14 }
 0xc68   : > { %2728 = vmatprep.subr.mxu0 %v6495_v50  ;;  %4412 = vmatprep.subr.mxu1 %v7256_v38 }
 0xc69   : > { %2729 = vmatpush1.msra.mxu0 %v6500_v11  ;;  %4413 = vmatpush3.msra.mxu1 %v6655_v30 }
 0xc6a   : > { %2730 = vmatprep.subr.mxu0 %v6505_v12  ;;  %4414 = vmatprep.subr.mxu1 %v7256_v38 }
 0xc6b   : > { %2731 = vmatpush1.msra.mxu0 %v6510_v15  ;;  %4415 = vmatpush3.msra.mxu1 %v6662_v37 }
 0xc6c   : > { %2732 = vmatprep.subr.mxu0 %v6515_v17  ;;  %4416 = vmatprep.subr.mxu1 %v7256_v38 }
 0xc6d   : > { %2733 = vmatpush1.msra.mxu0 %v6520_v21  ;;  %4417 = vmatpush3.msra.mxu1 %v6669_v44 }
 0xc6e   : > { %2734 = vmatprep.subr.mxu0 %v6525_v18  ;;  %4418 = vmatprep.subr.mxu1 %v7256_v38 }
 0xc6f   : > { %2735 = vmatpush1.msra.mxu0 %v6530_v61  ;;  %4419 = vmatpush3.msra.mxu1 %v6676_v43 }
 0xc70   : > { %2736 = vmatprep.subr.mxu0 %v6535_v20  ;;  %4420 = vmatprep.subr.mxu1 %v7256_v38 }
 0xc71   : > { %2737 = vmatpush1.msra.mxu0 %v6540_v63  ;;  %4421 = vmatpush3.msra.mxu1 %v6683_v33 }
 0xc72   : > { %2738 = vmatprep.subr.mxu0 %v6545_v62  ;;  %4422 = vmatprep.subr.mxu1 %v7256_v38 }
 0xc73   : > { %2739 = vmatpush1.msra.mxu0 %v6550_v0  ;;  %4423 = vmatpush3.msra.mxu1 %v6690_v45 }
 0xc74   : > { %2740 = vmatprep.subr.mxu0 %v6555_v24  ;;  %4424 = vmatprep.subr.mxu1 %v7256_v38 }
 0xc75   : > { %2741 = vmatpush1.msra.mxu0 %v6560_v1  ;;  %4425 = vmatpush3.msra.mxu1 %v6697_v47 }
 0xc76   : > { %2742 = vmatprep.subr.mxu0 %v6565_v48  ;;  %4426 = vmatprep.subr.mxu1 %v7256_v38 }
 0xc77   : > { %2743 = vmatpush1.msra.mxu0 %v6570_v54  ;;  %4427 = vmatpush3.msra.mxu1 %v6704_v10 }
 0xc78   : > { %2744 = vmatprep.subr.mxu0 %v6575_v36  ;;  %4428 = vmatprep.subr.mxu1 %v7256_v38 }
 0xc79   : > { %2745 = vmatpush1.msra.mxu0 %v6580_v2  ;;  %4429 = vmatpush3.msra.mxu1 %v6711_v49 }
 0xc7a   : > { %2746 = vmatprep.subr.mxu0 %v6585_v29  ;;  %4430 = vmatprep.subr.mxu1 %v7256_v38 }
 0xc7b   : > { %2747 = vmatpush1.msra.mxu0 %v6590_v3  ;;  %4431 = vmatpush3.msra.mxu1 %v6718_v13 }
 0xc7c   : > { %2748 = vmatprep.subr.mxu0 %v6595_v35  ;;  %4432 = vmatprep.subr.mxu1 %v7256_v38 }
 0xc7d   : > { %2749 = vmatpush1.msra.mxu0 %v6600_v4  ;;  %4433 = vmatpush3.msra.mxu1 %v7301_v26 }
 0xc7e   : > { %2750 = vmatprep.subr.mxu0 %v7302_v41  ;;  %4434 = vmatprep.subr.mxu1 %v7256_v38 }
 0xc7f   : > { %2751 = vmatpush1.msra.mxu0 %v7303_v5  ;;  %2784 = vmatprep.mubr.f32.mxu0 %v7256_v38 }
 0xc80   : > { %4435 = vmatpush3.msra.mxu1 %v7304_v42  ;;  %4436 = vmatprep.mubr.msk.f32.mxu1 %vm5061_vm0, %v7256_v38 }
 0xc81   : > { %2892 = vmatprep.subr.mxu0 %v7305_v16  ;;  %4439 = vmatprep.subr.mxu1 %v7256_v38 }
 0xd20   : > { %v2614_v23 = vpop.f32.mrf.mxu0  ;;  %v2685_v34 = vpop.f32.mrf.mxu1 }
 0xd21   : > { %v2615_v46 = vadd.f32 %v2614_v23, %v5638_v39  ;;  %v2686_v26 = vadd.f32 %v2685_v34, %v5644_v40  ;;  %v4883_v34 = vld [vmem:[%s5338_s10 + $0x148] sm:$0xff] }
 0xd22   : > { %v4403_v51 = vpop.f32.mrf.mxu1  ;;  %v2616_v25 = vpop.f32.mrf.mxu0 }
 0xd23   : > { %v2689_v52 = vadd.f32 %v3634_v19, %v2615_v46  ;;  %v2617_v55 = vadd.f32 %v2616_v25, %v7261_v53  ;;  %v3636_v51 = vld [vmem:[%s3422_s0 + $0x130] sm:$0xff]  ;;  %s3657_s0 = smul.u32 4294966936, %s5045_s22 }
 0xd25   : > { %v3637_v22 = vmul.f32 -1.442695, %v2689_v52  ;;  %v2696_v56 = vadd.f32 %v3635_v28, %v2617_v55 }
 0xd27   : > { %4740 = vpow2.f32 %v3637_v22  ;;  %v3638_v42 = vmul.f32 -1.442695, %v2696_v56  ;;  %v4884_v56 = vld [vmem:[%s5338_s10 + $0x128] sm:$0xff] }
 0xd29   : > { %4742 = vpow2.f32 %v3638_v42  ;;  %v4882_v42 = vld [vmem:[%s5338_s10 + $0x138] sm:$0xff] }
 0xd34   : > { %v4741_v16 = vpop.eup %4740 }
 0xd35   : > { %v2693_v5 = vadd.f32 1.0, %v4741_v16 }
 0xd36   : > { %v4743_v41 = vpop.eup %4742 }
 0xd37   : > { %4744 = vrcp.f32 %v2693_v5  ;;  %v2700_v52 = vadd.f32 1.0, %v4743_v41  ;;  %v4880_v41 = vld [vmem:[%s5338_s10 + $0x160] sm:$0xff] }
 0xd38   : > { %v4881_v5 = vld [vmem:[%s5338_s10 + $0x140] sm:$0xff] }
 0xd44   : > { %v4745_v23 = vpop.eup %4744 }
 0xd45   : > { %v2703_v19 = vmul.f32 %v4745_v23, %v2686_v26  ;;  %v4879_v26 = vld [vmem:[%s5338_s10 + $0x150] sm:$0xff]  ;;  %v4885_v23 = vld [vmem:[%s5338_s10 + $0x120] sm:$0xff] }
 0xd47   : > { %v2704_v46 = vadd.f32 %v3636_v51, %v2703_v19  ;;  %v4886_v51 = vld [vmem:[%s5338_s10 + $0x130] sm:$0xff] }
 0xd48   : > { %v4887_v19 = vld [vmem:[%s5338_s10 + $0x110] sm:$0xff] }
 0xd49   : > { %4746 = vtanh.f32 %v2704_v46  ;;  %v4888_v46 = vld [vmem:[%s5338_s10 + $0x108] sm:$0xff] }
 0xd4a   : > { %4748 = vrcp.f32 %v2700_v52  ;;  %v4889_v52 = vld [vmem:[%s5338_s10 + $0xf8] sm:$0xff] }
 0xd56   : > { %v4747_v22 = vpop.eup %4746 }
 0xd57   : > { %v2706_v25 = vsub.f32 %v6830_v27, %v4747_v22  ;;  %v4749_v55 = vpop.eup %4748  ;;  %v4878_v27 = vld [vmem:[%s5338_s10 + $0x158] sm:$0xff] }
 0xd59   : > { %v2707_v28 = vmul.f32 %v4749_v55, %v2706_v25  ;;  %v4891_v25 = vld [vmem:[%s5338_s10 + $0xe0] sm:$0xff]  ;;  %v4892_v55 = vld [vmem:[%s5338_s10 + $0xd8] sm:$0xff] }
 0xd5b   : > { %v6911_v16 = vadd.f32 %v4747_v22, %v2707_v28  ;;  %v4890_v22 = vld [vmem:[%s5338_s10 + $0xf0] sm:$0xff]  ;;  %v4894_v28 = vld [vmem:[%s5338_s10 + $0xc0] sm:$0xff] }
 0xd5d   : > { %3640 = vst [vmem:[%s3426_s24 + $0x60] sm:$0xff] %v6911_v16  ;;  %2785 = vmatmul.mubr.f32.vlgmr.msra.gmra.mxu0 %v6911_v16  ;;  %4437 = vmatmul.mubr.f32.vlgmr.msra.gmra.mxu1 %v6911_v16  ;;  %s3446_s24 = scalar_lea.vmem %s5345_s20, %s3657_s0 [#allocation3]  ;;  %s3667_s20 = sshll.u32 %s5041_s21, 1 }
 0xd5e   : > { %2893 = vmatpush1.msra.mxu0 %v6448_v57  ;;  %4440 = vmatpush3.msra.mxu1 %v6452_v31  ;;  %v7306_v57 = vld [vmem:[#allocation20_spill] sm:$0xff]  ;;  %v7307_v31 = vld [vmem:[#allocation17_spill] sm:$0xff]  ;;  %s3244_s13 = ssub.s32 1, %s3667_s20 }
 0xd5f   : > { %2894 = vmatprep.subr.mxu0 %v6456_v58  ;;  %4441 = vmatprep.subr.mxu1 %v7256_v38  ;;  %v7308_v58 = vld [vmem:[#allocation19_spill] sm:$0xff] }
 0xd60   : > { %2895 = vmatpush1.msra.mxu0 %v6461_v7  ;;  %4442 = vmatpush3.msra.mxu1 %v6465_v59  ;;  %v7309_v7 = vld [vmem:[#allocation21_spill] sm:$0xff]  ;;  %v7310_v59 = vld [vmem:[#allocation22_spill] sm:$0xff] }
 0xd61   : > { %2896 = vmatprep.subr.mxu0 %v6469_v32  ;;  %4443 = vmatprep.subr.mxu1 %v7256_v38  ;;  %v3642_v32 = vld [vmem:[%s3430_s29 + $0x138] sm:$0xff] }
 0xd62   : > { %2897 = vmatpush1.msra.mxu0 %v6474_v9  ;;  %4444 = vmatpush3.msra.mxu1 %v6478_v8 }
 0xd63   : > { %2898 = vmatprep.subr.mxu0 %v6482_v6  ;;  %4445 = vmatprep.subr.mxu1 %v7256_v38 }
 0xd64   : > { %2899 = vmatpush1.msra.mxu0 %v6487_v60  ;;  %4446 = vmatpush3.msra.mxu1 %v6491_v14 }
 0xd65   : > { %2900 = vmatprep.subr.mxu0 %v6495_v50  ;;  %4447 = vmatprep.subr.mxu1 %v7256_v38 }
 0xd66   : > { %2901 = vmatpush1.msra.mxu0 %v6500_v11  ;;  %4448 = vmatpush3.msra.mxu1 %v6655_v30 }
 0xd67   : > { %2902 = vmatprep.subr.mxu0 %v6505_v12  ;;  %4449 = vmatprep.subr.mxu1 %v7256_v38 }
 0xd68   : > { %2903 = vmatpush1.msra.mxu0 %v6510_v15  ;;  %4450 = vmatpush3.msra.mxu1 %v6662_v37  ;;  %v3643_v15 = vld [vmem:[%s3430_s29 + $0x140] sm:$0xff] }
 0xd69   : > { %2904 = vmatprep.subr.mxu0 %v6515_v17  ;;  %4451 = vmatprep.subr.mxu1 %v7256_v38 }
 0xd6a   : > { %2905 = vmatpush1.msra.mxu0 %v6520_v21  ;;  %4452 = vmatpush3.msra.mxu1 %v6669_v44 }
 0xd6b   : > { %2906 = vmatprep.subr.mxu0 %v6525_v18  ;;  %4453 = vmatprep.subr.mxu1 %v7256_v38 }
 0xd6c   : > { %2907 = vmatpush1.msra.mxu0 %v6530_v61  ;;  %4454 = vmatpush3.msra.mxu1 %v6676_v43 }
 0xd6d   : > { %2908 = vmatprep.subr.mxu0 %v6535_v20  ;;  %4455 = vmatprep.subr.mxu1 %v7256_v38 }
 0xd6e   : > { %2909 = vmatpush1.msra.mxu0 %v6540_v63  ;;  %4456 = vmatpush3.msra.mxu1 %v6683_v33 }
 0xd6f   : > { %2910 = vmatprep.subr.mxu0 %v6545_v62  ;;  %4457 = vmatprep.subr.mxu1 %v7256_v38 }
 0xd70   : > { %2911 = vmatpush1.msra.mxu0 %v6550_v0  ;;  %4458 = vmatpush3.msra.mxu1 %v6690_v45  ;;  %v3644_v0 = vld [vmem:[%s3430_s29 + $0x148] sm:$0xff]  ;;  %s3245_s29 = smul.u32 %s5045_s22, %s3244_s13  ;;  %s3271_s13 = sshll.u32 %s387_s28, 4  ;;  %s7097_s13 = int_to_ptr.vmem [resolvable:$true] %s3271_s13 }
 0xd71   : > { %2912 = vmatprep.subr.mxu0 %v6555_v24  ;;  %4459 = vmatprep.subr.mxu1 %v7256_v38 }
 0xd72   : > { %2913 = vmatpush1.msra.mxu0 %v6560_v1  ;;  %4460 = vmatpush3.msra.mxu1 %v6697_v47  ;;  %s3246_s6 = sadd.s32 %s5041_s21, %s3245_s29  ;;  %s3671_s21 = sshll.u32 %s5045_s22, 7 }
 0xd73   : > { %2914 = vmatprep.subr.mxu0 %v6565_v48  ;;  %4461 = vmatprep.subr.mxu1 %v7256_v38 }
 0xd74   : > { %2915 = vmatpush1.msra.mxu0 %v6570_v54  ;;  %4462 = vmatpush3.msra.mxu1 %v6704_v10 }
 0xd75   : > { %2916 = vmatprep.subr.mxu0 %v6575_v36  ;;  %4463 = vmatprep.subr.mxu1 %v7256_v38 }
 0xd76   : > { %2917 = vmatpush1.msra.mxu0 %v6580_v2  ;;  %4464 = vmatpush3.msra.mxu1 %v6711_v49 }
 0xd77   : > { %2918 = vmatprep.subr.mxu0 %v6585_v29  ;;  %4465 = vmatprep.subr.mxu1 %v7256_v38 }
 0xd78   : > { %2919 = vmatpush1.msra.mxu0 %v6590_v3  ;;  %4466 = vmatpush3.msra.mxu1 %v6718_v13 }
 0xd79   : > { %2920 = vmatprep.subr.mxu0 %v6595_v35  ;;  %4467 = vmatprep.subr.mxu1 %v7256_v38  ;;  %v4876_v35 = vld [vmem:[%s5338_s10 + $0x168] sm:$0xff] }
 0xd7a   : > { %2921 = vmatpush1.msra.mxu0 %v6600_v4  ;;  %4468 = vmatpush3.msra.mxu1 %v7306_v57  ;;  %v4877_v4 = vld [vmem:[%s5338_s10 + $0x178] sm:$0xff] }
 0xd7b   : > { %2922 = vmatprep.subr.mxu0 %v7307_v31  ;;  %4469 = vmatprep.subr.mxu1 %v7256_v38  ;;  %v4898_v31 = vld [vmem:[%s5338_s10 + $0x90] sm:$0xff] }
 0xd7c   : > { %2923 = vmatpush1.msra.mxu0 %v7308_v58  ;;  %2956 = vmatprep.mubr.f32.mxu0 %v7256_v38  ;;  %v4900_v58 = vld [vmem:[%s5338_s10 + $0x78] sm:$0xff] }
 0xd7d   : > { %4470 = vmatpush3.msra.mxu1 %v7309_v7  ;;  %4471 = vmatprep.mubr.msk.f32.mxu1 %vm5061_vm0, %v7256_v38 }
 0xd7e   : > { %3064 = vmatprep.subr.mxu0 %v7310_v59  ;;  %4474 = vmatprep.subr.mxu1 %v7256_v38  ;;  %v4902_v59 = vld [vmem:[%s5338_s10 + $0x60] sm:$0xff] }
 0xe1d   : > { %v2786_v9 = vpop.f32.mrf.mxu0  ;;  %v2857_v8 = vpop.f32.mrf.mxu1 }
 0xe1e   : > { %v2787_v6 = vadd.f32 %v2786_v9, %v5638_v39  ;;  %v2858_v63 = vadd.f32 %v2857_v8, %v5644_v40  ;;  %v4906_v9 = vld [vmem:[%s5338_s10 + $0x30] sm:$0xff]  ;;  %v4908_v8 = vld [vmem:[%s5338_s10 + $0x18] sm:$0xff] }
 0xe1f   : > { %v4438_v60 = vpop.f32.mrf.mxu1  ;;  %v2788_v11 = vpop.f32.mrf.mxu0 }
 0xe20   : > { %v2861_v14 = vadd.f32 %v3642_v32, %v2787_v6  ;;  %v2789_v12 = vadd.f32 %v2788_v11, %v7261_v53  ;;  %v4904_v32 = vld [vmem:[%s5338_s10 + $0x48] sm:$0xff]  ;;  %v4910_v6 = vld [vmem:[%s5338_s10] sm:$0xff] }
 0xe22   : > { %v3645_v50 = vmul.f32 -1.442695, %v2861_v14  ;;  %v2868_v17 = vadd.f32 %v3643_v15, %v2789_v12 }
 0xe24   : > { %4750 = vpow2.f32 %v3645_v50  ;;  %v3646_v21 = vmul.f32 -1.442695, %v2868_v17 }
 0xe26   : > { %4752 = vpow2.f32 %v3646_v21  ;;  %v3651_v21 = vld [vmem:[%s3438_s5 + $0x158] sm:$0xff] }
 0xe31   : > { %v4751_v18 = vpop.eup %4750 }
 0xe32   : > { %v2865_v61 = vadd.f32 1.0, %v4751_v18 }
 0xe33   : > { %v4753_v20 = vpop.eup %4752 }
 0xe34   : > { %4754 = vrcp.f32 %v2865_v61  ;;  %v2872_v48 = vadd.f32 1.0, %v4753_v20 }
 0xe41   : > { %v4755_v62 = vpop.eup %4754 }
 0xe42   : > { %v2875_v24 = vmul.f32 %v4755_v62, %v2858_v63 }
 0xe44   : > { %v2876_v1 = vadd.f32 %v3644_v0, %v2875_v24  ;;  %v3652_v0 = vld [vmem:[%s3438_s5 + $0x160] sm:$0xff] }
 0xe46   : > { %4756 = vtanh.f32 %v2876_v1 }
 0xe47   : > { %4758 = vrcp.f32 %v2872_v48 }
 0xe53   : > { %v4757_v54 = vpop.eup %4756 }
 0xe54   : > { %v2878_v36 = vsub.f32 %v6911_v16, %v4757_v54  ;;  %v4759_v2 = vpop.eup %4758  ;;  %v4896_v16 = vld [vmem:[%s5338_s10 + $0xa8] sm:$0xff] }
 0xe56   : > { %v2879_v29 = vmul.f32 %v4759_v2, %v2878_v36 }
 0xe58   : > { %v6991_v3 = vadd.f32 %v4757_v54, %v2879_v29 }
 0xe5a   : > { %3648 = vst [vmem:[%s3434_s11 + $0x68] sm:$0xff] %v6991_v3  ;;  %2957 = vmatmul.mubr.f32.vlgmr.msra.gmra.mxu0 %v6991_v3  ;;  %4472 = vmatmul.mubr.f32.vlgmr.msra.gmra.mxu1 %v6991_v3  ;;  %s3676_s11 = sshll.u32 %s3246_s6, 5 }
 0xe5b   : > { %3065 = vmatpush1.msra.mxu0 %v4876_v35  ;;  %4475 = vmatpush3.msra.mxu1 %v4877_v4  ;;  %v3658_v4 = vld [vmem:[%s3446_s24 + $0x168] sm:$0xff]  ;;  %s3252_s26 = sadd.s32 %s5045_s22, %s3676_s11  ;;  %s3231_s11 = scalar_lea.sflag [#allocation5], %s5324_s14 }
 0xe5c   : > { %3066 = vmatprep.subr.mxu0 %v4878_v27  ;;  %4476 = vmatprep.subr.mxu1 %v7256_v38 }
 0xe5d   : > { %3067 = vmatpush1.msra.mxu0 %v4879_v26  ;;  %4477 = vmatpush3.msra.mxu1 %v4880_v41 }
 0xe5e   : > { %3068 = vmatprep.subr.mxu0 %v4881_v5  ;;  %4478 = vmatprep.subr.mxu1 %v7256_v38 }
 0xe5f   : > { %3069 = vmatpush1.msra.mxu0 %v4882_v42  ;;  %4479 = vmatpush3.msra.mxu1 %v4883_v34 }
 0xe60   : > { %3070 = vmatprep.subr.mxu0 %v4884_v56  ;;  %4480 = vmatprep.subr.mxu1 %v7256_v38 }
 0xe61   : > { %3071 = vmatpush1.msra.mxu0 %v4885_v23  ;;  %4481 = vmatpush3.msra.mxu1 %v4886_v51  ;;  %v3659_v23 = vld [vmem:[%s3446_s24 + $0x170] sm:$0xff] }
 0xe62   : > { %3072 = vmatprep.subr.mxu0 %v4887_v19  ;;  %4482 = vmatprep.subr.mxu1 %v7256_v38 }
 0xe63   : > { %3073 = vmatpush1.msra.mxu0 %v4888_v46  ;;  %4483 = vmatpush3.msra.mxu1 %v6655_v30  ;;  %v4893_v30 = vld [vmem:[%s5338_s10 + $0xc8] sm:$0xff] }
 0xe64   : > { %3074 = vmatprep.subr.mxu0 %v4889_v52  ;;  %4484 = vmatprep.subr.mxu1 %v7256_v38 }
 0xe65   : > { %3075 = vmatpush1.msra.mxu0 %v4890_v22  ;;  %4485 = vmatpush3.msra.mxu1 %v6662_v37  ;;  %v4895_v37 = vld [vmem:[%s5338_s10 + $0xb0] sm:$0xff] }
 0xe66   : > { %3076 = vmatprep.subr.mxu0 %v4891_v25  ;;  %4486 = vmatprep.subr.mxu1 %v7256_v38 }
 0xe67   : > { %3077 = vmatpush1.msra.mxu0 %v4892_v55  ;;  %4487 = vmatpush3.msra.mxu1 %v6669_v44  ;;  %v4897_v44 = vld [vmem:[%s5338_s10 + $0x98] sm:$0xff] }
 0xe68   : > { %3078 = vmatprep.subr.mxu0 %v4893_v30  ;;  %4488 = vmatprep.subr.mxu1 %v7256_v38  ;;  %v3660_v55 = vld [vmem:[%s3446_s24 + $0x178] sm:$0xff] }
 0xe69   : > { %3079 = vmatpush1.msra.mxu0 %v4894_v28  ;;  %4489 = vmatpush3.msra.mxu1 %v6676_v43  ;;  %v4899_v43 = vld [vmem:[%s5338_s10 + $0x80] sm:$0xff] }
 0xe6a   : > { %3080 = vmatprep.subr.mxu0 %v4895_v37  ;;  %4490 = vmatprep.subr.mxu1 %v7256_v38 }
 0xe6b   : > { %3081 = vmatpush1.msra.mxu0 %v4896_v16  ;;  %4491 = vmatpush3.msra.mxu1 %v6683_v33  ;;  %v4901_v33 = vld [vmem:[%s5338_s10 + $0x68] sm:$0xff] }
 0xe6c   : > { %3082 = vmatprep.subr.mxu0 %v4897_v44  ;;  %4492 = vmatprep.subr.mxu1 %v7256_v38 }
 0xe6d   : > { %3083 = vmatpush1.msra.mxu0 %v4898_v31  ;;  %4493 = vmatpush3.msra.mxu1 %v6690_v45  ;;  %v4903_v45 = vld [vmem:[%s5338_s10 + $0x50] sm:$0xff] }
 0xe6e   : > { %3084 = vmatprep.subr.mxu0 %v4899_v43  ;;  %4494 = vmatprep.subr.mxu1 %v7256_v38 }
 0xe6f   : > { %3085 = vmatpush1.msra.mxu0 %v4900_v58  ;;  %4495 = vmatpush3.msra.mxu1 %v6697_v47  ;;  %v4905_v47 = vld [vmem:[%s5338_s10 + $0x38] sm:$0xff] }
 0xe70   : > { %3086 = vmatprep.subr.mxu0 %v4901_v33  ;;  %4496 = vmatprep.subr.mxu1 %v7256_v38 }
 0xe71   : > { %3087 = vmatpush1.msra.mxu0 %v4902_v59  ;;  %4497 = vmatpush3.msra.mxu1 %v6704_v10  ;;  %v4907_v10 = vld [vmem:[%s5338_s10 + $0x20] sm:$0xff] }
 0xe72   : > { %3088 = vmatprep.subr.mxu0 %v4903_v45  ;;  %4498 = vmatprep.subr.mxu1 %v7256_v38 }
 0xe73   : > { %3089 = vmatpush1.msra.mxu0 %v4904_v32  ;;  %4499 = vmatpush3.msra.mxu1 %v6711_v49  ;;  %v4909_v49 = vld [vmem:[%s5338_s10 + $0x8] sm:$0xff]  ;;  %s3655_s10 = smul.u32 4294967192, %s5045_s22  ;;  %s5062_s22 = smov [#allocation4]  }
 0xe74   : > { %3090 = vmatprep.subr.mxu0 %v4905_v47  ;;  %4500 = vmatprep.subr.mxu1 %v7256_v38 }
 0xe75   : > { %3091 = vmatpush1.msra.mxu0 %v4906_v9  ;;  %4501 = vmatpush3.msra.mxu1 %v6718_v13  ;;  %v3650_v13 = vld [vmem:[%s3438_s5 + $0x150] sm:$0xff]  ;;  %s3442_s7 = scalar_lea.vmem %s5347_s19, %s3655_s10 [#allocation4]  ;;  %s3670_s5 = sshll.u32 %s3252_s26, 7 }
 0xe76   : > { %3092 = vmatprep.subr.mxu0 %v4907_v10  ;;  %4502 = vmatprep.subr.mxu1 %v7256_v38  ;;  %s3255_s10 = sshll.u32 %s5347_s19, 4  ;;  %s7085_s20 = scalar_lea.hbm %s7189_s3, %s3670_s5  ;;  %s7087_s10 = int_to_ptr.vmem [resolvable:$true] %s3255_s10 }
 0xe77   : > { %3093 = vmatpush1.msra.mxu0 %v4908_v8  ;;  %4503 = vmatpush3.msra.mxu1 %v7306_v57  ;;  %s4911_s26 = scalar_lea.vmem %s7087_s10, 2048  ;;  %s4915_s5 = sshll.u32 %s5062_s22, 4  ;;  %s4916_s5 = int_to_ptr.vmem [resolvable:$false] %s4915_s5 }
 0xe78   : > { %3094 = vmatprep.subr.mxu0 %v4909_v49  ;;  %4504 = vmatprep.subr.mxu1 %v7256_v38  ;;  %p4912_p9 = scmp.ne.s32.totalorder %s7087_s10, %s4911_s26  ;;  %s4917_s0 = scalar_lea.vmem %s4916_s5, 4096 }
 0xe79   : > { %3095 = vmatpush1.msra.mxu0 %v4910_v6  ;;  %3128 = vmatprep.mubr.f32.mxu0 %v7256_v38  ;;  %p4918_p0 = scmp.lt.s32.totalorder %s7087_s10, %s4916_s5  ;;  %p4919_p2 = scmp.lt.s32.totalorder %s4917_s0, %s4911_s26 }
 0xe7a   : > { %4505 = vmatpush3.msra.mxu1 %v7309_v7  ;;  %4506 = vmatprep.mubr.msk.f32.mxu1 %vm5061_vm0, %v7256_v38  ;;  %p4913_p10 = pnand %p4912_p9, %p5179_p6 }
 0xe7b   : > { %p4920_p3 = por %p4919_p2, %p4918_p0 }
 0xe7c   : > { %p4914_p12 = pneg %p4913_p10 }
 0xe7e   : > { %p4921_p4 = pnand %p4920_p3, %p4914_p12 }
 0xf1a   : > { %v2958_v60 = vpop.f32.mrf.mxu0  ;;  %v3029_v14 = vpop.f32.mrf.mxu1 }
 0xf1b   : > { %v2959_v57 = vadd.f32 %v2958_v60, %v5638_v39  ;;  %v3030_v63 = vadd.f32 %v3029_v14, %v5644_v40 }
 0xf1c   : > { %v4473_v50 = vpop.f32.mrf.mxu1  ;;  %v2960_v15 = vpop.f32.mrf.mxu0 }
 0xf1d   : > { %v3033_v11 = vadd.f32 %v3650_v13, %v2959_v57  ;;  %v2961_v17 = vadd.f32 %v2960_v15, %v7261_v53 }
 0xf1f   : > { %v3653_v12 = vmul.f32 -1.442695, %v3033_v11  ;;  %v3040_v18 = vadd.f32 %v3651_v21, %v2961_v17 }
 0xf21   : > { %4760 = vpow2.f32 %v3653_v12  ;;  %v3654_v7 = vmul.f32 -1.442695, %v3040_v18 }
 0xf23   : > { %4762 = vpow2.f32 %v3654_v7 }
 0xf2e   : > { %v4761_v61 = vpop.eup %4760 }
 0xf2f   : > { %v3037_v38 = vadd.f32 1.0, %v4761_v61 }
 0xf30   : > { %v4763_v20 = vpop.eup %4762 }
 0xf31   : > { %4764 = vrcp.f32 %v3037_v38  ;;  %v3044_v48 = vadd.f32 1.0, %v4763_v20 }
 0xf3e   : > { %v4765_v62 = vpop.eup %4764 }
 0xf3f   : > { %v3047_v24 = vmul.f32 %v4765_v62, %v3030_v63 }
 0xf41   : > { %v3048_v1 = vadd.f32 %v3652_v0, %v3047_v24 }
 0xf43   : > { %4766 = vtanh.f32 %v3048_v1 }
 0xf44   : > { %4768 = vrcp.f32 %v3044_v48 }
 0xf50   : > { %v4767_v54 = vpop.eup %4766 }
 0xf51   : > { %v3050_v36 = vsub.f32 %v6991_v3, %v4767_v54  ;;  %v4769_v2 = vpop.eup %4768 }
 0xf53   : > { %v3051_v29 = vmul.f32 %v4769_v2, %v3050_v36 }
 0xf55   : > { %v3052_v35 = vadd.f32 %v4767_v54, %v3051_v29 }
 0xf57   : > { %3129 = vmatmul.mubr.f32.vlgmr.msra.gmra.mxu0 %v3052_v35  ;;  %4507 = vmatmul.mubr.f32.vlgmr.msra.gmra.mxu1 %v3052_v35  ;;  %3656 = vst [vmem:[%s3442_s7 + $0x70] sm:$0xff] %v3052_v35  ;;  %s3450_s7 = scalar_lea.vmem %s5347_s19, %s3617_s9 [#allocation4]  ;;  %s7311_s9 = sld [smem:[#allocation24_spill]] }
 0xf5d   : > { %s7095_s6 = scalar_lea.hbm %s7311_s9, %s3671_s21 }
0x1017   : > { %v3130_v27 = vpop.f32.mrf.mxu0  ;;  %v3201_v26 = vpop.f32.mrf.mxu1 }
0x1018   : > { %v3131_v41 = vadd.f32 %v3130_v27, %v5638_v39  ;;  %v3202_v22 = vadd.f32 %v3201_v26, %v5644_v40 }
0x1019   : > { %v4508_v5 = vpop.f32.mrf.mxu1  ;;  %v3132_v3 = vpop.f32.mrf.mxu0 }
0x101a   : > { %v3205_v42 = vadd.f32 %v3658_v4, %v3131_v41  ;;  %v3133_v56 = vadd.f32 %v3132_v3, %v7261_v53 }
0x101c   : > { %v3661_v34 = vmul.f32 -1.442695, %v3205_v42  ;;  %v3212_v51 = vadd.f32 %v3659_v23, %v3133_v56 }
0x101e   : > { %4770 = vpow2.f32 %v3661_v34  ;;  %v3662_v19 = vmul.f32 -1.442695, %v3212_v51 }
0x1020   : > { %4772 = vpow2.f32 %v3662_v19 }
0x102b   : > { %v4771_v46 = vpop.eup %4770 }
0x102c   : > { %v3209_v52 = vadd.f32 1.0, %v4771_v46 }
0x102d   : > { %v4773_v39 = vpop.eup %4772 }
0x102e   : > { %4774 = vrcp.f32 %v3209_v52  ;;  %v3216_v28 = vadd.f32 1.0, %v4773_v39 }
0x103b   : > { %v4775_v25 = vpop.eup %4774 }
0x103c   : > { %v3219_v53 = vmul.f32 %v4775_v25, %v3202_v22 }
0x103e   : > { %v3220_v30 = vadd.f32 %v3660_v55, %v3219_v53 }
0x1040   : > { %4776 = vtanh.f32 %v3220_v30 }
0x1041   : > { %4778 = vrcp.f32 %v3216_v28 }
0x104d   : > { %v4777_v40 = vpop.eup %4776 }
0x104e   : > { %v3222_v37 = vsub.f32 %v3052_v35, %v4777_v40  ;;  %v4779_v16 = vpop.eup %4778 }
0x1050   : > { %v3223_v44 = vmul.f32 %v4779_v16, %v3222_v37 }
0x1052   : > { %v3224_v31 = vadd.f32 %v4777_v40, %v3223_v44 }
0x1054   : > { %3228 = vst [vmem:[#allocation2] sm:$0xff] %v3224_v31  ;;  %3229 = vst [vmem:[%s387_s28] sm:$0xff] %v3224_v31 }
0x1055   : > { %3664 = vst [vmem:[%s3450_s7 + $0x78] sm:$0xff] %v3224_v31 }
0x1056   : > { %4924 = shalt.err (!%p4921_p4)
}
0x1057   : > { %s4925_s28 = scalar_lea.hbm %s7085_s20, 2048  ;;  %s4929_s24 = scalar_lea.hbm %s7189_s3, 8192 }
0x1058   : > { %p4926_p5 = scmp.ne.s32.totalorder %s7085_s20, %s4925_s28  ;;  %p4930_p9 = scmp.lt.s32.totalorder %s7085_s20, %s7189_s3 }
0x1059   : > { %p4931_p10 = scmp.lt.s32.totalorder %s4929_s24, %s4925_s28 }
0x105a   : > { %p4927_p7 = pnand %p4926_p5, %p5179_p6 }
0x105b   : > { %p4932_p12 = por %p4931_p10, %p4930_p9 }
0x105c   : > { %p4928_p8 = pneg %p4927_p7 }
0x105e   : > { %p4933_p0 = pnand %p4932_p12, %p4928_p8 }
0x1060   : > { %4936 = shalt.err (!%p4933_p0)
}
0x1061   : > { %s5063_s19 = smov 128   ;;  %s5064_s26 = smov 256  }
0x1062   : > { %s5065_s22 = smov 8   ;;  %s7312_s5 = sand.u32 1, %s5021_s16  }
0x1063   : > { %4514 = dma.vmem_to_hbm [thread:$0]  (%p5179_p6), %s7087_s10, 2048, %s7085_s20, %s3231_s11, %s5063_s19, %s5064_s26, %s5065_s22  }
0x1064   : > { %s3236_s0 = scalar_lea.sflag [#allocation7], %s7312_s5  ;;  %s4937_s28 = scalar_lea.vmem %s7097_s13, 128 }
0x1065   : > { %p4938_p2 = scmp.ne.s32.totalorder %s7097_s13, %s4937_s28  ;;  %s5066_s12 = smov [#allocation6]  }
0x1066   : > { %s4941_s7 = sshll.u32 %s5066_s12, 4  ;;  %s4942_s7 = int_to_ptr.vmem [resolvable:$false] %s4941_s7 }
0x1067   : > { %p4939_p3 = pnand %p4938_p2, %p5202_p13  ;;  %s4943_s24 = scalar_lea.vmem %s4942_s7, 256 }
0x1068   : > { %p4944_p5 = scmp.lt.s32.totalorder %s7097_s13, %s4942_s7  ;;  %p4945_p7 = scmp.lt.s32.totalorder %s4943_s24, %s4937_s28 }
0x1069   : > { %p4940_p4 = pneg %p4939_p3 }
0x106a   : > { %p4946_p8 = por %p4945_p7, %p4944_p5 }
0x106c   : > { %p4947_p9 = pnand %p4946_p8, %p4940_p4 }
0x106e   : > { %4950 = shalt.err (!%p4947_p9)
}
0x106f   : > { %s4951_s30 = scalar_lea.hbm %s7095_s6, 128  ;;  %s4955_s20 = scalar_lea.hbm %s7311_s9, 256 }
0x1070   : > { %p4952_p6 = scmp.ne.s32.totalorder %s7095_s6, %s4951_s30  ;;  %p4956_p0 = scmp.lt.s32.totalorder %s7095_s6, %s7311_s9 }
0x1071   : > { %p4957_p2 = scmp.lt.s32.totalorder %s4955_s20, %s4951_s30 }
0x1072   : > { %p4953_p10 = pnand %p4952_p6, %p5202_p13 }
0x1073   : > { %p4958_p3 = por %p4957_p2, %p4956_p0 }
0x1074   : > { %p4954_p12 = pneg %p4953_p10 }
0x1076   : > { %p4959_p4 = pnand %p4958_p3, %p4954_p12 }
0x1078   : > { %4962 = shalt.err (!%p4959_p4)
}
0x1079   : > { %4515 = dma.vmem_to_hbm [thread:$0]  (%p5202_p13), %s7097_s13, 128, %s7095_s6, %s3236_s0  }
0x107a PF: > { %p4525_p5 = scmp.ge.s32.totalorder %s5057_s25, 2  ;;  %s3283_s29 = sand.u32 1, %s5029_s18  }
0x107b   : > { %s3284_s19 = scalar_lea.sflag [#allocation5], %s3283_s29 }
0x107c   : > { %p4519_p7 = pnand %p4525_p5, %p5187_p11 }
0x107e   : > { %p4520_p8 = pneg %p4519_p7 }
0x1080   : > { %5008 = dma.done.wait (%p4520_p8), %s3284_s19, 2048  }
0x1081   : > { %5010 = vsyncadd (%p4520_p8), %s3284_s19, 4294965248  ;;  %s3292_s26 = sand.u32 1, %s5017_s15   ;;  %p4522_p9 = pnand %p4525_p5, %p5208_p1 }
0x1082   : > { %s3293_s4 = scalar_lea.sflag [#allocation7], %s3292_s26 }
0x1083   : > { %p4523_p6 = pneg %p4522_p9 }
0x1085   : > { %5012 = dma.done.wait (%p4523_p6), %s3293_s4, 128  }
0x1086   : > { %5014 = vsyncadd (%p4523_p6), %s3293_s4, 4294967168  ;;  %s21_s25 = sadd.s32 1, %s5057_s25   ;;  %s7313_s18 = sld [smem:[#allocation10_spill]] }
0x1087   : > { %p18_p13 = scmp.ge.s32.totalorder %s21_s25, 6   ;;  %s7314_s19 = sld [smem:[#allocation11_spill]] }
0x1088   : > { %s7315_s20 = sld [smem:[#allocation16_spill]]  ;;  %s7320_s15 = smov %s5021_s16 }
0x1089   : > { %s7316_s21 = sld [smem:[#allocation12_spill]]  ;;  %s7321_s16 = smov %s5025_s17 }
0x108a   : > { %s7317_s22 = sld [smem:[#allocation13_spill]]  ;;  %s7322_s17 = smov %s5198_s23 }
0x108b   : > { %s7318_s8 = sld [smem:[#allocation14_spill]] }
0x108c   : > { %s7319_s24 = sld [smem:[#allocation15_spill]] }
0x108d   :  { %20 = sbr.rel (!%p18_p13) target bundleno = 12 (0xc), region = 154 }
0x1091   : > { %s7323_s23 = smov %s7318_s8 }
0x1092   :  { %3298 = vsyncpa [#allocation5], 1 }
0x1093   :  { %3300 = vsyncpa [#allocation5 + $0x1], 1 }
0x1094   :  { %3301 = vsyncpa [#allocation7], 1 }
0x1095   :  { %3303 = vsyncpa [#allocation7 + $0x1], 1 }

</bundles_post_ra>
